<compile_context>
chip_gen: v6e
topology: v6e:2x2x1
jax: 0.10.0
libtpu: 0.0.40
codegen_flags: <defaults>
</compile_context>

<pallas_src>
import math
import numpy as np
import jax
import jax.numpy as jnp
from jax import lax
from jax.experimental import pallas as pl

# ----------------------------- model hyper-params -----------------------------
MODEL_SIZE = 32
NUM_HEAD = 4
FF_SIZE = 32
EDGE_DIM = 32
ENCODER_LAYERS = 2
TANH_XPLOR = 10.0
CUSTOMER_FEATURE = 3
VEHICLE_FEATURE = 4
NUM_CUSTOMERS = 8            # -> N = 9 nodes (depot + customers)
NUM_VEHICLES = 3
BATCH = 2
NSEL = 1                     # vehicles selected per step

N_NODES = NUM_CUSTOMERS + 1
ROWS_N = BATCH * N_NODES     # 18
ROWS_V = BATCH * NUM_VEHICLES  # 6
ROWS_S = BATCH * NSEL        # 2
HEAD_DIM = MODEL_SIZE // NUM_HEAD

_NEG = -1e30
_BN_EPS = 1e-5
LANES = 128


# ----------------------------- weight-slab layout ------------------------------
def _ceil8(x):
    return -(-x // 8) * 8


_VEC_NAMES = ["bnn_g", "bnn_b", "edge_w", "bne_g", "bne_b", "cproj_b",
              "fleet_bq", "fleet_bkv", "fleet_bo", "veh_bq", "veh_bkv", "veh_bo",
              "crit_b1", "crit_b2"]
for _l in range(ENCODER_LAYERS):
    _VEC_NAMES += [f"enc{_l}_{s}" for s in
                   ("bqkv", "bo", "be", "fb1", "fb2", "g1", "b1", "g2", "b2")]
VEC_IDX = {n: i for i, n in enumerate(_VEC_NAMES)}
NUM_VECS = len(_VEC_NAMES)


def _build_layout():
    D, H, E, FS = MODEL_SIZE, NUM_HEAD, EDGE_DIM, FF_SIZE
    F, VF = CUSTOMER_FEATURE, VEHICLE_FEATURE
    entries = [
        ("emb_w", 2 * F, D),          # block-diag [depot_w ; cust_w]
        ("emb_b", ROWS_N, D),         # per-row embedding bias (depot vs customer)
        ("cproj_w", D, D),
        ("fleet_wq", VF, D),
        ("fleet_wkv", D, 2 * D),
        ("fleet_wo", D, D),
        ("veh_wq", D, D),
        ("veh_wkv", D, 2 * D),
        ("veh_wo", D, D),
        ("crit_w1", N_NODES, FS),
        ("crit_w2", FS, 1),
        ("bias_nodes", ROWS_N, ROWS_N),   # cross-batch -inf mask (encoder attention)
        ("bias_fleet", ROWS_V, ROWS_N),   # cross-batch -inf mask (fleet attention)
        ("bias_veh", ROWS_S, ROWS_V),     # cross-batch -inf mask (vehicle attention)
        ("sel_mat", ROWS_N, N_NODES),     # fold batch blocks -> per-customer columns
    ]
    for l in range(ENCODER_LAYERS):
        entries += [
            (f"enc{l}_wqkv", D, 3 * D),
            (f"enc{l}_wo", D, D),
            (f"enc{l}_we", E, H),
            (f"enc{l}_fw1", D, FS),
            (f"enc{l}_fw2", FS, D),
        ]
    entries.append(("vecs", NUM_VECS, LANES))
    layout, row = {}, 0
    for name, r, c in entries:
        layout[name] = (row, r, c)
        row += _ceil8(r)
    return layout, _ceil8(row)


LAYOUT, W_ROWS = _build_layout()


# ----------------------------- parameter init ---------------------------------
def init_linear(key, fan_in, fan_out, scale=0.1):
    kw, kb = jax.random.split(key)
    w = scale * jax.random.normal(kw, (fan_in, fan_out), jnp.float32)
    b = scale * jax.random.normal(kb, (1, fan_out), jnp.float32)
    return w, b


def init_params(key):
    keys = iter(jax.random.split(key, 64))
    D, E = MODEL_SIZE, EDGE_DIM
    F, VF, FS = CUSTOMER_FEATURE, VEHICLE_FEATURE, FF_SIZE
    N = N_NODES
    L = ENCODER_LAYERS

    p = {
        "depot_emb": init_linear(next(keys), F, D),
        "cust_emb": init_linear(next(keys), F, D),
        "edge_w": 0.1 * jax.random.normal(next(keys), (1, E), jnp.float32),
        "bn_nodes": (jnp.ones((1, D), jnp.float32), jnp.zeros((1, D), jnp.float32)),
        "bn_edges": (jnp.ones((1, E), jnp.float32), jnp.zeros((1, E), jnp.float32)),
        "cust_proj": init_linear(next(keys), D, D),
        "fleet_wq": init_linear(next(keys), VF, D),
        "fleet_wkv": init_linear(next(keys), D, 2 * D),
        "fleet_wo": init_linear(next(keys), D, D),
        "veh_wq": init_linear(next(keys), D, D),
        "veh_wkv": init_linear(next(keys), D, 2 * D),
        "veh_wo": init_linear(next(keys), D, D),
        "critic": init_linear(next(keys), N, FS) + init_linear(next(keys), FS, 1),
    }

    def stack(fn):
        ws, bs = zip(*[fn(next(keys)) for _ in range(L)])
        return jnp.stack(ws), jnp.stack(bs)

    p["enc_wqkv"], p["enc_bqkv"] = stack(lambda k: init_linear(k, D, 3 * D))
    p["enc_wo"], p["enc_bo"] = stack(lambda k: init_linear(k, D, D))
    p["enc_we"], p["enc_be"] = stack(lambda k: init_linear(k, E, NUM_HEAD))
    p["enc_ffw1"], p["enc_ffb1"] = stack(lambda k: init_linear(k, D, FS))
    p["enc_ffw2"], p["enc_ffb2"] = stack(lambda k: init_linear(k, FS, D))
    p["enc_bn1g"] = jnp.ones((L, 1, D), jnp.float32)
    p["enc_bn1b"] = jnp.zeros((L, 1, D), jnp.float32)
    p["enc_bn2g"] = jnp.ones((L, 1, D), jnp.float32)
    p["enc_bn2b"] = jnp.zeros((L, 1, D), jnp.float32)
    return p


# ----------------------------- one-time weight packing --------------------------
def pack_params(params):
    """Packs every weight / bias / BN param / constant mask into a single (W_ROWS, 128)
    f32 slab (one HBM->VMEM DMA).  Done once, outside jit."""
    slab = np.zeros((W_ROWS, LANES), np.float32)

    def put(name, arr):
        r0, r, c = LAYOUT[name]
        a = np.asarray(arr, np.float32)
        assert a.shape == (r, c), (name, a.shape, (r, c))
        slab[r0:r0 + r, 0:c] = a

    def putv(name, arr):
        r0, _, _ = LAYOUT["vecs"]
        a = np.asarray(arr, np.float32).reshape(-1)
        slab[r0 + VEC_IDX[name], 0:a.shape[0]] = a

    depot_w, depot_b = params["depot_emb"]
    cust_w, cust_b = params["cust_emb"]
    put("emb_w", np.concatenate([np.asarray(depot_w), np.asarray(cust_w)], axis=0))
    dmask = (np.arange(ROWS_N) % N_NODES == 0).astype(np.float32)[:, None]
    put("emb_b", dmask * np.asarray(depot_b) + (1.0 - dmask) * np.asarray(cust_b))

    put("cproj_w", params["cust_proj"][0]); putv("cproj_b", params["cust_proj"][1])
    put("fleet_wq", params["fleet_wq"][0]); putv("fleet_bq", params["fleet_wq"][1])
    put("fleet_wkv", params["fleet_wkv"][0]); putv("fleet_bkv", params["fleet_wkv"][1])
    put("fleet_wo", params["fleet_wo"][0]); putv("fleet_bo", params["fleet_wo"][1])
    put("veh_wq", params["veh_wq"][0]); putv("veh_bq", params["veh_wq"][1])
    put("veh_wkv", params["veh_wkv"][0]); putv("veh_bkv", params["veh_wkv"][1])
    put("veh_wo", params["veh_wo"][0]); putv("veh_bo", params["veh_wo"][1])

    cw1, cb1, cw2, cb2 = params["critic"]
    put("crit_w1", cw1); putv("crit_b1", cb1)
    put("crit_w2", cw2); putv("crit_b2", cb2)

    putv("edge_w", params["edge_w"])
    putv("bnn_g", params["bn_nodes"][0]); putv("bnn_b", params["bn_nodes"][1])
    putv("bne_g", params["bn_edges"][0]); putv("bne_b", params["bn_edges"][1])  # bne_b unused (softmax-invariant)

    for l in range(ENCODER_LAYERS):
        put(f"enc{l}_wqkv", params["enc_wqkv"][l]); putv(f"enc{l}_bqkv", params["enc_bqkv"][l])
        put(f"enc{l}_wo", params["enc_wo"][l]); putv(f"enc{l}_bo", params["enc_bo"][l])
        put(f"enc{l}_we", params["enc_we"][l]); putv(f"enc{l}_be", params["enc_be"][l])  # be unused (softmax-invariant)
        put(f"enc{l}_fw1", params["enc_ffw1"][l]); putv(f"enc{l}_fb1", params["enc_ffb1"][l])
        put(f"enc{l}_fw2", params["enc_ffw2"][l]); putv(f"enc{l}_fb2", params["enc_ffb2"][l])
        putv(f"enc{l}_g1", params["enc_bn1g"][l]); putv(f"enc{l}_b1", params["enc_bn1b"][l])
        putv(f"enc{l}_g2", params["enc_bn2g"][l]); putv(f"enc{l}_b2", params["enc_bn2b"][l])

    # structural constants (cross-batch masks, batch-block fold matrix)
    nb = np.repeat(np.arange(BATCH), N_NODES)
    vb = np.repeat(np.arange(BATCH), NUM_VEHICLES)
    sb = np.repeat(np.arange(BATCH), NSEL)
    put("bias_nodes", np.where(nb[:, None] == nb[None, :], 0.0, _NEG).astype(np.float32))
    put("bias_fleet", np.where(vb[:, None] == nb[None, :], 0.0, _NEG).astype(np.float32))
    put("bias_veh", np.where(sb[:, None] == vb[None, :], 0.0, _NEG).astype(np.float32))
    col_within = np.arange(ROWS_N) % N_NODES
    put("sel_mat", (col_within[:, None] == np.arange(N_NODES)[None, :]).astype(np.float32))

    return jnp.asarray(slab)


# ----------------------------- fused forward ----------------------------------
def model_forward(w_slab, nodes, edge_attr, vehicles, veh_idx, cust_mask):
    B, N, nf = nodes.shape
    nv = vehicles.shape[1]
    vf = vehicles.shape[2]
    nsel = veh_idx.shape[1]
    D, Hn, FS, L = MODEL_SIZE, NUM_HEAD, FF_SIZE, ENCODER_LAYERS
    dk = D // Hn
    rows_n, rows_v, rows_s = B * N, B * nv, B * nsel
    f32 = jnp.float32
    inv_sqrt_dk = 1.0 / math.sqrt(dk)
    scale_score = math.sqrt(D)              # reference: compact *= model_size ** 0.5

    # ------- tiny XLA-side slab assembly (only 2 data-dependent kernel operands) -------
    dmask = jnp.asarray((np.arange(rows_n) % N == 0).astype(np.float32))[:, None]
    nodes2d = nodes.reshape(rows_n, nf).astype(f32)
    nodes_cat = jnp.concatenate([nodes2d * dmask, nodes2d * (1.0 - dmask)], axis=1)   # (18, 2F)
    edges3 = edge_attr.reshape(B, N, N).astype(f32)
    ri = np.arange(rows_n)
    # block-diagonal raw edge attributes; cross-batch entries are masked downstream
    eblock = edges3[ri[:, None] // N, ri[:, None] % N, ri[None, :] % N]               # (18, 18)
    x_slab = jnp.concatenate([nodes_cat, eblock], axis=1)                             # (18, 2F+18)

    vehicles2d = vehicles.reshape(rows_v, vf).astype(f32)
    flat_v = (jnp.arange(B, dtype=jnp.int32)[:, None] * nv
              + veh_idx.astype(jnp.int32)).reshape(rows_s)
    gather_oh = jax.nn.one_hot(flat_v, rows_v, dtype=f32)                              # (2, 6)
    in_block = jnp.where(cust_mask.reshape(rows_s, N), _NEG, 0.0).astype(f32)          # (2, 9)
    sb = np.repeat(np.arange(B), nsel)
    nbv = np.repeat(np.arange(B), N)
    col_within = np.arange(rows_n) % N
    score_bias = jnp.where(jnp.asarray(sb[:, None] == nbv[None, :]),
                           in_block[:, col_within], _NEG).astype(f32)                  # (2, 18)
    small = jnp.concatenate([gather_oh, score_bias], axis=1)                           # (2, 24)
    small = jnp.pad(small, ((0, rows_v - rows_s), (0, 0)))                             # (6, 24)
    y_slab = jnp.concatenate([vehicles2d, small], axis=1)                              # (6, VF+24)

    vrow = LAYOUT["vecs"][0]
    out_pad = LANES - (3 + N)

    # ------------------------------ the single fused kernel ------------------------------
    def kernel(w_ref, x_ref, y_ref, o_ref):
        def mm(a, b):
            return jnp.dot(a, b, preferred_element_type=jnp.float32)

        def mm_t(a, b):                      # a @ b.T (contract last dims)
            return lax.dot_general(a, b, (((1,), (1,)), ((), ())),
                                   preferred_element_type=jnp.float32)

        def W(name):                         # static 8-row-aligned slice of the weight slab
            r0, r, c = LAYOUT[name]
            return w_ref[r0:r0 + r, 0:c]

        vecs = w_ref[vrow:vrow + NUM_VECS, :]        # all (1, <=128) vectors, loaded once

        def vec(name, width):
            i = VEC_IDX[name]
            return vecs[i:i + 1, 0:width]

        def bn_rows(v, g, b):                # BatchNorm1d, train-mode batch stats over rows
            mu = jnp.mean(v, axis=0, keepdims=True)
            var = jnp.mean((v - mu) ** 2, axis=0, keepdims=True)
            return (v - mu) * lax.rsqrt(var + _BN_EPS) * g + b

        def softmax_rows(s, exact=False):
            s = s - jnp.max(s, axis=-1, keepdims=True)
            p = jnp.exp(s)
            den = jnp.sum(p, axis=-1, keepdims=True)
            if exact:
                return p / den
            return p * pl.reciprocal(den, approx=True)     # EUP slot, otherwise idle

        def mha(q, k, v, bias, alphas=None, eb=None):
            # per-head matmuls on traced values; head outputs concatenated once (no scratch)
            heads = []
            for hh in range(Hn):
                qh = q[:, hh * dk:(hh + 1) * dk]
                kh = k[:, hh * dk:(hh + 1) * dk]
                vh = v[:, hh * dk:(hh + 1) * dk]
                s = mm_t(qh, kh) * inv_sqrt_dk + bias
                if alphas is not None:
                    s = s + eb * alphas[0:1, hh:hh + 1]
                heads.append(mm(softmax_rows(s), vh))
            return jnp.concatenate(heads, axis=-1)

        x = x_ref[...]
        nodes_cat_k = x[:, 0:2 * nf]
        eblock_k = x[:, 2 * nf:2 * nf + rows_n]

        y = y_ref[...]
        veh_k = y[:, 0:vf]
        gather_k = y[0:rows_s, vf:vf + rows_v]
        sbias_k = y[0:rows_s, vf + rows_v:vf + rows_v + rows_n]

        # ---- node embeddings (depot/customer fused block-diag matmul) + BN ----
        h = mm(nodes_cat_k, W("emb_w")) + W("emb_b")
        h = bn_rows(h, vec("bnn_g", D), vec("bnn_b", D))

        # ---- edge path: Linear(1,E) + train-mode BN folded analytically into an affine
        #      map of the raw scalar edge attribute.  The constant part (edge-Linear bias,
        #      BN beta, per-head offset) is uniform per score row -> softmax-invariant -> dropped.
        inv_cnt = 1.0 / float(rows_n * rows_n)
        mean_a = jnp.sum(jnp.sum(eblock_k, axis=1, keepdims=True),
                         axis=0, keepdims=True) * inv_cnt
        dcen = eblock_k - mean_a
        var_a = jnp.sum(jnp.sum(dcen * dcen, axis=1, keepdims=True),
                        axis=0, keepdims=True) * inv_cnt
        ew = vec("edge_w", EDGE_DIM)
        t_vec = ew * vec("bne_g", EDGE_DIM) * lax.rsqrt(var_a * ew * ew + _BN_EPS)   # (1, E)

        bias_n = W("bias_nodes")

        # ---- graph encoder layers (edge-biased MHA + FF, residual + BN) ----
        for l in range(L):
            qkv = mm(h, W(f"enc{l}_wqkv")) + vec(f"enc{l}_bqkv", 3 * D)              # fused Q|K|V
            alphas = mm(t_vec, W(f"enc{l}_we"))                                      # (1, H)
            att = mha(qkv[:, 0:D], qkv[:, D:2 * D], qkv[:, 2 * D:3 * D],
                      bias_n, alphas=alphas, eb=dcen)
            a_out = mm(att, W(f"enc{l}_wo")) + vec(f"enc{l}_bo", D)
            h = bn_rows(h + a_out, vec(f"enc{l}_g1", D), vec(f"enc{l}_b1", D))
            ff = jnp.maximum(mm(h, W(f"enc{l}_fw1")) + vec(f"enc{l}_fb1", FS), 0.0)
            ff = mm(ff, W(f"enc{l}_fw2")) + vec(f"enc{l}_fb2", D)
            h = bn_rows(h + ff, vec(f"enc{l}_g2", D), vec(f"enc{l}_b2", D))

        # ---- customer projection + fleet attention (K|V from encoding, Q from vehicles) ----
        crep = mm(h, W("cproj_w")) + vec("cproj_b", D)                               # (B*N, D)
        fkv = mm(h, W("fleet_wkv")) + vec("fleet_bkv", 2 * D)                        # (B*N, 2D)
        fq = mm(veh_k, W("fleet_wq")) + vec("fleet_bq", D)                           # (B*nv, D)
        fatt = mha(fq, fkv[:, 0:D], fkv[:, D:2 * D], W("bias_fleet"))
        fleet_rep = mm(fatt, W("fleet_wo")) + vec("fleet_bo", D)                     # (B*nv, D)

        # ---- vehicle attention: query = currently selected vehicle (one-hot gather) ----
        vq_in = mm(gather_k, fleet_rep)                                              # (B*nsel, D)
        vq = mm(vq_in, W("veh_wq")) + vec("veh_bq", D)
        vkv = mm(fleet_rep, W("veh_wkv")) + vec("veh_bkv", 2 * D)                    # (B*nv, 2D)
        vatt = mha(vq, vkv[:, 0:D], vkv[:, D:2 * D], W("bias_veh"))
        veh_rep = mm(vatt, W("veh_wo")) + vec("veh_bo", D)                           # (B*nsel, D)

        # ---- score_customers + get_prop (bmm * sqrt(D) -> tanh_xplor*tanh -> mask -> softmax) ----
        sc = mm_t(veh_rep, crep) * scale_score
        sc = TANH_XPLOR * jnp.tanh(sc) + sbias_k
        prop_full = softmax_rows(sc, exact=True)                                     # (B*nsel, B*N)
        prop_c = mm(prop_full, W("sel_mat"))                                         # (B*nsel, N)

        # ---- greedy action, log-prob, critic value ----
        mx = jnp.max(prop_c, axis=-1, keepdims=True)
        col = lax.broadcasted_iota(jnp.int32, prop_c.shape, 1).astype(jnp.float32)
        idx = jnp.min(jnp.where(prop_c >= mx, col, float(N)), axis=-1, keepdims=True)
        logp = jnp.log(mx + 1e-20)
        c1 = jnp.maximum(mm(prop_c, W("crit_w1")) + vec("crit_b1", FS), 0.0)
        val = mm(c1, W("crit_w2")) + vec("crit_b2", 1)

        # single lane-dense output slab: [idx | logp | val | prop | zeros]
        o_ref[...] = jnp.concatenate(
            [idx, logp, val, prop_c, jnp.zeros((rows_s, out_pad), jnp.float32)], axis=-1)

    out = pl.pallas_call(
        kernel,
        out_shape=jax.ShapeDtypeStruct((rows_s, LANES), f32),
    )(w_slab, x_slab, y_slab)

    customer_index = out[:, 0:1].astype(jnp.int32).reshape(B, nsel)
    logp = out[:, 1:2].reshape(B, nsel)
    val = out[:, 2:3]
    prop = out[:, 3:3 + N].reshape(B, nsel, N)
    return customer_index, logp, val, prop


# ----------------------------- main --------------------------------------------
if __name__ == "__main__":
    key = jax.random.PRNGKey(0)
    k_nodes, k_edges, k_veh, k_params = jax.random.split(key, 4)

    B = BATCH
    N = N_NODES

    nodes = jax.random.normal(k_nodes, (B, N, CUSTOMER_FEATURE), jnp.float32)
    edge_attributes = jax.random.normal(k_edges, (B, N * N, 1), jnp.float32)
    vehicles = jax.random.normal(k_veh, (B, NUM_VEHICLES, VEHICLE_FEATURE), jnp.float32)
    current_vehicle_index = jnp.array([[1], [2]], jnp.int32)                    # (B, 1)
    current_vehicle_mask = (
        jnp.zeros((B, 1, N), bool).at[0, 0, 0].set(True).at[1, 0, 3].set(True)
    )

    params = init_params(k_params)
    w_slab = pack_params(params)          # one-time packing (outside jit)

    fwd = jax.jit(model_forward)
    customer_index, logp, val, prop = fwd(
        w_slab, nodes, edge_attributes, vehicles, current_vehicle_index, current_vehicle_mask
    )
    jax.block_until_ready((customer_index, logp, val, prop))

    assert prop.shape == (B, 1, N)
    assert customer_index.shape == (B, 1)
    assert logp.shape == (B, 1)
    assert val.shape == (B, 1)
    assert bool(jnp.all(jnp.isfinite(prop)))
    assert bool(jnp.allclose(jnp.sum(prop, axis=-1), 1.0, atol=1e-4))
    assert bool(jnp.all(customer_index >= 0)) and bool(jnp.all(customer_index < N))

    print("KERNEL_OK")
</pallas_src>

<mosaic_0001>
module attributes {stable_mosaic.version = 11 : i64} {
  func.func @kernel(%arg0: memref<696x128xf32, #tpu.memory_space<vmem>>, %arg1: memref<18x24xf32, #tpu.memory_space<vmem>>, %arg2: memref<6x28xf32, #tpu.memory_space<vmem>>, %arg3: memref<2x128xf32, #tpu.memory_space<vmem>>) attributes {dimension_semantics = [], scalar_prefetch = 0 : i64, scratch_operands = 0 : i64, tpu.core_type = #tpu.core_type<tc>} {
    %c664 = arith.constant 664 : index
    %c0 = arith.constant 0 : index
    %0 = vector.load %arg0[%c664, %c0] : memref<696x128xf32, #tpu.memory_space<vmem>>, vector<32x128xf32>
    %c0_0 = arith.constant 0 : index
    %c0_1 = arith.constant 0 : index
    %1 = vector.load %arg1[%c0_0, %c0_1] : memref<18x24xf32, #tpu.memory_space<vmem>>, vector<18x24xf32>
    %2 = vector.extract_strided_slice %1 {offsets = [0, 0], sizes = [18, 6], strides = [1, 1]} : vector<18x24xf32> to vector<18x6xf32>
    %3 = vector.extract_strided_slice %1 {offsets = [0, 6], sizes = [18, 18], strides = [1, 1]} : vector<18x24xf32> to vector<18x18xf32>
    %c0_2 = arith.constant 0 : index
    %c0_3 = arith.constant 0 : index
    %4 = vector.load %arg2[%c0_2, %c0_3] : memref<6x28xf32, #tpu.memory_space<vmem>>, vector<6x28xf32>
    %5 = vector.extract_strided_slice %4 {offsets = [0, 0], sizes = [6, 4], strides = [1, 1]} : vector<6x28xf32> to vector<6x4xf32>
    %6 = vector.extract_strided_slice %4 {offsets = [0, 4], sizes = [2, 6], strides = [1, 1]} : vector<6x28xf32> to vector<2x6xf32>
    %7 = vector.extract_strided_slice %4 {offsets = [0, 10], sizes = [2, 18], strides = [1, 1]} : vector<6x28xf32> to vector<2x18xf32>
    %c0_4 = arith.constant 0 : index
    %c0_5 = arith.constant 0 : index
    %8 = vector.load %arg0[%c0_4, %c0_5] : memref<696x128xf32, #tpu.memory_space<vmem>>, vector<6x32xf32>
    %cst = arith.constant dense<0.000000e+00> : vector<18x32xf32>
    %9 = tpu.matmul %2, %8, %cst {dimension_numbers = #tpu.dot_dimension_numbers<[1], [0], [0], [1], [0, 0, 1, 1], [], []>} : vector<18x6xf32>, vector<6x32xf32>, vector<18x32xf32> -> vector<18x32xf32>
    %c8 = arith.constant 8 : index
    %c0_6 = arith.constant 0 : index
    %10 = vector.load %arg0[%c8, %c0_6] : memref<696x128xf32, #tpu.memory_space<vmem>>, vector<18x32xf32>
    %11 = arith.addf %9, %10 : vector<18x32xf32>
    %12 = vector.extract_strided_slice %0 {offsets = [0, 0], sizes = [1, 32], strides = [1, 1]} : vector<32x128xf32> to vector<1x32xf32>
    %13 = vector.extract_strided_slice %0 {offsets = [1, 0], sizes = [1, 32], strides = [1, 1]} : vector<32x128xf32> to vector<1x32xf32>
    %cst_7 = arith.constant dense<0.000000e+00> : vector<32xf32>
    %14 = vector.multi_reduction <add>, %11, %cst_7 [0] : vector<18x32xf32> to vector<32xf32>
    %15 = vector.shape_cast %14 : vector<32xf32> to vector<1x32xf32>
    %cst_8 = arith.constant 1.800000e+01 : f32
    %16 = vector.broadcast %cst_8 : f32 to vector<1x32xf32>
    %17 = arith.divf %15, %16 : vector<1x32xf32>
    %18 = vector.broadcast %17 : vector<1x32xf32> to vector<18x32xf32>
    %19 = arith.subf %11, %18 : vector<18x32xf32>
    %20 = arith.mulf %19, %19 : vector<18x32xf32>
    %cst_9 = arith.constant dense<0.000000e+00> : vector<32xf32>
    %21 = vector.multi_reduction <add>, %20, %cst_9 [0] : vector<18x32xf32> to vector<32xf32>
    %22 = vector.shape_cast %21 : vector<32xf32> to vector<1x32xf32>
    %cst_10 = arith.constant 1.800000e+01 : f32
    %23 = vector.broadcast %cst_10 : f32 to vector<1x32xf32>
    %24 = arith.divf %22, %23 : vector<1x32xf32>
    %25 = vector.broadcast %17 : vector<1x32xf32> to vector<18x32xf32>
    %26 = arith.subf %11, %25 : vector<18x32xf32>
    %cst_11 = arith.constant 9.99999974E-6 : f32
    %27 = vector.broadcast %cst_11 : f32 to vector<1x32xf32>
    %28 = arith.addf %24, %27 : vector<1x32xf32>
    %29 = math.rsqrt %28 : vector<1x32xf32>
    %30 = vector.broadcast %29 : vector<1x32xf32> to vector<18x32xf32>
    %31 = arith.mulf %26, %30 : vector<18x32xf32>
    %32 = vector.broadcast %12 : vector<1x32xf32> to vector<18x32xf32>
    %33 = arith.mulf %31, %32 : vector<18x32xf32>
    %34 = vector.broadcast %13 : vector<1x32xf32> to vector<18x32xf32>
    %35 = arith.addf %33, %34 : vector<18x32xf32>
    %cst_12 = arith.constant dense<0.000000e+00> : vector<18xf32>
    %36 = vector.multi_reduction <add>, %3, %cst_12 [1] : vector<18x18xf32> to vector<18xf32>
    %37 = vector.shape_cast %36 : vector<18xf32> to vector<18x1xf32>
    %cst_13 = arith.constant dense<0.000000e+00> : vector<1xf32>
    %38 = vector.multi_reduction <add>, %37, %cst_13 [0] : vector<18x1xf32> to vector<1xf32>
    %39 = vector.shape_cast %38 : vector<1xf32> to vector<1x1xf32>
    %cst_14 = arith.constant 0.00308641978 : f32
    %40 = vector.broadcast %cst_14 : f32 to vector<1x1xf32>
    %41 = arith.mulf %39, %40 : vector<1x1xf32>
    %42 = vector.broadcast %41 : vector<1x1xf32> to vector<18x18xf32>
    %43 = arith.subf %3, %42 : vector<18x18xf32>
    %44 = arith.mulf %43, %43 : vector<18x18xf32>
    %cst_15 = arith.constant dense<0.000000e+00> : vector<18xf32>
    %45 = vector.multi_reduction <add>, %44, %cst_15 [1] : vector<18x18xf32> to vector<18xf32>
    %46 = vector.shape_cast %45 : vector<18xf32> to vector<18x1xf32>
    %cst_16 = arith.constant dense<0.000000e+00> : vector<1xf32>
    %47 = vector.multi_reduction <add>, %46, %cst_16 [0] : vector<18x1xf32> to vector<1xf32>
    %48 = vector.shape_cast %47 : vector<1xf32> to vector<1x1xf32>
    %cst_17 = arith.constant 0.00308641978 : f32
    %49 = vector.broadcast %cst_17 : f32 to vector<1x1xf32>
    %50 = arith.mulf %48, %49 : vector<1x1xf32>
    %51 = vector.extract_strided_slice %0 {offsets = [2, 0], sizes = [1, 32], strides = [1, 1]} : vector<32x128xf32> to vector<1x32xf32>
    %52 = vector.extract_strided_slice %0 {offsets = [3, 0], sizes = [1, 32], strides = [1, 1]} : vector<32x128xf32> to vector<1x32xf32>
    %53 = arith.mulf %51, %52 : vector<1x32xf32>
    %54 = vector.broadcast %50 : vector<1x1xf32> to vector<1x32xf32>
    %55 = arith.mulf %54, %51 : vector<1x32xf32>
    %56 = arith.mulf %55, %51 : vector<1x32xf32>
    %cst_18 = arith.constant 9.99999974E-6 : f32
    %57 = vector.broadcast %cst_18 : f32 to vector<1x32xf32>
    %58 = arith.addf %56, %57 : vector<1x32xf32>
    %59 = math.rsqrt %58 : vector<1x32xf32>
    %60 = arith.mulf %53, %59 : vector<1x32xf32>
    %c280 = arith.constant 280 : index
    %c0_19 = arith.constant 0 : index
    %61 = vector.load %arg0[%c280, %c0_19] : memref<696x128xf32, #tpu.memory_space<vmem>>, vector<18x18xf32>
    %c344 = arith.constant 344 : index
    %c0_20 = arith.constant 0 : index
    %62 = vector.load %arg0[%c344, %c0_20] : memref<696x128xf32, #tpu.memory_space<vmem>>, vector<32x96xf32>
    %cst_21 = arith.constant dense<0.000000e+00> : vector<18x96xf32>
    %63 = tpu.matmul %35, %62, %cst_21 {dimension_numbers = #tpu.dot_dimension_numbers<[1], [0], [0], [1], [0, 0, 1, 1], [], []>} : vector<18x32xf32>, vector<32x96xf32>, vector<18x96xf32> -> vector<18x96xf32>
    %64 = vector.extract_strided_slice %0 {offsets = [14, 0], sizes = [1, 96], strides = [1, 1]} : vector<32x128xf32> to vector<1x96xf32>
    %65 = vector.broadcast %64 : vector<1x96xf32> to vector<18x96xf32>
    %66 = arith.addf %63, %65 : vector<18x96xf32>
    %c408 = arith.constant 408 : index
    %c0_22 = arith.constant 0 : index
    %67 = vector.load %arg0[%c408, %c0_22] : memref<696x128xf32, #tpu.memory_space<vmem>>, vector<32x4xf32>
    %cst_23 = arith.constant dense<0.000000e+00> : vector<1x4xf32>
    %68 = tpu.matmul %60, %67, %cst_23 {dimension_numbers = #tpu.dot_dimension_numbers<[1], [0], [0], [1], [0, 0, 1, 1], [], []>} : vector<1x32xf32>, vector<32x4xf32>, vector<1x4xf32> -> vector<1x4xf32>
    %69 = vector.extract_strided_slice %66 {offsets = [0, 0], sizes = [18, 32], strides = [1, 1]} : vector<18x96xf32> to vector<18x32xf32>
    %70 = vector.extract_strided_slice %66 {offsets = [0, 32], sizes = [18, 32], strides = [1, 1]} : vector<18x96xf32> to vector<18x32xf32>
    %71 = vector.extract_strided_slice %66 {offsets = [0, 64], sizes = [18, 32], strides = [1, 1]} : vector<18x96xf32> to vector<18x32xf32>
    %72 = vector.extract_strided_slice %69 {offsets = [0, 0], sizes = [18, 8], strides = [1, 1]} : vector<18x32xf32> to vector<18x8xf32>
    %73 = vector.extract_strided_slice %70 {offsets = [0, 0], sizes = [18, 8], strides = [1, 1]} : vector<18x32xf32> to vector<18x8xf32>
    %74 = vector.extract_strided_slice %71 {offsets = [0, 0], sizes = [18, 8], strides = [1, 1]} : vector<18x32xf32> to vector<18x8xf32>
    %cst_24 = arith.constant dense<0.000000e+00> : vector<18x18xf32>
    %75 = tpu.matmul %72, %73, %cst_24 {dimension_numbers = #tpu.dot_dimension_numbers<[1], [1], [0], [0], [0, 0, 1, 0], [], []>} : vector<18x8xf32>, vector<18x8xf32>, vector<18x18xf32> -> vector<18x18xf32>
    %cst_25 = arith.constant 0.353553385 : f32
    %76 = vector.broadcast %cst_25 : f32 to vector<18x18xf32>
    %77 = arith.mulf %75, %76 : vector<18x18xf32>
    %78 = arith.addf %77, %61 : vector<18x18xf32>
    %79 = vector.extract_strided_slice %68 {offsets = [0, 0], sizes = [1, 1], strides = [1, 1]} : vector<1x4xf32> to vector<1x1xf32>
    %80 = vector.broadcast %79 : vector<1x1xf32> to vector<18x18xf32>
    %81 = arith.mulf %43, %80 : vector<18x18xf32>
    %82 = arith.addf %78, %81 : vector<18x18xf32>
    %cst_26 = arith.constant dense<0xFF800000> : vector<18xf32>
    %83 = vector.multi_reduction <maximumf>, %82, %cst_26 [1] : vector<18x18xf32> to vector<18xf32>
    %84 = vector.shape_cast %83 : vector<18xf32> to vector<18x1xf32>
    %85 = vector.broadcast %84 : vector<18x1xf32> to vector<18x18xf32>
    %86 = arith.subf %82, %85 : vector<18x18xf32>
    %87 = math.exp %86 : vector<18x18xf32>
    %cst_27 = arith.constant dense<0.000000e+00> : vector<18xf32>
    %88 = vector.multi_reduction <add>, %87, %cst_27 [1] : vector<18x18xf32> to vector<18xf32>
    %89 = vector.shape_cast %88 : vector<18xf32> to vector<18x1xf32>
    %90 = tpu.reciprocal %89 {approx = true} : vector<18x1xf32> -> vector<18x1xf32>
    %91 = vector.broadcast %90 : vector<18x1xf32> to vector<18x18xf32>
    %92 = arith.mulf %87, %91 : vector<18x18xf32>
    %cst_28 = arith.constant dense<0.000000e+00> : vector<18x8xf32>
    %93 = tpu.matmul %92, %74, %cst_28 {dimension_numbers = #tpu.dot_dimension_numbers<[1], [0], [0], [1], [0, 0, 1, 1], [], []>} : vector<18x18xf32>, vector<18x8xf32>, vector<18x8xf32> -> vector<18x8xf32>
    %94 = vector.extract_strided_slice %69 {offsets = [0, 8], sizes = [18, 8], strides = [1, 1]} : vector<18x32xf32> to vector<18x8xf32>
    %95 = vector.extract_strided_slice %70 {offsets = [0, 8], sizes = [18, 8], strides = [1, 1]} : vector<18x32xf32> to vector<18x8xf32>
    %96 = vector.extract_strided_slice %71 {offsets = [0, 8], sizes = [18, 8], strides = [1, 1]} : vector<18x32xf32> to vector<18x8xf32>
    %cst_29 = arith.constant dense<0.000000e+00> : vector<18x18xf32>
    %97 = tpu.matmul %94, %95, %cst_29 {dimension_numbers = #tpu.dot_dimension_numbers<[1], [1], [0], [0], [0, 0, 1, 0], [], []>} : vector<18x8xf32>, vector<18x8xf32>, vector<18x18xf32> -> vector<18x18xf32>
    %cst_30 = arith.constant 0.353553385 : f32
    %98 = vector.broadcast %cst_30 : f32 to vector<18x18xf32>
    %99 = arith.mulf %97, %98 : vector<18x18xf32>
    %100 = arith.addf %99, %61 : vector<18x18xf32>
    %101 = vector.extract_strided_slice %68 {offsets = [0, 1], sizes = [1, 1], strides = [1, 1]} : vector<1x4xf32> to vector<1x1xf32>
    %102 = vector.broadcast %101 : vector<1x1xf32> to vector<18x18xf32>
    %103 = arith.mulf %43, %102 : vector<18x18xf32>
    %104 = arith.addf %100, %103 : vector<18x18xf32>
    %cst_31 = arith.constant dense<0xFF800000> : vector<18xf32>
    %105 = vector.multi_reduction <maximumf>, %104, %cst_31 [1] : vector<18x18xf32> to vector<18xf32>
    %106 = vector.shape_cast %105 : vector<18xf32> to vector<18x1xf32>
    %107 = vector.broadcast %106 : vector<18x1xf32> to vector<18x18xf32>
    %108 = arith.subf %104, %107 : vector<18x18xf32>
    %109 = math.exp %108 : vector<18x18xf32>
    %cst_32 = arith.constant dense<0.000000e+00> : vector<18xf32>
    %110 = vector.multi_reduction <add>, %109, %cst_32 [1] : vector<18x18xf32> to vector<18xf32>
    %111 = vector.shape_cast %110 : vector<18xf32> to vector<18x1xf32>
    %112 = tpu.reciprocal %111 {approx = true} : vector<18x1xf32> -> vector<18x1xf32>
    %113 = vector.broadcast %112 : vector<18x1xf32> to vector<18x18xf32>
    %114 = arith.mulf %109, %113 : vector<18x18xf32>
    %cst_33 = arith.constant dense<0.000000e+00> : vector<18x8xf32>
    %115 = tpu.matmul %114, %96, %cst_33 {dimension_numbers = #tpu.dot_dimension_numbers<[1], [0], [0], [1], [0, 0, 1, 1], [], []>} : vector<18x18xf32>, vector<18x8xf32>, vector<18x8xf32> -> vector<18x8xf32>
    %116 = vector.extract_strided_slice %69 {offsets = [0, 16], sizes = [18, 8], strides = [1, 1]} : vector<18x32xf32> to vector<18x8xf32>
    %117 = vector.extract_strided_slice %70 {offsets = [0, 16], sizes = [18, 8], strides = [1, 1]} : vector<18x32xf32> to vector<18x8xf32>
    %118 = vector.extract_strided_slice %71 {offsets = [0, 16], sizes = [18, 8], strides = [1, 1]} : vector<18x32xf32> to vector<18x8xf32>
    %cst_34 = arith.constant dense<0.000000e+00> : vector<18x18xf32>
    %119 = tpu.matmul %116, %117, %cst_34 {dimension_numbers = #tpu.dot_dimension_numbers<[1], [1], [0], [0], [0, 0, 1, 0], [], []>} : vector<18x8xf32>, vector<18x8xf32>, vector<18x18xf32> -> vector<18x18xf32>
    %cst_35 = arith.constant 0.353553385 : f32
    %120 = vector.broadcast %cst_35 : f32 to vector<18x18xf32>
    %121 = arith.mulf %119, %120 : vector<18x18xf32>
    %122 = arith.addf %121, %61 : vector<18x18xf32>
    %123 = vector.extract_strided_slice %68 {offsets = [0, 2], sizes = [1, 1], strides = [1, 1]} : vector<1x4xf32> to vector<1x1xf32>
    %124 = vector.broadcast %123 : vector<1x1xf32> to vector<18x18xf32>
    %125 = arith.mulf %43, %124 : vector<18x18xf32>
    %126 = arith.addf %122, %125 : vector<18x18xf32>
    %cst_36 = arith.constant dense<0xFF800000> : vector<18xf32>
    %127 = vector.multi_reduction <maximumf>, %126, %cst_36 [1] : vector<18x18xf32> to vector<18xf32>
    %128 = vector.shape_cast %127 : vector<18xf32> to vector<18x1xf32>
    %129 = vector.broadcast %128 : vector<18x1xf32> to vector<18x18xf32>
    %130 = arith.subf %126, %129 : vector<18x18xf32>
    %131 = math.exp %130 : vector<18x18xf32>
    %cst_37 = arith.constant dense<0.000000e+00> : vector<18xf32>
    %132 = vector.multi_reduction <add>, %131, %cst_37 [1] : vector<18x18xf32> to vector<18xf32>
    %133 = vector.shape_cast %132 : vector<18xf32> to vector<18x1xf32>
    %134 = tpu.reciprocal %133 {approx = true} : vector<18x1xf32> -> vector<18x1xf32>
    %135 = vector.broadcast %134 : vector<18x1xf32> to vector<18x18xf32>
    %136 = arith.mulf %131, %135 : vector<18x18xf32>
    %cst_38 = arith.constant dense<0.000000e+00> : vector<18x8xf32>
    %137 = tpu.matmul %136, %118, %cst_38 {dimension_numbers = #tpu.dot_dimension_numbers<[1], [0], [0], [1], [0, 0, 1, 1], [], []>} : vector<18x18xf32>, vector<18x8xf32>, vector<18x8xf32> -> vector<18x8xf32>
    %138 = vector.extract_strided_slice %69 {offsets = [0, 24], sizes = [18, 8], strides = [1, 1]} : vector<18x32xf32> to vector<18x8xf32>
    %139 = vector.extract_strided_slice %70 {offsets = [0, 24], sizes = [18, 8], strides = [1, 1]} : vector<18x32xf32> to vector<18x8xf32>
    %140 = vector.extract_strided_slice %71 {offsets = [0, 24], sizes = [18, 8], strides = [1, 1]} : vector<18x32xf32> to vector<18x8xf32>
    %cst_39 = arith.constant dense<0.000000e+00> : vector<18x18xf32>
    %141 = tpu.matmul %138, %139, %cst_39 {dimension_numbers = #tpu.dot_dimension_numbers<[1], [1], [0], [0], [0, 0, 1, 0], [], []>} : vector<18x8xf32>, vector<18x8xf32>, vector<18x18xf32> -> vector<18x18xf32>
    %cst_40 = arith.constant 0.353553385 : f32
    %142 = vector.broadcast %cst_40 : f32 to vector<18x18xf32>
    %143 = arith.mulf %141, %142 : vector<18x18xf32>
    %144 = arith.addf %143, %61 : vector<18x18xf32>
    %145 = vector.extract_strided_slice %68 {offsets = [0, 3], sizes = [1, 1], strides = [1, 1]} : vector<1x4xf32> to vector<1x1xf32>
    %146 = vector.broadcast %145 : vector<1x1xf32> to vector<18x18xf32>
    %147 = arith.mulf %43, %146 : vector<18x18xf32>
    %148 = arith.addf %144, %147 : vector<18x18xf32>
    %cst_41 = arith.constant dense<0xFF800000> : vector<18xf32>
    %149 = vector.multi_reduction <maximumf>, %148, %cst_41 [1] : vector<18x18xf32> to vector<18xf32>
    %150 = vector.shape_cast %149 : vector<18xf32> to vector<18x1xf32>
    %151 = vector.broadcast %150 : vector<18x1xf32> to vector<18x18xf32>
    %152 = arith.subf %148, %151 : vector<18x18xf32>
    %153 = math.exp %152 : vector<18x18xf32>
    %cst_42 = arith.constant dense<0.000000e+00> : vector<18xf32>
    %154 = vector.multi_reduction <add>, %153, %cst_42 [1] : vector<18x18xf32> to vector<18xf32>
    %155 = vector.shape_cast %154 : vector<18xf32> to vector<18x1xf32>
    %156 = tpu.reciprocal %155 {approx = true} : vector<18x1xf32> -> vector<18x1xf32>
    %157 = vector.broadcast %156 : vector<18x1xf32> to vector<18x18xf32>
    %158 = arith.mulf %153, %157 : vector<18x18xf32>
    %cst_43 = arith.constant dense<0.000000e+00> : vector<18x8xf32>
    %159 = tpu.matmul %158, %140, %cst_43 {dimension_numbers = #tpu.dot_dimension_numbers<[1], [0], [0], [1], [0, 0, 1, 1], [], []>} : vector<18x18xf32>, vector<18x8xf32>, vector<18x8xf32> -> vector<18x8xf32>
    %160 = tpu.concatenate %93, %115, %137, %159 in 1 : vector<18x8xf32>, vector<18x8xf32>, vector<18x8xf32>, vector<18x8xf32> -> vector<18x32xf32>
    %c376 = arith.constant 376 : index
    %c0_44 = arith.constant 0 : index
    %161 = vector.load %arg0[%c376, %c0_44] : memref<696x128xf32, #tpu.memory_space<vmem>>, vector<32x32xf32>
    %cst_45 = arith.constant dense<0.000000e+00> : vector<18x32xf32>
    %162 = tpu.matmul %160, %161, %cst_45 {dimension_numbers = #tpu.dot_dimension_numbers<[1], [0], [0], [1], [0, 0, 1, 1], [], []>} : vector<18x32xf32>, vector<32x32xf32>, vector<18x32xf32> -> vector<18x32xf32>
    %163 = vector.extract_strided_slice %0 {offsets = [15, 0], sizes = [1, 32], strides = [1, 1]} : vector<32x128xf32> to vector<1x32xf32>
    %164 = vector.broadcast %163 : vector<1x32xf32> to vector<18x32xf32>
    %165 = arith.addf %162, %164 : vector<18x32xf32>
    %166 = arith.addf %35, %165 : vector<18x32xf32>
    %167 = vector.extract_strided_slice %0 {offsets = [19, 0], sizes = [1, 32], strides = [1, 1]} : vector<32x128xf32> to vector<1x32xf32>
    %168 = vector.extract_strided_slice %0 {offsets = [20, 0], sizes = [1, 32], strides = [1, 1]} : vector<32x128xf32> to vector<1x32xf32>
    %cst_46 = arith.constant dense<0.000000e+00> : vector<32xf32>
    %169 = vector.multi_reduction <add>, %166, %cst_46 [0] : vector<18x32xf32> to vector<32xf32>
    %170 = vector.shape_cast %169 : vector<32xf32> to vector<1x32xf32>
    %cst_47 = arith.constant 1.800000e+01 : f32
    %171 = vector.broadcast %cst_47 : f32 to vector<1x32xf32>
    %172 = arith.divf %170, %171 : vector<1x32xf32>
    %173 = vector.broadcast %172 : vector<1x32xf32> to vector<18x32xf32>
    %174 = arith.subf %166, %173 : vector<18x32xf32>
    %175 = arith.mulf %174, %174 : vector<18x32xf32>
    %cst_48 = arith.constant dense<0.000000e+00> : vector<32xf32>
    %176 = vector.multi_reduction <add>, %175, %cst_48 [0] : vector<18x32xf32> to vector<32xf32>
    %177 = vector.shape_cast %176 : vector<32xf32> to vector<1x32xf32>
    %cst_49 = arith.constant 1.800000e+01 : f32
    %178 = vector.broadcast %cst_49 : f32 to vector<1x32xf32>
    %179 = arith.divf %177, %178 : vector<1x32xf32>
    %180 = vector.broadcast %172 : vector<1x32xf32> to vector<18x32xf32>
    %181 = arith.subf %166, %180 : vector<18x32xf32>
    %cst_50 = arith.constant 9.99999974E-6 : f32
    %182 = vector.broadcast %cst_50 : f32 to vector<1x32xf32>
    %183 = arith.addf %179, %182 : vector<1x32xf32>
    %184 = math.rsqrt %183 : vector<1x32xf32>
    %185 = vector.broadcast %184 : vector<1x32xf32> to vector<18x32xf32>
    %186 = arith.mulf %181, %185 : vector<18x32xf32>
    %187 = vector.broadcast %167 : vector<1x32xf32> to vector<18x32xf32>
    %188 = arith.mulf %186, %187 : vector<18x32xf32>
    %189 = vector.broadcast %168 : vector<1x32xf32> to vector<18x32xf32>
    %190 = arith.addf %188, %189 : vector<18x32xf32>
    %c440 = arith.constant 440 : index
    %c0_51 = arith.constant 0 : index
    %191 = vector.load %arg0[%c440, %c0_51] : memref<696x128xf32, #tpu.memory_space<vmem>>, vector<32x32xf32>
    %cst_52 = arith.constant dense<0.000000e+00> : vector<18x32xf32>
    %192 = tpu.matmul %190, %191, %cst_52 {dimension_numbers = #tpu.dot_dimension_numbers<[1], [0], [0], [1], [0, 0, 1, 1], [], []>} : vector<18x32xf32>, vector<32x32xf32>, vector<18x32xf32> -> vector<18x32xf32>
    %193 = vector.extract_strided_slice %0 {offsets = [17, 0], sizes = [1, 32], strides = [1, 1]} : vector<32x128xf32> to vector<1x32xf32>
    %194 = vector.broadcast %193 : vector<1x32xf32> to vector<18x32xf32>
    %195 = arith.addf %192, %194 : vector<18x32xf32>
    %cst_53 = arith.constant 0.000000e+00 : f32
    %196 = vector.broadcast %cst_53 : f32 to vector<18x32xf32>
    %197 = arith.maximumf %195, %196 : vector<18x32xf32>
    %c472 = arith.constant 472 : index
    %c0_54 = arith.constant 0 : index
    %198 = vector.load %arg0[%c472, %c0_54] : memref<696x128xf32, #tpu.memory_space<vmem>>, vector<32x32xf32>
    %cst_55 = arith.constant dense<0.000000e+00> : vector<18x32xf32>
    %199 = tpu.matmul %197, %198, %cst_55 {dimension_numbers = #tpu.dot_dimension_numbers<[1], [0], [0], [1], [0, 0, 1, 1], [], []>} : vector<18x32xf32>, vector<32x32xf32>, vector<18x32xf32> -> vector<18x32xf32>
    %200 = vector.extract_strided_slice %0 {offsets = [18, 0], sizes = [1, 32], strides = [1, 1]} : vector<32x128xf32> to vector<1x32xf32>
    %201 = vector.broadcast %200 : vector<1x32xf32> to vector<18x32xf32>
    %202 = arith.addf %199, %201 : vector<18x32xf32>
    %203 = arith.addf %190, %202 : vector<18x32xf32>
    %204 = vector.extract_strided_slice %0 {offsets = [21, 0], sizes = [1, 32], strides = [1, 1]} : vector<32x128xf32> to vector<1x32xf32>
    %205 = vector.extract_strided_slice %0 {offsets = [22, 0], sizes = [1, 32], strides = [1, 1]} : vector<32x128xf32> to vector<1x32xf32>
    %cst_56 = arith.constant dense<0.000000e+00> : vector<32xf32>
    %206 = vector.multi_reduction <add>, %203, %cst_56 [0] : vector<18x32xf32> to vector<32xf32>
    %207 = vector.shape_cast %206 : vector<32xf32> to vector<1x32xf32>
    %cst_57 = arith.constant 1.800000e+01 : f32
    %208 = vector.broadcast %cst_57 : f32 to vector<1x32xf32>
    %209 = arith.divf %207, %208 : vector<1x32xf32>
    %210 = vector.broadcast %209 : vector<1x32xf32> to vector<18x32xf32>
    %211 = arith.subf %203, %210 : vector<18x32xf32>
    %212 = arith.mulf %211, %211 : vector<18x32xf32>
    %cst_58 = arith.constant dense<0.000000e+00> : vector<32xf32>
    %213 = vector.multi_reduction <add>, %212, %cst_58 [0] : vector<18x32xf32> to vector<32xf32>
    %214 = vector.shape_cast %213 : vector<32xf32> to vector<1x32xf32>
    %cst_59 = arith.constant 1.800000e+01 : f32
    %215 = vector.broadcast %cst_59 : f32 to vector<1x32xf32>
    %216 = arith.divf %214, %215 : vector<1x32xf32>
    %217 = vector.broadcast %209 : vector<1x32xf32> to vector<18x32xf32>
    %218 = arith.subf %203, %217 : vector<18x32xf32>
    %cst_60 = arith.constant 9.99999974E-6 : f32
    %219 = vector.broadcast %cst_60 : f32 to vector<1x32xf32>
    %220 = arith.addf %216, %219 : vector<1x32xf32>
    %221 = math.rsqrt %220 : vector<1x32xf32>
    %222 = vector.broadcast %221 : vector<1x32xf32> to vector<18x32xf32>
    %223 = arith.mulf %218, %222 : vector<18x32xf32>
    %224 = vector.broadcast %204 : vector<1x32xf32> to vector<18x32xf32>
    %225 = arith.mulf %223, %224 : vector<18x32xf32>
    %226 = vector.broadcast %205 : vector<1x32xf32> to vector<18x32xf32>
    %227 = arith.addf %225, %226 : vector<18x32xf32>
    %c504 = arith.constant 504 : index
    %c0_61 = arith.constant 0 : index
    %228 = vector.load %arg0[%c504, %c0_61] : memref<696x128xf32, #tpu.memory_space<vmem>>, vector<32x96xf32>
    %cst_62 = arith.constant dense<0.000000e+00> : vector<18x96xf32>
    %229 = tpu.matmul %227, %228, %cst_62 {dimension_numbers = #tpu.dot_dimension_numbers<[1], [0], [0], [1], [0, 0, 1, 1], [], []>} : vector<18x32xf32>, vector<32x96xf32>, vector<18x96xf32> -> vector<18x96xf32>
    %230 = vector.extract_strided_slice %0 {offsets = [23, 0], sizes = [1, 96], strides = [1, 1]} : vector<32x128xf32> to vector<1x96xf32>
    %231 = vector.broadcast %230 : vector<1x96xf32> to vector<18x96xf32>
    %232 = arith.addf %229, %231 : vector<18x96xf32>
    %c568 = arith.constant 568 : index
    %c0_63 = arith.constant 0 : index
    %233 = vector.load %arg0[%c568, %c0_63] : memref<696x128xf32, #tpu.memory_space<vmem>>, vector<32x4xf32>
    %cst_64 = arith.constant dense<0.000000e+00> : vector<1x4xf32>
    %234 = tpu.matmul %60, %233, %cst_64 {dimension_numbers = #tpu.dot_dimension_numbers<[1], [0], [0], [1], [0, 0, 1, 1], [], []>} : vector<1x32xf32>, vector<32x4xf32>, vector<1x4xf32> -> vector<1x4xf32>
    %235 = vector.extract_strided_slice %232 {offsets = [0, 0], sizes = [18, 32], strides = [1, 1]} : vector<18x96xf32> to vector<18x32xf32>
    %236 = vector.extract_strided_slice %232 {offsets = [0, 32], sizes = [18, 32], strides = [1, 1]} : vector<18x96xf32> to vector<18x32xf32>
    %237 = vector.extract_strided_slice %232 {offsets = [0, 64], sizes = [18, 32], strides = [1, 1]} : vector<18x96xf32> to vector<18x32xf32>
    %238 = vector.extract_strided_slice %235 {offsets = [0, 0], sizes = [18, 8], strides = [1, 1]} : vector<18x32xf32> to vector<18x8xf32>
    %239 = vector.extract_strided_slice %236 {offsets = [0, 0], sizes = [18, 8], strides = [1, 1]} : vector<18x32xf32> to vector<18x8xf32>
    %240 = vector.extract_strided_slice %237 {offsets = [0, 0], sizes = [18, 8], strides = [1, 1]} : vector<18x32xf32> to vector<18x8xf32>
    %cst_65 = arith.constant dense<0.000000e+00> : vector<18x18xf32>
    %241 = tpu.matmul %238, %239, %cst_65 {dimension_numbers = #tpu.dot_dimension_numbers<[1], [1], [0], [0], [0, 0, 1, 0], [], []>} : vector<18x8xf32>, vector<18x8xf32>, vector<18x18xf32> -> vector<18x18xf32>
    %cst_66 = arith.constant 0.353553385 : f32
    %242 = vector.broadcast %cst_66 : f32 to vector<18x18xf32>
    %243 = arith.mulf %241, %242 : vector<18x18xf32>
    %244 = arith.addf %243, %61 : vector<18x18xf32>
    %245 = vector.extract_strided_slice %234 {offsets = [0, 0], sizes = [1, 1], strides = [1, 1]} : vector<1x4xf32> to vector<1x1xf32>
    %246 = vector.broadcast %245 : vector<1x1xf32> to vector<18x18xf32>
    %247 = arith.mulf %43, %246 : vector<18x18xf32>
    %248 = arith.addf %244, %247 : vector<18x18xf32>
    %cst_67 = arith.constant dense<0xFF800000> : vector<18xf32>
    %249 = vector.multi_reduction <maximumf>, %248, %cst_67 [1] : vector<18x18xf32> to vector<18xf32>
    %250 = vector.shape_cast %249 : vector<18xf32> to vector<18x1xf32>
    %251 = vector.broadcast %250 : vector<18x1xf32> to vector<18x18xf32>
    %252 = arith.subf %248, %251 : vector<18x18xf32>
    %253 = math.exp %252 : vector<18x18xf32>
    %cst_68 = arith.constant dense<0.000000e+00> : vector<18xf32>
    %254 = vector.multi_reduction <add>, %253, %cst_68 [1] : vector<18x18xf32> to vector<18xf32>
    %255 = vector.shape_cast %254 : vector<18xf32> to vector<18x1xf32>
    %256 = tpu.reciprocal %255 {approx = true} : vector<18x1xf32> -> vector<18x1xf32>
    %257 = vector.broadcast %256 : vector<18x1xf32> to vector<18x18xf32>
    %258 = arith.mulf %253, %257 : vector<18x18xf32>
    %cst_69 = arith.constant dense<0.000000e+00> : vector<18x8xf32>
    %259 = tpu.matmul %258, %240, %cst_69 {dimension_numbers = #tpu.dot_dimension_numbers<[1], [0], [0], [1], [0, 0, 1, 1], [], []>} : vector<18x18xf32>, vector<18x8xf32>, vector<18x8xf32> -> vector<18x8xf32>
    %260 = vector.extract_strided_slice %235 {offsets = [0, 8], sizes = [18, 8], strides = [1, 1]} : vector<18x32xf32> to vector<18x8xf32>
    %261 = vector.extract_strided_slice %236 {offsets = [0, 8], sizes = [18, 8], strides = [1, 1]} : vector<18x32xf32> to vector<18x8xf32>
    %262 = vector.extract_strided_slice %237 {offsets = [0, 8], sizes = [18, 8], strides = [1, 1]} : vector<18x32xf32> to vector<18x8xf32>
    %cst_70 = arith.constant dense<0.000000e+00> : vector<18x18xf32>
    %263 = tpu.matmul %260, %261, %cst_70 {dimension_numbers = #tpu.dot_dimension_numbers<[1], [1], [0], [0], [0, 0, 1, 0], [], []>} : vector<18x8xf32>, vector<18x8xf32>, vector<18x18xf32> -> vector<18x18xf32>
    %cst_71 = arith.constant 0.353553385 : f32
    %264 = vector.broadcast %cst_71 : f32 to vector<18x18xf32>
    %265 = arith.mulf %263, %264 : vector<18x18xf32>
    %266 = arith.addf %265, %61 : vector<18x18xf32>
    %267 = vector.extract_strided_slice %234 {offsets = [0, 1], sizes = [1, 1], strides = [1, 1]} : vector<1x4xf32> to vector<1x1xf32>
    %268 = vector.broadcast %267 : vector<1x1xf32> to vector<18x18xf32>
    %269 = arith.mulf %43, %268 : vector<18x18xf32>
    %270 = arith.addf %266, %269 : vector<18x18xf32>
    %cst_72 = arith.constant dense<0xFF800000> : vector<18xf32>
    %271 = vector.multi_reduction <maximumf>, %270, %cst_72 [1] : vector<18x18xf32> to vector<18xf32>
    %272 = vector.shape_cast %271 : vector<18xf32> to vector<18x1xf32>
    %273 = vector.broadcast %272 : vector<18x1xf32> to vector<18x18xf32>
    %274 = arith.subf %270, %273 : vector<18x18xf32>
    %275 = math.exp %274 : vector<18x18xf32>
    %cst_73 = arith.constant dense<0.000000e+00> : vector<18xf32>
    %276 = vector.multi_reduction <add>, %275, %cst_73 [1] : vector<18x18xf32> to vector<18xf32>
    %277 = vector.shape_cast %276 : vector<18xf32> to vector<18x1xf32>
    %278 = tpu.reciprocal %277 {approx = true} : vector<18x1xf32> -> vector<18x1xf32>
    %279 = vector.broadcast %278 : vector<18x1xf32> to vector<18x18xf32>
    %280 = arith.mulf %275, %279 : vector<18x18xf32>
    %cst_74 = arith.constant dense<0.000000e+00> : vector<18x8xf32>
    %281 = tpu.matmul %280, %262, %cst_74 {dimension_numbers = #tpu.dot_dimension_numbers<[1], [0], [0], [1], [0, 0, 1, 1], [], []>} : vector<18x18xf32>, vector<18x8xf32>, vector<18x8xf32> -> vector<18x8xf32>
    %282 = vector.extract_strided_slice %235 {offsets = [0, 16], sizes = [18, 8], strides = [1, 1]} : vector<18x32xf32> to vector<18x8xf32>
    %283 = vector.extract_strided_slice %236 {offsets = [0, 16], sizes = [18, 8], strides = [1, 1]} : vector<18x32xf32> to vector<18x8xf32>
    %284 = vector.extract_strided_slice %237 {offsets = [0, 16], sizes = [18, 8], strides = [1, 1]} : vector<18x32xf32> to vector<18x8xf32>
    %cst_75 = arith.constant dense<0.000000e+00> : vector<18x18xf32>
    %285 = tpu.matmul %282, %283, %cst_75 {dimension_numbers = #tpu.dot_dimension_numbers<[1], [1], [0], [0], [0, 0, 1, 0], [], []>} : vector<18x8xf32>, vector<18x8xf32>, vector<18x18xf32> -> vector<18x18xf32>
    %cst_76 = arith.constant 0.353553385 : f32
    %286 = vector.broadcast %cst_76 : f32 to vector<18x18xf32>
    %287 = arith.mulf %285, %286 : vector<18x18xf32>
    %288 = arith.addf %287, %61 : vector<18x18xf32>
    %289 = vector.extract_strided_slice %234 {offsets = [0, 2], sizes = [1, 1], strides = [1, 1]} : vector<1x4xf32> to vector<1x1xf32>
    %290 = vector.broadcast %289 : vector<1x1xf32> to vector<18x18xf32>
    %291 = arith.mulf %43, %290 : vector<18x18xf32>
    %292 = arith.addf %288, %291 : vector<18x18xf32>
    %cst_77 = arith.constant dense<0xFF800000> : vector<18xf32>
    %293 = vector.multi_reduction <maximumf>, %292, %cst_77 [1] : vector<18x18xf32> to vector<18xf32>
    %294 = vector.shape_cast %293 : vector<18xf32> to vector<18x1xf32>
    %295 = vector.broadcast %294 : vector<18x1xf32> to vector<18x18xf32>
    %296 = arith.subf %292, %295 : vector<18x18xf32>
    %297 = math.exp %296 : vector<18x18xf32>
    %cst_78 = arith.constant dense<0.000000e+00> : vector<18xf32>
    %298 = vector.multi_reduction <add>, %297, %cst_78 [1] : vector<18x18xf32> to vector<18xf32>
    %299 = vector.shape_cast %298 : vector<18xf32> to vector<18x1xf32>
    %300 = tpu.reciprocal %299 {approx = true} : vector<18x1xf32> -> vector<18x1xf32>
    %301 = vector.broadcast %300 : vector<18x1xf32> to vector<18x18xf32>
    %302 = arith.mulf %297, %301 : vector<18x18xf32>
    %cst_79 = arith.constant dense<0.000000e+00> : vector<18x8xf32>
    %303 = tpu.matmul %302, %284, %cst_79 {dimension_numbers = #tpu.dot_dimension_numbers<[1], [0], [0], [1], [0, 0, 1, 1], [], []>} : vector<18x18xf32>, vector<18x8xf32>, vector<18x8xf32> -> vector<18x8xf32>
    %304 = vector.extract_strided_slice %235 {offsets = [0, 24], sizes = [18, 8], strides = [1, 1]} : vector<18x32xf32> to vector<18x8xf32>
    %305 = vector.extract_strided_slice %236 {offsets = [0, 24], sizes = [18, 8], strides = [1, 1]} : vector<18x32xf32> to vector<18x8xf32>
    %306 = vector.extract_strided_slice %237 {offsets = [0, 24], sizes = [18, 8], strides = [1, 1]} : vector<18x32xf32> to vector<18x8xf32>
    %cst_80 = arith.constant dense<0.000000e+00> : vector<18x18xf32>
    %307 = tpu.matmul %304, %305, %cst_80 {dimension_numbers = #tpu.dot_dimension_numbers<[1], [1], [0], [0], [0, 0, 1, 0], [], []>} : vector<18x8xf32>, vector<18x8xf32>, vector<18x18xf32> -> vector<18x18xf32>
    %cst_81 = arith.constant 0.353553385 : f32
    %308 = vector.broadcast %cst_81 : f32 to vector<18x18xf32>
    %309 = arith.mulf %307, %308 : vector<18x18xf32>
    %310 = arith.addf %309, %61 : vector<18x18xf32>
    %311 = vector.extract_strided_slice %234 {offsets = [0, 3], sizes = [1, 1], strides = [1, 1]} : vector<1x4xf32> to vector<1x1xf32>
    %312 = vector.broadcast %311 : vector<1x1xf32> to vector<18x18xf32>
    %313 = arith.mulf %43, %312 : vector<18x18xf32>
    %314 = arith.addf %310, %313 : vector<18x18xf32>
    %cst_82 = arith.constant dense<0xFF800000> : vector<18xf32>
    %315 = vector.multi_reduction <maximumf>, %314, %cst_82 [1] : vector<18x18xf32> to vector<18xf32>
    %316 = vector.shape_cast %315 : vector<18xf32> to vector<18x1xf32>
    %317 = vector.broadcast %316 : vector<18x1xf32> to vector<18x18xf32>
    %318 = arith.subf %314, %317 : vector<18x18xf32>
    %319 = math.exp %318 : vector<18x18xf32>
    %cst_83 = arith.constant dense<0.000000e+00> : vector<18xf32>
    %320 = vector.multi_reduction <add>, %319, %cst_83 [1] : vector<18x18xf32> to vector<18xf32>
    %321 = vector.shape_cast %320 : vector<18xf32> to vector<18x1xf32>
    %322 = tpu.reciprocal %321 {approx = true} : vector<18x1xf32> -> vector<18x1xf32>
    %323 = vector.broadcast %322 : vector<18x1xf32> to vector<18x18xf32>
    %324 = arith.mulf %319, %323 : vector<18x18xf32>
    %cst_84 = arith.constant dense<0.000000e+00> : vector<18x8xf32>
    %325 = tpu.matmul %324, %306, %cst_84 {dimension_numbers = #tpu.dot_dimension_numbers<[1], [0], [0], [1], [0, 0, 1, 1], [], []>} : vector<18x18xf32>, vector<18x8xf32>, vector<18x8xf32> -> vector<18x8xf32>
    %326 = tpu.concatenate %259, %281, %303, %325 in 1 : vector<18x8xf32>, vector<18x8xf32>, vector<18x8xf32>, vector<18x8xf32> -> vector<18x32xf32>
    %c536 = arith.constant 536 : index
    %c0_85 = arith.constant 0 : index
    %327 = vector.load %arg0[%c536, %c0_85] : memref<696x128xf32, #tpu.memory_space<vmem>>, vector<32x32xf32>
    %cst_86 = arith.constant dense<0.000000e+00> : vector<18x32xf32>
    %328 = tpu.matmul %326, %327, %cst_86 {dimension_numbers = #tpu.dot_dimension_numbers<[1], [0], [0], [1], [0, 0, 1, 1], [], []>} : vector<18x32xf32>, vector<32x32xf32>, vector<18x32xf32> -> vector<18x32xf32>
    %329 = vector.extract_strided_slice %0 {offsets = [24, 0], sizes = [1, 32], strides = [1, 1]} : vector<32x128xf32> to vector<1x32xf32>
    %330 = vector.broadcast %329 : vector<1x32xf32> to vector<18x32xf32>
    %331 = arith.addf %328, %330 : vector<18x32xf32>
    %332 = arith.addf %227, %331 : vector<18x32xf32>
    %333 = vector.extract_strided_slice %0 {offsets = [28, 0], sizes = [1, 32], strides = [1, 1]} : vector<32x128xf32> to vector<1x32xf32>
    %334 = vector.extract_strided_slice %0 {offsets = [29, 0], sizes = [1, 32], strides = [1, 1]} : vector<32x128xf32> to vector<1x32xf32>
    %cst_87 = arith.constant dense<0.000000e+00> : vector<32xf32>
    %335 = vector.multi_reduction <add>, %332, %cst_87 [0] : vector<18x32xf32> to vector<32xf32>
    %336 = vector.shape_cast %335 : vector<32xf32> to vector<1x32xf32>
    %cst_88 = arith.constant 1.800000e+01 : f32
    %337 = vector.broadcast %cst_88 : f32 to vector<1x32xf32>
    %338 = arith.divf %336, %337 : vector<1x32xf32>
    %339 = vector.broadcast %338 : vector<1x32xf32> to vector<18x32xf32>
    %340 = arith.subf %332, %339 : vector<18x32xf32>
    %341 = arith.mulf %340, %340 : vector<18x32xf32>
    %cst_89 = arith.constant dense<0.000000e+00> : vector<32xf32>
    %342 = vector.multi_reduction <add>, %341, %cst_89 [0] : vector<18x32xf32> to vector<32xf32>
    %343 = vector.shape_cast %342 : vector<32xf32> to vector<1x32xf32>
    %cst_90 = arith.constant 1.800000e+01 : f32
    %344 = vector.broadcast %cst_90 : f32 to vector<1x32xf32>
    %345 = arith.divf %343, %344 : vector<1x32xf32>
    %346 = vector.broadcast %338 : vector<1x32xf32> to vector<18x32xf32>
    %347 = arith.subf %332, %346 : vector<18x32xf32>
    %cst_91 = arith.constant 9.99999974E-6 : f32
    %348 = vector.broadcast %cst_91 : f32 to vector<1x32xf32>
    %349 = arith.addf %345, %348 : vector<1x32xf32>
    %350 = math.rsqrt %349 : vector<1x32xf32>
    %351 = vector.broadcast %350 : vector<1x32xf32> to vector<18x32xf32>
    %352 = arith.mulf %347, %351 : vector<18x32xf32>
    %353 = vector.broadcast %333 : vector<1x32xf32> to vector<18x32xf32>
    %354 = arith.mulf %352, %353 : vector<18x32xf32>
    %355 = vector.broadcast %334 : vector<1x32xf32> to vector<18x32xf32>
    %356 = arith.addf %354, %355 : vector<18x32xf32>
    %c600 = arith.constant 600 : index
    %c0_92 = arith.constant 0 : index
    %357 = vector.load %arg0[%c600, %c0_92] : memref<696x128xf32, #tpu.memory_space<vmem>>, vector<32x32xf32>
    %cst_93 = arith.constant dense<0.000000e+00> : vector<18x32xf32>
    %358 = tpu.matmul %356, %357, %cst_93 {dimension_numbers = #tpu.dot_dimension_numbers<[1], [0], [0], [1], [0, 0, 1, 1], [], []>} : vector<18x32xf32>, vector<32x32xf32>, vector<18x32xf32> -> vector<18x32xf32>
    %359 = vector.extract_strided_slice %0 {offsets = [26, 0], sizes = [1, 32], strides = [1, 1]} : vector<32x128xf32> to vector<1x32xf32>
    %360 = vector.broadcast %359 : vector<1x32xf32> to vector<18x32xf32>
    %361 = arith.addf %358, %360 : vector<18x32xf32>
    %cst_94 = arith.constant 0.000000e+00 : f32
    %362 = vector.broadcast %cst_94 : f32 to vector<18x32xf32>
    %363 = arith.maximumf %361, %362 : vector<18x32xf32>
    %c632 = arith.constant 632 : index
    %c0_95 = arith.constant 0 : index
    %364 = vector.load %arg0[%c632, %c0_95] : memref<696x128xf32, #tpu.memory_space<vmem>>, vector<32x32xf32>
    %cst_96 = arith.constant dense<0.000000e+00> : vector<18x32xf32>
    %365 = tpu.matmul %363, %364, %cst_96 {dimension_numbers = #tpu.dot_dimension_numbers<[1], [0], [0], [1], [0, 0, 1, 1], [], []>} : vector<18x32xf32>, vector<32x32xf32>, vector<18x32xf32> -> vector<18x32xf32>
    %366 = vector.extract_strided_slice %0 {offsets = [27, 0], sizes = [1, 32], strides = [1, 1]} : vector<32x128xf32> to vector<1x32xf32>
    %367 = vector.broadcast %366 : vector<1x32xf32> to vector<18x32xf32>
    %368 = arith.addf %365, %367 : vector<18x32xf32>
    %369 = arith.addf %356, %368 : vector<18x32xf32>
    %370 = vector.extract_strided_slice %0 {offsets = [30, 0], sizes = [1, 32], strides = [1, 1]} : vector<32x128xf32> to vector<1x32xf32>
    %371 = vector.extract_strided_slice %0 {offsets = [31, 0], sizes = [1, 32], strides = [1, 1]} : vector<32x128xf32> to vector<1x32xf32>
    %cst_97 = arith.constant dense<0.000000e+00> : vector<32xf32>
    %372 = vector.multi_reduction <add>, %369, %cst_97 [0] : vector<18x32xf32> to vector<32xf32>
    %373 = vector.shape_cast %372 : vector<32xf32> to vector<1x32xf32>
    %cst_98 = arith.constant 1.800000e+01 : f32
    %374 = vector.broadcast %cst_98 : f32 to vector<1x32xf32>
    %375 = arith.divf %373, %374 : vector<1x32xf32>
    %376 = vector.broadcast %375 : vector<1x32xf32> to vector<18x32xf32>
    %377 = arith.subf %369, %376 : vector<18x32xf32>
    %378 = arith.mulf %377, %377 : vector<18x32xf32>
    %cst_99 = arith.constant dense<0.000000e+00> : vector<32xf32>
    %379 = vector.multi_reduction <add>, %378, %cst_99 [0] : vector<18x32xf32> to vector<32xf32>
    %380 = vector.shape_cast %379 : vector<32xf32> to vector<1x32xf32>
    %cst_100 = arith.constant 1.800000e+01 : f32
    %381 = vector.broadcast %cst_100 : f32 to vector<1x32xf32>
    %382 = arith.divf %380, %381 : vector<1x32xf32>
    %383 = vector.broadcast %375 : vector<1x32xf32> to vector<18x32xf32>
    %384 = arith.subf %369, %383 : vector<18x32xf32>
    %cst_101 = arith.constant 9.99999974E-6 : f32
    %385 = vector.broadcast %cst_101 : f32 to vector<1x32xf32>
    %386 = arith.addf %382, %385 : vector<1x32xf32>
    %387 = math.rsqrt %386 : vector<1x32xf32>
    %388 = vector.broadcast %387 : vector<1x32xf32> to vector<18x32xf32>
    %389 = arith.mulf %384, %388 : vector<18x32xf32>
    %390 = vector.broadcast %370 : vector<1x32xf32> to vector<18x32xf32>
    %391 = arith.mulf %389, %390 : vector<18x32xf32>
    %392 = vector.broadcast %371 : vector<1x32xf32> to vector<18x32xf32>
    %393 = arith.addf %391, %392 : vector<18x32xf32>
    %c32 = arith.constant 32 : index
    %c0_102 = arith.constant 0 : index
    %394 = vector.load %arg0[%c32, %c0_102] : memref<696x128xf32, #tpu.memory_space<vmem>>, vector<32x32xf32>
    %cst_103 = arith.constant dense<0.000000e+00> : vector<18x32xf32>
    %395 = tpu.matmul %393, %394, %cst_103 {dimension_numbers = #tpu.dot_dimension_numbers<[1], [0], [0], [1], [0, 0, 1, 1], [], []>} : vector<18x32xf32>, vector<32x32xf32>, vector<18x32xf32> -> vector<18x32xf32>
    %396 = vector.extract_strided_slice %0 {offsets = [5, 0], sizes = [1, 32], strides = [1, 1]} : vector<32x128xf32> to vector<1x32xf32>
    %397 = vector.broadcast %396 : vector<1x32xf32> to vector<18x32xf32>
    %398 = arith.addf %395, %397 : vector<18x32xf32>
    %c72 = arith.constant 72 : index
    %c0_104 = arith.constant 0 : index
    %399 = vector.load %arg0[%c72, %c0_104] : memref<696x128xf32, #tpu.memory_space<vmem>>, vector<32x64xf32>
    %cst_105 = arith.constant dense<0.000000e+00> : vector<18x64xf32>
    %400 = tpu.matmul %393, %399, %cst_105 {dimension_numbers = #tpu.dot_dimension_numbers<[1], [0], [0], [1], [0, 0, 1, 1], [], []>} : vector<18x32xf32>, vector<32x64xf32>, vector<18x64xf32> -> vector<18x64xf32>
    %401 = vector.extract_strided_slice %0 {offsets = [7, 0], sizes = [1, 64], strides = [1, 1]} : vector<32x128xf32> to vector<1x64xf32>
    %402 = vector.broadcast %401 : vector<1x64xf32> to vector<18x64xf32>
    %403 = arith.addf %400, %402 : vector<18x64xf32>
    %c64 = arith.constant 64 : index
    %c0_106 = arith.constant 0 : index
    %404 = vector.load %arg0[%c64, %c0_106] : memref<696x128xf32, #tpu.memory_space<vmem>>, vector<4x32xf32>
    %cst_107 = arith.constant dense<0.000000e+00> : vector<6x32xf32>
    %405 = tpu.matmul %5, %404, %cst_107 {dimension_numbers = #tpu.dot_dimension_numbers<[1], [0], [0], [1], [0, 0, 1, 1], [], []>} : vector<6x4xf32>, vector<4x32xf32>, vector<6x32xf32> -> vector<6x32xf32>
    %406 = vector.extract_strided_slice %0 {offsets = [6, 0], sizes = [1, 32], strides = [1, 1]} : vector<32x128xf32> to vector<1x32xf32>
    %407 = vector.broadcast %406 : vector<1x32xf32> to vector<6x32xf32>
    %408 = arith.addf %405, %407 : vector<6x32xf32>
    %409 = vector.extract_strided_slice %403 {offsets = [0, 0], sizes = [18, 32], strides = [1, 1]} : vector<18x64xf32> to vector<18x32xf32>
    %410 = vector.extract_strided_slice %403 {offsets = [0, 32], sizes = [18, 32], strides = [1, 1]} : vector<18x64xf32> to vector<18x32xf32>
    %c304 = arith.constant 304 : index
    %c0_108 = arith.constant 0 : index
    %411 = vector.load %arg0[%c304, %c0_108] : memref<696x128xf32, #tpu.memory_space<vmem>>, vector<6x18xf32>
    %412 = vector.extract_strided_slice %408 {offsets = [0, 0], sizes = [6, 8], strides = [1, 1]} : vector<6x32xf32> to vector<6x8xf32>
    %413 = vector.extract_strided_slice %409 {offsets = [0, 0], sizes = [18, 8], strides = [1, 1]} : vector<18x32xf32> to vector<18x8xf32>
    %414 = vector.extract_strided_slice %410 {offsets = [0, 0], sizes = [18, 8], strides = [1, 1]} : vector<18x32xf32> to vector<18x8xf32>
    %cst_109 = arith.constant dense<0.000000e+00> : vector<6x18xf32>
    %415 = tpu.matmul %412, %413, %cst_109 {dimension_numbers = #tpu.dot_dimension_numbers<[1], [1], [0], [0], [0, 0, 1, 0], [], []>} : vector<6x8xf32>, vector<18x8xf32>, vector<6x18xf32> -> vector<6x18xf32>
    %cst_110 = arith.constant 0.353553385 : f32
    %416 = vector.broadcast %cst_110 : f32 to vector<6x18xf32>
    %417 = arith.mulf %415, %416 : vector<6x18xf32>
    %418 = arith.addf %417, %411 : vector<6x18xf32>
    %cst_111 = arith.constant dense<0xFF800000> : vector<6xf32>
    %419 = vector.multi_reduction <maximumf>, %418, %cst_111 [1] : vector<6x18xf32> to vector<6xf32>
    %420 = vector.shape_cast %419 : vector<6xf32> to vector<6x1xf32>
    %421 = vector.broadcast %420 : vector<6x1xf32> to vector<6x18xf32>
    %422 = arith.subf %418, %421 : vector<6x18xf32>
    %423 = math.exp %422 : vector<6x18xf32>
    %cst_112 = arith.constant dense<0.000000e+00> : vector<6xf32>
    %424 = vector.multi_reduction <add>, %423, %cst_112 [1] : vector<6x18xf32> to vector<6xf32>
    %425 = vector.shape_cast %424 : vector<6xf32> to vector<6x1xf32>
    %426 = tpu.reciprocal %425 {approx = true} : vector<6x1xf32> -> vector<6x1xf32>
    %427 = vector.broadcast %426 : vector<6x1xf32> to vector<6x18xf32>
    %428 = arith.mulf %423, %427 : vector<6x18xf32>
    %cst_113 = arith.constant dense<0.000000e+00> : vector<6x8xf32>
    %429 = tpu.matmul %428, %414, %cst_113 {dimension_numbers = #tpu.dot_dimension_numbers<[1], [0], [0], [1], [0, 0, 1, 1], [], []>} : vector<6x18xf32>, vector<18x8xf32>, vector<6x8xf32> -> vector<6x8xf32>
    %430 = vector.extract_strided_slice %408 {offsets = [0, 8], sizes = [6, 8], strides = [1, 1]} : vector<6x32xf32> to vector<6x8xf32>
    %431 = vector.extract_strided_slice %409 {offsets = [0, 8], sizes = [18, 8], strides = [1, 1]} : vector<18x32xf32> to vector<18x8xf32>
    %432 = vector.extract_strided_slice %410 {offsets = [0, 8], sizes = [18, 8], strides = [1, 1]} : vector<18x32xf32> to vector<18x8xf32>
    %cst_114 = arith.constant dense<0.000000e+00> : vector<6x18xf32>
    %433 = tpu.matmul %430, %431, %cst_114 {dimension_numbers = #tpu.dot_dimension_numbers<[1], [1], [0], [0], [0, 0, 1, 0], [], []>} : vector<6x8xf32>, vector<18x8xf32>, vector<6x18xf32> -> vector<6x18xf32>
    %cst_115 = arith.constant 0.353553385 : f32
    %434 = vector.broadcast %cst_115 : f32 to vector<6x18xf32>
    %435 = arith.mulf %433, %434 : vector<6x18xf32>
    %436 = arith.addf %435, %411 : vector<6x18xf32>
    %cst_116 = arith.constant dense<0xFF800000> : vector<6xf32>
    %437 = vector.multi_reduction <maximumf>, %436, %cst_116 [1] : vector<6x18xf32> to vector<6xf32>
    %438 = vector.shape_cast %437 : vector<6xf32> to vector<6x1xf32>
    %439 = vector.broadcast %438 : vector<6x1xf32> to vector<6x18xf32>
    %440 = arith.subf %436, %439 : vector<6x18xf32>
    %441 = math.exp %440 : vector<6x18xf32>
    %cst_117 = arith.constant dense<0.000000e+00> : vector<6xf32>
    %442 = vector.multi_reduction <add>, %441, %cst_117 [1] : vector<6x18xf32> to vector<6xf32>
    %443 = vector.shape_cast %442 : vector<6xf32> to vector<6x1xf32>
    %444 = tpu.reciprocal %443 {approx = true} : vector<6x1xf32> -> vector<6x1xf32>
    %445 = vector.broadcast %444 : vector<6x1xf32> to vector<6x18xf32>
    %446 = arith.mulf %441, %445 : vector<6x18xf32>
    %cst_118 = arith.constant dense<0.000000e+00> : vector<6x8xf32>
    %447 = tpu.matmul %446, %432, %cst_118 {dimension_numbers = #tpu.dot_dimension_numbers<[1], [0], [0], [1], [0, 0, 1, 1], [], []>} : vector<6x18xf32>, vector<18x8xf32>, vector<6x8xf32> -> vector<6x8xf32>
    %448 = vector.extract_strided_slice %408 {offsets = [0, 16], sizes = [6, 8], strides = [1, 1]} : vector<6x32xf32> to vector<6x8xf32>
    %449 = vector.extract_strided_slice %409 {offsets = [0, 16], sizes = [18, 8], strides = [1, 1]} : vector<18x32xf32> to vector<18x8xf32>
    %450 = vector.extract_strided_slice %410 {offsets = [0, 16], sizes = [18, 8], strides = [1, 1]} : vector<18x32xf32> to vector<18x8xf32>
    %cst_119 = arith.constant dense<0.000000e+00> : vector<6x18xf32>
    %451 = tpu.matmul %448, %449, %cst_119 {dimension_numbers = #tpu.dot_dimension_numbers<[1], [1], [0], [0], [0, 0, 1, 0], [], []>} : vector<6x8xf32>, vector<18x8xf32>, vector<6x18xf32> -> vector<6x18xf32>
    %cst_120 = arith.constant 0.353553385 : f32
    %452 = vector.broadcast %cst_120 : f32 to vector<6x18xf32>
    %453 = arith.mulf %451, %452 : vector<6x18xf32>
    %454 = arith.addf %453, %411 : vector<6x18xf32>
    %cst_121 = arith.constant dense<0xFF800000> : vector<6xf32>
    %455 = vector.multi_reduction <maximumf>, %454, %cst_121 [1] : vector<6x18xf32> to vector<6xf32>
    %456 = vector.shape_cast %455 : vector<6xf32> to vector<6x1xf32>
    %457 = vector.broadcast %456 : vector<6x1xf32> to vector<6x18xf32>
    %458 = arith.subf %454, %457 : vector<6x18xf32>
    %459 = math.exp %458 : vector<6x18xf32>
    %cst_122 = arith.constant dense<0.000000e+00> : vector<6xf32>
    %460 = vector.multi_reduction <add>, %459, %cst_122 [1] : vector<6x18xf32> to vector<6xf32>
    %461 = vector.shape_cast %460 : vector<6xf32> to vector<6x1xf32>
    %462 = tpu.reciprocal %461 {approx = true} : vector<6x1xf32> -> vector<6x1xf32>
    %463 = vector.broadcast %462 : vector<6x1xf32> to vector<6x18xf32>
    %464 = arith.mulf %459, %463 : vector<6x18xf32>
    %cst_123 = arith.constant dense<0.000000e+00> : vector<6x8xf32>
    %465 = tpu.matmul %464, %450, %cst_123 {dimension_numbers = #tpu.dot_dimension_numbers<[1], [0], [0], [1], [0, 0, 1, 1], [], []>} : vector<6x18xf32>, vector<18x8xf32>, vector<6x8xf32> -> vector<6x8xf32>
    %466 = vector.extract_strided_slice %408 {offsets = [0, 24], sizes = [6, 8], strides = [1, 1]} : vector<6x32xf32> to vector<6x8xf32>
    %467 = vector.extract_strided_slice %409 {offsets = [0, 24], sizes = [18, 8], strides = [1, 1]} : vector<18x32xf32> to vector<18x8xf32>
    %468 = vector.extract_strided_slice %410 {offsets = [0, 24], sizes = [18, 8], strides = [1, 1]} : vector<18x32xf32> to vector<18x8xf32>
    %cst_124 = arith.constant dense<0.000000e+00> : vector<6x18xf32>
    %469 = tpu.matmul %466, %467, %cst_124 {dimension_numbers = #tpu.dot_dimension_numbers<[1], [1], [0], [0], [0, 0, 1, 0], [], []>} : vector<6x8xf32>, vector<18x8xf32>, vector<6x18xf32> -> vector<6x18xf32>
    %cst_125 = arith.constant 0.353553385 : f32
    %470 = vector.broadcast %cst_125 : f32 to vector<6x18xf32>
    %471 = arith.mulf %469, %470 : vector<6x18xf32>
    %472 = arith.addf %471, %411 : vector<6x18xf32>
    %cst_126 = arith.constant dense<0xFF800000> : vector<6xf32>
    %473 = vector.multi_reduction <maximumf>, %472, %cst_126 [1] : vector<6x18xf32> to vector<6xf32>
    %474 = vector.shape_cast %473 : vector<6xf32> to vector<6x1xf32>
    %475 = vector.broadcast %474 : vector<6x1xf32> to vector<6x18xf32>
    %476 = arith.subf %472, %475 : vector<6x18xf32>
    %477 = math.exp %476 : vector<6x18xf32>
    %cst_127 = arith.constant dense<0.000000e+00> : vector<6xf32>
    %478 = vector.multi_reduction <add>, %477, %cst_127 [1] : vector<6x18xf32> to vector<6xf32>
    %479 = vector.shape_cast %478 : vector<6xf32> to vector<6x1xf32>
    %480 = tpu.reciprocal %479 {approx = true} : vector<6x1xf32> -> vector<6x1xf32>
    %481 = vector.broadcast %480 : vector<6x1xf32> to vector<6x18xf32>
    %482 = arith.mulf %477, %481 : vector<6x18xf32>
    %cst_128 = arith.constant dense<0.000000e+00> : vector<6x8xf32>
    %483 = tpu.matmul %482, %468, %cst_128 {dimension_numbers = #tpu.dot_dimension_numbers<[1], [0], [0], [1], [0, 0, 1, 1], [], []>} : vector<6x18xf32>, vector<18x8xf32>, vector<6x8xf32> -> vector<6x8xf32>
    %484 = tpu.concatenate %429, %447, %465, %483 in 1 : vector<6x8xf32>, vector<6x8xf32>, vector<6x8xf32>, vector<6x8xf32> -> vector<6x32xf32>
    %c104 = arith.constant 104 : index
    %c0_129 = arith.constant 0 : index
    %485 = vector.load %arg0[%c104, %c0_129] : memref<696x128xf32, #tpu.memory_space<vmem>>, vector<32x32xf32>
    %cst_130 = arith.constant dense<0.000000e+00> : vector<6x32xf32>
    %486 = tpu.matmul %484, %485, %cst_130 {dimension_numbers = #tpu.dot_dimension_numbers<[1], [0], [0], [1], [0, 0, 1, 1], [], []>} : vector<6x32xf32>, vector<32x32xf32>, vector<6x32xf32> -> vector<6x32xf32>
    %487 = vector.extract_strided_slice %0 {offsets = [8, 0], sizes = [1, 32], strides = [1, 1]} : vector<32x128xf32> to vector<1x32xf32>
    %488 = vector.broadcast %487 : vector<1x32xf32> to vector<6x32xf32>
    %489 = arith.addf %486, %488 : vector<6x32xf32>
    %cst_131 = arith.constant dense<0.000000e+00> : vector<2x32xf32>
    %490 = tpu.matmul %6, %489, %cst_131 {dimension_numbers = #tpu.dot_dimension_numbers<[1], [0], [0], [1], [0, 0, 1, 1], [], []>} : vector<2x6xf32>, vector<6x32xf32>, vector<2x32xf32> -> vector<2x32xf32>
    %c136 = arith.constant 136 : index
    %c0_132 = arith.constant 0 : index
    %491 = vector.load %arg0[%c136, %c0_132] : memref<696x128xf32, #tpu.memory_space<vmem>>, vector<32x32xf32>
    %cst_133 = arith.constant dense<0.000000e+00> : vector<2x32xf32>
    %492 = tpu.matmul %490, %491, %cst_133 {dimension_numbers = #tpu.dot_dimension_numbers<[1], [0], [0], [1], [0, 0, 1, 1], [], []>} : vector<2x32xf32>, vector<32x32xf32>, vector<2x32xf32> -> vector<2x32xf32>
    %493 = vector.extract_strided_slice %0 {offsets = [9, 0], sizes = [1, 32], strides = [1, 1]} : vector<32x128xf32> to vector<1x32xf32>
    %494 = vector.broadcast %493 : vector<1x32xf32> to vector<2x32xf32>
    %495 = arith.addf %492, %494 : vector<2x32xf32>
    %c168 = arith.constant 168 : index
    %c0_134 = arith.constant 0 : index
    %496 = vector.load %arg0[%c168, %c0_134] : memref<696x128xf32, #tpu.memory_space<vmem>>, vector<32x64xf32>
    %cst_135 = arith.constant dense<0.000000e+00> : vector<6x64xf32>
    %497 = tpu.matmul %489, %496, %cst_135 {dimension_numbers = #tpu.dot_dimension_numbers<[1], [0], [0], [1], [0, 0, 1, 1], [], []>} : vector<6x32xf32>, vector<32x64xf32>, vector<6x64xf32> -> vector<6x64xf32>
    %498 = vector.extract_strided_slice %0 {offsets = [10, 0], sizes = [1, 64], strides = [1, 1]} : vector<32x128xf32> to vector<1x64xf32>
    %499 = vector.broadcast %498 : vector<1x64xf32> to vector<6x64xf32>
    %500 = arith.addf %497, %499 : vector<6x64xf32>
    %501 = vector.extract_strided_slice %500 {offsets = [0, 0], sizes = [6, 32], strides = [1, 1]} : vector<6x64xf32> to vector<6x32xf32>
    %502 = vector.extract_strided_slice %500 {offsets = [0, 32], sizes = [6, 32], strides = [1, 1]} : vector<6x64xf32> to vector<6x32xf32>
    %c312 = arith.constant 312 : index
    %c0_136 = arith.constant 0 : index
    %503 = vector.load %arg0[%c312, %c0_136] : memref<696x128xf32, #tpu.memory_space<vmem>>, vector<2x6xf32>
    %504 = vector.extract_strided_slice %495 {offsets = [0, 0], sizes = [2, 8], strides = [1, 1]} : vector<2x32xf32> to vector<2x8xf32>
    %505 = vector.extract_strided_slice %501 {offsets = [0, 0], sizes = [6, 8], strides = [1, 1]} : vector<6x32xf32> to vector<6x8xf32>
    %506 = vector.extract_strided_slice %502 {offsets = [0, 0], sizes = [6, 8], strides = [1, 1]} : vector<6x32xf32> to vector<6x8xf32>
    %cst_137 = arith.constant dense<0.000000e+00> : vector<2x6xf32>
    %507 = tpu.matmul %504, %505, %cst_137 {dimension_numbers = #tpu.dot_dimension_numbers<[1], [1], [0], [0], [0, 0, 1, 0], [], []>} : vector<2x8xf32>, vector<6x8xf32>, vector<2x6xf32> -> vector<2x6xf32>
    %cst_138 = arith.constant 0.353553385 : f32
    %508 = vector.broadcast %cst_138 : f32 to vector<2x6xf32>
    %509 = arith.mulf %507, %508 : vector<2x6xf32>
    %510 = arith.addf %509, %503 : vector<2x6xf32>
    %cst_139 = arith.constant dense<0xFF800000> : vector<2xf32>
    %511 = vector.multi_reduction <maximumf>, %510, %cst_139 [1] : vector<2x6xf32> to vector<2xf32>
    %512 = vector.shape_cast %511 : vector<2xf32> to vector<2x1xf32>
    %513 = vector.broadcast %512 : vector<2x1xf32> to vector<2x6xf32>
    %514 = arith.subf %510, %513 : vector<2x6xf32>
    %515 = math.exp %514 : vector<2x6xf32>
    %cst_140 = arith.constant dense<0.000000e+00> : vector<2xf32>
    %516 = vector.multi_reduction <add>, %515, %cst_140 [1] : vector<2x6xf32> to vector<2xf32>
    %517 = vector.shape_cast %516 : vector<2xf32> to vector<2x1xf32>
    %518 = tpu.reciprocal %517 {approx = true} : vector<2x1xf32> -> vector<2x1xf32>
    %519 = vector.broadcast %518 : vector<2x1xf32> to vector<2x6xf32>
    %520 = arith.mulf %515, %519 : vector<2x6xf32>
    %cst_141 = arith.constant dense<0.000000e+00> : vector<2x8xf32>
    %521 = tpu.matmul %520, %506, %cst_141 {dimension_numbers = #tpu.dot_dimension_numbers<[1], [0], [0], [1], [0, 0, 1, 1], [], []>} : vector<2x6xf32>, vector<6x8xf32>, vector<2x8xf32> -> vector<2x8xf32>
    %522 = vector.extract_strided_slice %495 {offsets = [0, 8], sizes = [2, 8], strides = [1, 1]} : vector<2x32xf32> to vector<2x8xf32>
    %523 = vector.extract_strided_slice %501 {offsets = [0, 8], sizes = [6, 8], strides = [1, 1]} : vector<6x32xf32> to vector<6x8xf32>
    %524 = vector.extract_strided_slice %502 {offsets = [0, 8], sizes = [6, 8], strides = [1, 1]} : vector<6x32xf32> to vector<6x8xf32>
    %cst_142 = arith.constant dense<0.000000e+00> : vector<2x6xf32>
    %525 = tpu.matmul %522, %523, %cst_142 {dimension_numbers = #tpu.dot_dimension_numbers<[1], [1], [0], [0], [0, 0, 1, 0], [], []>} : vector<2x8xf32>, vector<6x8xf32>, vector<2x6xf32> -> vector<2x6xf32>
    %cst_143 = arith.constant 0.353553385 : f32
    %526 = vector.broadcast %cst_143 : f32 to vector<2x6xf32>
    %527 = arith.mulf %525, %526 : vector<2x6xf32>
    %528 = arith.addf %527, %503 : vector<2x6xf32>
    %cst_144 = arith.constant dense<0xFF800000> : vector<2xf32>
    %529 = vector.multi_reduction <maximumf>, %528, %cst_144 [1] : vector<2x6xf32> to vector<2xf32>
    %530 = vector.shape_cast %529 : vector<2xf32> to vector<2x1xf32>
    %531 = vector.broadcast %530 : vector<2x1xf32> to vector<2x6xf32>
    %532 = arith.subf %528, %531 : vector<2x6xf32>
    %533 = math.exp %532 : vector<2x6xf32>
    %cst_145 = arith.constant dense<0.000000e+00> : vector<2xf32>
    %534 = vector.multi_reduction <add>, %533, %cst_145 [1] : vector<2x6xf32> to vector<2xf32>
    %535 = vector.shape_cast %534 : vector<2xf32> to vector<2x1xf32>
    %536 = tpu.reciprocal %535 {approx = true} : vector<2x1xf32> -> vector<2x1xf32>
    %537 = vector.broadcast %536 : vector<2x1xf32> to vector<2x6xf32>
    %538 = arith.mulf %533, %537 : vector<2x6xf32>
    %cst_146 = arith.constant dense<0.000000e+00> : vector<2x8xf32>
    %539 = tpu.matmul %538, %524, %cst_146 {dimension_numbers = #tpu.dot_dimension_numbers<[1], [0], [0], [1], [0, 0, 1, 1], [], []>} : vector<2x6xf32>, vector<6x8xf32>, vector<2x8xf32> -> vector<2x8xf32>
    %540 = vector.extract_strided_slice %495 {offsets = [0, 16], sizes = [2, 8], strides = [1, 1]} : vector<2x32xf32> to vector<2x8xf32>
    %541 = vector.extract_strided_slice %501 {offsets = [0, 16], sizes = [6, 8], strides = [1, 1]} : vector<6x32xf32> to vector<6x8xf32>
    %542 = vector.extract_strided_slice %502 {offsets = [0, 16], sizes = [6, 8], strides = [1, 1]} : vector<6x32xf32> to vector<6x8xf32>
    %cst_147 = arith.constant dense<0.000000e+00> : vector<2x6xf32>
    %543 = tpu.matmul %540, %541, %cst_147 {dimension_numbers = #tpu.dot_dimension_numbers<[1], [1], [0], [0], [0, 0, 1, 0], [], []>} : vector<2x8xf32>, vector<6x8xf32>, vector<2x6xf32> -> vector<2x6xf32>
    %cst_148 = arith.constant 0.353553385 : f32
    %544 = vector.broadcast %cst_148 : f32 to vector<2x6xf32>
    %545 = arith.mulf %543, %544 : vector<2x6xf32>
    %546 = arith.addf %545, %503 : vector<2x6xf32>
    %cst_149 = arith.constant dense<0xFF800000> : vector<2xf32>
    %547 = vector.multi_reduction <maximumf>, %546, %cst_149 [1] : vector<2x6xf32> to vector<2xf32>
    %548 = vector.shape_cast %547 : vector<2xf32> to vector<2x1xf32>
    %549 = vector.broadcast %548 : vector<2x1xf32> to vector<2x6xf32>
    %550 = arith.subf %546, %549 : vector<2x6xf32>
    %551 = math.exp %550 : vector<2x6xf32>
    %cst_150 = arith.constant dense<0.000000e+00> : vector<2xf32>
    %552 = vector.multi_reduction <add>, %551, %cst_150 [1] : vector<2x6xf32> to vector<2xf32>
    %553 = vector.shape_cast %552 : vector<2xf32> to vector<2x1xf32>
    %554 = tpu.reciprocal %553 {approx = true} : vector<2x1xf32> -> vector<2x1xf32>
    %555 = vector.broadcast %554 : vector<2x1xf32> to vector<2x6xf32>
    %556 = arith.mulf %551, %555 : vector<2x6xf32>
    %cst_151 = arith.constant dense<0.000000e+00> : vector<2x8xf32>
    %557 = tpu.matmul %556, %542, %cst_151 {dimension_numbers = #tpu.dot_dimension_numbers<[1], [0], [0], [1], [0, 0, 1, 1], [], []>} : vector<2x6xf32>, vector<6x8xf32>, vector<2x8xf32> -> vector<2x8xf32>
    %558 = vector.extract_strided_slice %495 {offsets = [0, 24], sizes = [2, 8], strides = [1, 1]} : vector<2x32xf32> to vector<2x8xf32>
    %559 = vector.extract_strided_slice %501 {offsets = [0, 24], sizes = [6, 8], strides = [1, 1]} : vector<6x32xf32> to vector<6x8xf32>
    %560 = vector.extract_strided_slice %502 {offsets = [0, 24], sizes = [6, 8], strides = [1, 1]} : vector<6x32xf32> to vector<6x8xf32>
    %cst_152 = arith.constant dense<0.000000e+00> : vector<2x6xf32>
    %561 = tpu.matmul %558, %559, %cst_152 {dimension_numbers = #tpu.dot_dimension_numbers<[1], [1], [0], [0], [0, 0, 1, 0], [], []>} : vector<2x8xf32>, vector<6x8xf32>, vector<2x6xf32> -> vector<2x6xf32>
    %cst_153 = arith.constant 0.353553385 : f32
    %562 = vector.broadcast %cst_153 : f32 to vector<2x6xf32>
    %563 = arith.mulf %561, %562 : vector<2x6xf32>
    %564 = arith.addf %563, %503 : vector<2x6xf32>
    %cst_154 = arith.constant dense<0xFF800000> : vector<2xf32>
    %565 = vector.multi_reduction <maximumf>, %564, %cst_154 [1] : vector<2x6xf32> to vector<2xf32>
    %566 = vector.shape_cast %565 : vector<2xf32> to vector<2x1xf32>
    %567 = vector.broadcast %566 : vector<2x1xf32> to vector<2x6xf32>
    %568 = arith.subf %564, %567 : vector<2x6xf32>
    %569 = math.exp %568 : vector<2x6xf32>
    %cst_155 = arith.constant dense<0.000000e+00> : vector<2xf32>
    %570 = vector.multi_reduction <add>, %569, %cst_155 [1] : vector<2x6xf32> to vector<2xf32>
    %571 = vector.shape_cast %570 : vector<2xf32> to vector<2x1xf32>
    %572 = tpu.reciprocal %571 {approx = true} : vector<2x1xf32> -> vector<2x1xf32>
    %573 = vector.broadcast %572 : vector<2x1xf32> to vector<2x6xf32>
    %574 = arith.mulf %569, %573 : vector<2x6xf32>
    %cst_156 = arith.constant dense<0.000000e+00> : vector<2x8xf32>
    %575 = tpu.matmul %574, %560, %cst_156 {dimension_numbers = #tpu.dot_dimension_numbers<[1], [0], [0], [1], [0, 0, 1, 1], [], []>} : vector<2x6xf32>, vector<6x8xf32>, vector<2x8xf32> -> vector<2x8xf32>
    %576 = tpu.concatenate %521, %539, %557, %575 in 1 : vector<2x8xf32>, vector<2x8xf32>, vector<2x8xf32>, vector<2x8xf32> -> vector<2x32xf32>
    %c200 = arith.constant 200 : index
    %c0_157 = arith.constant 0 : index
    %577 = vector.load %arg0[%c200, %c0_157] : memref<696x128xf32, #tpu.memory_space<vmem>>, vector<32x32xf32>
    %cst_158 = arith.constant dense<0.000000e+00> : vector<2x32xf32>
    %578 = tpu.matmul %576, %577, %cst_158 {dimension_numbers = #tpu.dot_dimension_numbers<[1], [0], [0], [1], [0, 0, 1, 1], [], []>} : vector<2x32xf32>, vector<32x32xf32>, vector<2x32xf32> -> vector<2x32xf32>
    %579 = vector.extract_strided_slice %0 {offsets = [11, 0], sizes = [1, 32], strides = [1, 1]} : vector<32x128xf32> to vector<1x32xf32>
    %580 = vector.broadcast %579 : vector<1x32xf32> to vector<2x32xf32>
    %581 = arith.addf %578, %580 : vector<2x32xf32>
    %cst_159 = arith.constant dense<0.000000e+00> : vector<2x18xf32>
    %582 = tpu.matmul %581, %398, %cst_159 {dimension_numbers = #tpu.dot_dimension_numbers<[1], [1], [0], [0], [0, 0, 1, 0], [], []>} : vector<2x32xf32>, vector<18x32xf32>, vector<2x18xf32> -> vector<2x18xf32>
    %cst_160 = arith.constant 5.65685415 : f32
    %583 = vector.broadcast %cst_160 : f32 to vector<2x18xf32>
    %584 = arith.mulf %582, %583 : vector<2x18xf32>
    %585 = math.tanh %584 : vector<2x18xf32>
    %cst_161 = arith.constant 1.000000e+01 : f32
    %586 = vector.broadcast %cst_161 : f32 to vector<2x18xf32>
    %587 = arith.mulf %586, %585 : vector<2x18xf32>
    %588 = arith.addf %587, %7 : vector<2x18xf32>
    %cst_162 = arith.constant dense<0xFF800000> : vector<2xf32>
    %589 = vector.multi_reduction <maximumf>, %588, %cst_162 [1] : vector<2x18xf32> to vector<2xf32>
    %590 = vector.shape_cast %589 : vector<2xf32> to vector<2x1xf32>
    %591 = vector.broadcast %590 : vector<2x1xf32> to vector<2x18xf32>
    %592 = arith.subf %588, %591 : vector<2x18xf32>
    %593 = math.exp %592 : vector<2x18xf32>
    %cst_163 = arith.constant dense<0.000000e+00> : vector<2xf32>
    %594 = vector.multi_reduction <add>, %593, %cst_163 [1] : vector<2x18xf32> to vector<2xf32>
    %595 = vector.shape_cast %594 : vector<2xf32> to vector<2x1xf32>
    %596 = vector.broadcast %595 : vector<2x1xf32> to vector<2x18xf32>
    %597 = arith.divf %593, %596 : vector<2x18xf32>
    %c320 = arith.constant 320 : index
    %c0_164 = arith.constant 0 : index
    %598 = vector.load %arg0[%c320, %c0_164] : memref<696x128xf32, #tpu.memory_space<vmem>>, vector<18x9xf32>
    %cst_165 = arith.constant dense<0.000000e+00> : vector<2x9xf32>
    %599 = tpu.matmul %597, %598, %cst_165 {dimension_numbers = #tpu.dot_dimension_numbers<[1], [0], [0], [1], [0, 0, 1, 1], [], []>} : vector<2x18xf32>, vector<18x9xf32>, vector<2x9xf32> -> vector<2x9xf32>
    %cst_166 = arith.constant dense<0xFF800000> : vector<2xf32>
    %600 = vector.multi_reduction <maximumf>, %599, %cst_166 [1] : vector<2x9xf32> to vector<2xf32>
    %601 = vector.shape_cast %600 : vector<2xf32> to vector<2x1xf32>
    %602 = tpu.iota {dimensions = array<i32: 1>} : vector<2x9xi32>
    %603 = arith.sitofp %602 : vector<2x9xi32> to vector<2x9xf32>
    %604 = vector.broadcast %601 : vector<2x1xf32> to vector<2x9xf32>
    %605 = arith.cmpf oge, %599, %604 : vector<2x9xf32>
    %cst_167 = arith.constant 9.000000e+00 : f32
    %606 = vector.broadcast %cst_167 : f32 to vector<2x9xf32>
    %607 = arith.select %605, %603, %606 : vector<2x9xi1>, vector<2x9xf32>
    %cst_168 = arith.constant dense<0x7F800000> : vector<2xf32>
    %608 = vector.multi_reduction <minimumf>, %607, %cst_168 [1] : vector<2x9xf32> to vector<2xf32>
    %609 = vector.shape_cast %608 : vector<2xf32> to vector<2x1xf32>
    %cst_169 = arith.constant 9.99999968E-21 : f32
    %610 = vector.broadcast %cst_169 : f32 to vector<2x1xf32>
    %611 = arith.addf %601, %610 : vector<2x1xf32>
    %612 = math.log %611 : vector<2x1xf32>
    %c232 = arith.constant 232 : index
    %c0_170 = arith.constant 0 : index
    %613 = vector.load %arg0[%c232, %c0_170] : memref<696x128xf32, #tpu.memory_space<vmem>>, vector<9x32xf32>
    %cst_171 = arith.constant dense<0.000000e+00> : vector<2x32xf32>
    %614 = tpu.matmul %599, %613, %cst_171 {dimension_numbers = #tpu.dot_dimension_numbers<[1], [0], [0], [1], [0, 0, 1, 1], [], []>} : vector<2x9xf32>, vector<9x32xf32>, vector<2x32xf32> -> vector<2x32xf32>
    %615 = vector.extract_strided_slice %0 {offsets = [12, 0], sizes = [1, 32], strides = [1, 1]} : vector<32x128xf32> to vector<1x32xf32>
    %616 = vector.broadcast %615 : vector<1x32xf32> to vector<2x32xf32>
    %617 = arith.addf %614, %616 : vector<2x32xf32>
    %cst_172 = arith.constant 0.000000e+00 : f32
    %618 = vector.broadcast %cst_172 : f32 to vector<2x32xf32>
    %619 = arith.maximumf %617, %618 : vector<2x32xf32>
    %c248 = arith.constant 248 : index
    %c0_173 = arith.constant 0 : index
    %620 = vector.load %arg0[%c248, %c0_173] : memref<696x128xf32, #tpu.memory_space<vmem>>, vector<32x1xf32>
    %cst_174 = arith.constant dense<0.000000e+00> : vector<2x1xf32>
    %621 = tpu.matmul %619, %620, %cst_174 {dimension_numbers = #tpu.dot_dimension_numbers<[1], [0], [0], [1], [0, 0, 1, 1], [], []>} : vector<2x32xf32>, vector<32x1xf32>, vector<2x1xf32> -> vector<2x1xf32>
    %622 = vector.extract_strided_slice %0 {offsets = [13, 0], sizes = [1, 1], strides = [1, 1]} : vector<32x128xf32> to vector<1x1xf32>
    %623 = vector.broadcast %622 : vector<1x1xf32> to vector<2x1xf32>
    %624 = arith.addf %621, %623 : vector<2x1xf32>
    %cst_175 = arith.constant 0.000000e+00 : f32
    %625 = vector.broadcast %cst_175 : f32 to vector<2x116xf32>
    %626 = tpu.concatenate %609, %612, %624, %599, %625 in 1 : vector<2x1xf32>, vector<2x1xf32>, vector<2x1xf32>, vector<2x9xf32>, vector<2x116xf32> -> vector<2x128xf32>
    %c0_176 = arith.constant 0 : index
    %c0_177 = arith.constant 0 : index
    %627 = vector.load %arg3[%c0_176, %c0_177] : memref<2x128xf32, #tpu.memory_space<vmem>>, vector<2x128xf32>
    tpu.vector_store %arg3[%c0_176, %c0_177], %626 {strides = array<i32>} : memref<2x128xf32, #tpu.memory_space<vmem>>, vector<2x128xf32>,
    return
  }
}

</mosaic_0001>

<bundles_post_ra>
// kernel: model_forward.1
= control target key start
LH: loop header
LB: loop body
LE: loop exit
PB: predicated region body
PF: predicated region fallthrough
CT: control target
= control target key end

     0   :  { %vm36_vm0 = vcmask 1045504   ;;  %vm26_vm1 = vcmask 48128   ;;  %v7355_v0 = vmov 0.0   ;;  %vm7356_vm2 = vmmov 0   ;;  %s7357_s16 = smov 122   ;;  %s7358_s20 = smov 96   ;;  %s9101_s1 = inlined_call_operand.vmem [shape: f32[18,24], index: 1, kind: input, shape index: {}]   ;;  %s9102_s0 = inlined_call_operand.vmem [shape: f32[696,128], index: 0, kind: input, shape index: {}]   ;;  %s9103_s2 = inlined_call_operand.vmem [shape: f32[6,28], index: 2, kind: input, shape index: {}]   ;;  %s9104_s3 = inlined_call_operand.vmem [shape: f32[2,128], index: 3, kind: output, shape index: {}]  }
   0x1   :  { %6516 = vmatprep.subr.mxu0 %v7355_v0  ;;  %6518 = vmatprep.mubr.msk.f32.mxu0 %vm7356_vm2, %v7355_v0  ;;  %v7405_v1 = vld [vmem:[%s9101_s1] sm:$0xff]  ;;  %v7416_v3 = vld [vmem:[%s9101_s1 + $0x10] sm:$0x3]  ;;  %v7423_v4 = vld [vmem:[%s9101_s1 + $0x8] sm:$0xff]  ;;  %vm181_vm3 = vcmask 146432   ;;  %vm188_vm4 = vcmask 140288   ;;  %v158_v58 = vlaneseq }
   0x2   :  { %v22_v2 = vld [vmem:[%s9102_s0] sm:$0x3f]  ;;  %172 = vrot.lane.b32.xlu0 %v7405_v1, %s7357_s16  ;;  %176 = vrot.lane.b32.xlu1 %v7416_v3, %s7357_s16  ;;  %v255_v11 = vld [vmem:[%s9102_s0 + $0x170] sm:$0xff]  ;;  %vm120_vm5 = vcmask 261120   ;;  %vm124_vm6 = vcmask 254976   ;;  %vm193_vm7 = vcmask 1041408  }
   0x3   :  { %6517 = vmatpush3.msk.msra.mxu0 %vm36_vm0, %v22_v2  ;;  %6527 = vmatprep.subr.mxu1 %v7355_v0  ;;  %v254_v12 = vld [vmem:[%s9102_s0 + $0x168] sm:$0xff]  ;;  %v253_v13 = vld [vmem:[%s9102_s0 + $0x160] sm:$0xff]  ;;  %v252_v14 = vld [vmem:[%s9102_s0 + $0x158] sm:$0xff]  ;;  %v7478_v59 = vshrl.u32 %v158_v58, 7  ;;  %vm436_vm8 = vcmask 64512   ;;  %s7359_s27 = smov 64  }
   0x4   :  { %6519 = vmatmul.mubr.msk.f32.vlgmr.msra.gmra.mxu0 %vm26_vm1, %v7405_v1  ;;  %6535 = vmatprep.mubr.msk.f32.mxu1 %vm7356_vm2, %v7355_v0  ;;  %v23_v15 = vld [vmem:[%s9102_s0 + $0x8] sm:$0xff]  ;;  %v24_v19 = vld [vmem:[%s9102_s0 + $0x10] sm:$0xff]  ;;  %v25_v24 = vld [vmem:[%s9102_s0 + $0x18] sm:$0x3]  ;;  %s7360_s28 = smov 88   ;;  %s7361_s29 = smov 80  }
   0x5   :  { %6521 = vmatprep.mubr.msk.f32.mxu0 %vm7356_vm2, %v7355_v0  ;;  %6544 = vmatprep.subr.mxu0 %v7355_v0  ;;  %v7481_v60 = vsub.s32 0, %v7478_v59  ;;  %v7486_v61 = vld [vmem:[%s9102_s0 + $0x298] sm:$0xff]  ;;  %v7489_v62 = vsub.s32 1, %v7478_v59  ;;  %s7362_s30 = smov 120   ;;  %s7363_s4 = smov 72   ;;  %vm1523_vm9 = vcmask 130048  }
   0x6   :  { %174 = vrot.lane.b32.xlu0 %v7423_v4, %s7357_s16  ;;  %6528 = vmatpush3.msra.mxu1 %v255_v11  ;;  %s7364_s5 = smov 112   ;;  %s7365_s6 = smov 104   ;;  %vm1527_vm10 = vcmask 195584   ;;  %vm3793_vm11 = vcmask 1043456   ;;  %vm3789_vm12 = vcmask 31744   ;;  %vm3952_vm13 = vcmask 144384  }
   0x7   :  { %6529 = vmatprep.subr.mxu1 %v7355_v0  ;;  %v161_v2 = vrot.slane %v7486_v61, %v7481_v60  ;;  %s7366_s7 = smov 127   ;;  %s7367_s8 = smov 125   ;;  %vm5006_vm14 = vcmask 41984   ;;  %vm5899_vm15 = vcmask 1040384  }
   0x8   :  { %6522 = vmatmul.mubr.msk.f32.gmra.mxu0 %vm26_vm1, %v7423_v4  ;;  %6530 = vmatpush3.msra.mxu1 %v254_v12  ;;  %s7368_s9 = smov 126   ;;  %s7369_s13 = smov 56  }
   0x9   :  { %6524 = vmatprep.mubr.msk.f32.mxu0 %vm7356_vm2, %v7355_v0  ;;  %6531 = vmatprep.subr.mxu1 %v7355_v0  ;;  %s7370_s14 = smov 48   ;;  %s7371_s15 = smov 40  }
   0xa   :  { %6532 = vmatpush3.msra.mxu1 %v253_v13  ;;  %s7372_s17 = smov 8   ;;  %s7373_s26 = smov 16  }
   0xb   :  { %6533 = vmatprep.subr.mxu1 %v7355_v0 }
   0xc   :  { %6525 = vmatmul.mubr.msk.f32.gmra.mxu0 %vm26_vm1, %v7416_v3  ;;  %6534 = vmatpush3.msra.mxu1 %v252_v14 }
   0xd   :  { %6552 = vmatprep.mubr.msk.f32.mxu0 %vm7356_vm2, %v7355_v0  ;;  %6555 = vmatprep.subr.mxu1 %v7355_v0 }
  0x74   :  { %v173_v5 = vpop.permute.xlu0 %172  ;;  %v177_v8 = vpop.permute.xlu1 %176 }
  0x75   :  { %v182_v6 = vsel %vm181_vm3, %v173_v5, 0.0  ;;  %v189_v10 = vsel %vm188_vm4, %v177_v8, 0.0  ;;  %v168_v8 = vrot.slane %v7486_v61, %v7489_v62 }
  0x76   :  { %183 = vadd.xlane.f32.xlu1 %v182_v6 }
  0x78   :  { %v175_v7 = vpop.permute.xlu0 %174 }
  0x79   :  { %v185_v9 = vsel %vm181_vm3, %v175_v7, 0.0 }
  0x7a   :  { %186 = vadd.xlane.f32.xlu0 %v185_v9 }
  0x7e   :  { %190 = vadd.xlane.f32.xlu0 %v189_v10 }
  0xc4   :  { %v106_v16 = vpop.f32.mrf.mxu0 }
  0xc5   :  { %v107_v17 = vadd.f32 %v106_v16, %v23_v15 }
  0xc6   :  { %v6520_v18 = vpop.f32.mrf.mxu0 }
  0xc7   :  { %v121_v21 = vsel %vm120_vm5, %v107_v17, 0.0 }
  0xc8   :  { %v111_v20 = vpop.f32.mrf.mxu0 }
  0xc9   :  { %v112_v22 = vadd.f32 %v111_v20, %v24_v19 }
  0xca   :  { %v6523_v23 = vpop.f32.mrf.mxu0 }
  0xcb   :  { %v122_v25 = vsel %vm120_vm5, %v112_v22, 0.0 }
  0xcc   :  { %v123_v26 = vadd.f32 %v122_v25, %v121_v21  ;;  %v116_v27 = vpop.f32.mrf.mxu0 }
  0xcd   :  { %v117_v28 = vadd.f32 %v116_v27, %v25_v24 }
  0xce   :  { %v6526_v29 = vpop.f32.mrf.mxu0 }
  0xcf   :  { %v125_v30 = vsel %vm124_vm6, %v117_v28, 0.0 }
  0xd0   :  { %v126_v31 = vadd.f32 %v125_v30, %v123_v26 }
  0xd2   :  { %v127_v32 = vrot.slane %v126_v31, 4 }
  0xd4   :  { %v128_v33 = vadd.f32 %v127_v32, %v126_v31 }
  0xd6   :  { %v129_v34 = vrot.slane %v128_v33, 2 }
  0xd8   :  { %v130_v35 = vadd.f32 %v129_v34, %v128_v33 }
  0xda   :  { %v131_v36 = vrot.slane %v130_v35, 1 }
  0xdc   :  { %v132_v37 = vadd.f32 %v131_v36, %v130_v35 }
  0xde   :  { %v134_v38 = vmul.f32 0.055555556, %v132_v37  ;;  %v352_v37 = vld [vmem:[%s9102_s0 + $0x1b0] sm:$0xff] }
  0xdf   :  { %6545 = vmatpush3.msra.mxu0 %v352_v37 }
  0xe0   :  { %v135_v39 = vsub.f32 %v107_v17, %v134_v38  ;;  %v136_v40 = vsub.f32 %v112_v22, %v134_v38  ;;  %v137_v41 = vsub.f32 %v117_v28, %v134_v38  ;;  %v351_v38 = vld [vmem:[%s9102_s0 + $0x1a8] sm:$0xff]  ;;  %6546 = vmatprep.subr.mxu0 %v7355_v0 }
  0xe1   :  { %6547 = vmatpush3.msra.mxu0 %v351_v38  ;;  %v7613_v38 = vld [vmem:[%s9102_s0 + $0x118] sm:$0xff] }
  0xe2   :  { %v138_v42 = vmul.f32 %v135_v39, %v135_v39  ;;  %v139_v43 = vmul.f32 %v136_v40, %v136_v40  ;;  %v140_v44 = vmul.f32 %v137_v41, %v137_v41  ;;  %6548 = vmatprep.subr.mxu0 %v7355_v0 }
  0xe4   :  { %v141_v45 = vsel %vm120_vm5, %v138_v42, 0.0  ;;  %v142_v46 = vsel %vm120_vm5, %v139_v43, 0.0  ;;  %v144_v47 = vsel %vm124_vm6, %v140_v44, 0.0  ;;  %v15_v42 = vld [vmem:[%s9102_s0 + $0x2a0] sm:$0xff] }
  0xe5   :  { %v143_v48 = vadd.f32 %v142_v46, %v141_v45 }
  0xe7   :  { %v145_v49 = vadd.f32 %v144_v47, %v143_v48 }
  0xe9   :  { %v146_v50 = vrot.slane %v145_v49, 4 }
  0xeb   :  { %v147_v51 = vadd.f32 %v146_v50, %v145_v49 }
  0xed   :  { %v148_v52 = vrot.slane %v147_v51, 2 }
  0xef   :  { %v149_v53 = vadd.f32 %v148_v52, %v147_v51 }
  0xf1   :  { %v150_v54 = vrot.slane %v149_v53, 1 }
  0xf3   :  { %v151_v55 = vadd.f32 %v150_v54, %v149_v53 }
  0xf5   :  { %v152_v56 = vmul.f32 0.055555556, %v151_v55 }
  0xf7   :  { %v153_v57 = vadd.f32 1e-05, %v152_v56 }
  0xf9   :  { %7201 = vrsqrt.f32 %v153_v57 }
  0xff   :  { %v184_v6 = vpop.xlane.xlu1 %183 }
 0x103   :  { %v187_v63 = vpop.xlane.xlu0 %186 }
 0x104   :  { %v192_v10 = vadd.f32 %v187_v63, %v184_v6 }
 0x106   :  { %v7202_v5 = vpop.eup %7201 }
 0x107   :  { %v155_v7 = vmul.f32 %v7202_v5, %v135_v39  ;;  %v156_v9 = vmul.f32 %v7202_v5, %v136_v40  ;;  %v191_v11 = vpop.xlane.xlu0 %190  ;;  %v157_v12 = vmul.f32 %v7202_v5, %v137_v41  ;;  %v350_v39 = vld [vmem:[%s9102_s0 + $0x1a0] sm:$0xff]  ;;  %v349_v40 = vld [vmem:[%s9102_s0 + $0x198] sm:$0xff]  ;;  %v7552_v41 = vsub.s32 6, %v7478_v59 }
 0x108   :  { %v194_v13 = vsel %vm193_vm7, %v191_v11, 0.0  ;;  %6549 = vmatpush3.msra.mxu0 %v350_v39  ;;  %v7618_v39 = vld [vmem:[%s9102_s0 + $0x120] sm:$0xff] }
 0x109   :  { %v162_v14 = vmul.f32 %v161_v2, %v155_v7  ;;  %v163_v15 = vmul.f32 %v161_v2, %v156_v9  ;;  %v195_v16 = vadd.f32 %v194_v13, %v192_v10  ;;  %v164_v19 = vmul.f32 %v161_v2, %v157_v12  ;;  %6550 = vmatprep.subr.mxu0 %v7355_v0 }
 0x10a   :  { %6551 = vmatpush3.msra.mxu0 %v349_v40  ;;  %v259_v45 = vrot.slane %v15_v42, %v7552_v41 }
 0x10b   :  { %v7496_v17 = vadd.f32 %v168_v8, %v162_v14  ;;  %v196_v18 = vrot.slane %v195_v16, 4  ;;  %v7500_v20 = vadd.f32 %v168_v8, %v163_v15  ;;  %v7506_v23 = vadd.f32 %v168_v8, %v164_v19  ;;  %6570 = vmatprep.subr.mxu0 %v7355_v0 }
 0x10c   :  { %v241_v14 = vrot.slane %v7486_v61, 1 }
 0x10d   :  { %6536 = vmatmul.mubr.msk.f32.vlgmr.msra.gmra.mxu1 %vm120_vm5, %v7496_v17  ;;  %v197_v21 = vadd.f32 %v196_v18, %v195_v16 }
 0x10e   :  { %6538 = vmatprep.mubr.msk.f32.mxu1 %vm7356_vm2, %v7355_v0  ;;  %v243_v15 = vmul.f32 %v241_v14, %v7486_v61 }
 0x10f   :  { %v198_v22 = vrot.slane %v197_v21, 2 }
 0x111   :  { %6539 = vmatmul.mubr.msk.f32.gmra.mxu1 %vm120_vm5, %v7500_v20  ;;  %v199_v24 = vadd.f32 %v198_v22, %v197_v21 }
 0x112   :  { %6541 = vmatprep.mubr.msk.f32.mxu1 %vm7356_vm2, %v7355_v0 }
 0x113   :  { %v200_v25 = vrot.slane %v199_v24, 1 }
 0x115   :  { %6542 = vmatmul.mubr.msk.f32.gmra.mxu1 %vm120_vm5, %v7506_v23  ;;  %v201_v26 = vadd.f32 %v200_v25, %v199_v24 }
 0x116   :  { %6561 = vmatprep.mubr.msk.f32.mxu1 %vm7356_vm2, %v7355_v0 }
 0x117   :  { %v202_v27 = vmul.f32 0.0030864198, %v201_v26 }
 0x119   :  { %v7515_v28 = vsub.f32 %v7405_v1, %v202_v27  ;;  %v7518_v29 = vsub.f32 %v7423_v4, %v202_v27  ;;  %v7521_v30 = vsub.f32 %v7416_v3, %v202_v27 }
 0x11b   :  { %v207_v31 = vmul.f32 %v7518_v29, %v7518_v29  ;;  %v206_v32 = vmul.f32 %v7515_v28, %v7515_v28  ;;  %v208_v1 = vmul.f32 %v7521_v30, %v7521_v30 }
 0x11d   :  { %214 = vrot.lane.b32.xlu0 %v207_v31, %s7357_s16  ;;  %212 = vrot.lane.b32.xlu1 %v206_v32, %s7357_s16 }
 0x121   :  { %216 = vrot.lane.b32.xlu1 %v208_v1, %s7357_s16 }
 0x18f   :  { %v215_v4 = vpop.permute.xlu0 %214  ;;  %v213_v33 = vpop.permute.xlu1 %212 }
 0x190   :  { %v224_v3 = vsel %vm181_vm3, %v215_v4, 0.0  ;;  %v221_v34 = vsel %vm181_vm3, %v213_v33, 0.0 }
 0x191   :  { %225 = vadd.xlane.f32.xlu0 %v224_v3  ;;  %222 = vadd.xlane.f32.xlu1 %v221_v34 }
 0x193   :  { %v217_v35 = vpop.permute.xlu1 %216 }
 0x194   :  { %v227_v36 = vsel %vm188_vm4, %v217_v35, 0.0 }
 0x195   :  { %228 = vadd.xlane.f32.xlu0 %v227_v36 }
 0x1cd   :  { %v335_v43 = vpop.f32.mrf.mxu1 }
 0x1ce   :  { %v7564_v52 = vadd.f32 %v335_v43, %v259_v45 }
 0x1cf   :  { %v6537_v44 = vpop.f32.mrf.mxu1 }
 0x1d0   :  { %v7625_v44 = vld [vmem:[%s9102_s0 + $0x128] sm:$0x3] }
 0x1d1   :  { %v340_v46 = vpop.f32.mrf.mxu1 }
 0x1d2   :  { %v7558_v47 = vadd.f32 %v340_v46, %v259_v45 }
 0x1d3   :  { %v6540_v48 = vpop.f32.mrf.mxu1 }
 0x1d4   :  { %432 = vrot.lane.b32.xlu0 %v7558_v47, %s7358_s20 }
 0x1d5   :  { %v345_v49 = vpop.f32.mrf.mxu1 }
 0x1d6   :  { %v7562_v50 = vadd.f32 %v345_v49, %v259_v45 }
 0x1d7   :  { %v6543_v51 = vpop.f32.mrf.mxu1 }
 0x1d8   :  { %434 = vrot.lane.b32.xlu1 %v7562_v50, %s7358_s20 }
 0x1dc   :  { %430 = vrot.lane.b32.xlu1 %v7564_v52, %s7358_s20 }
 0x21a   :  { %v226_v53 = vpop.xlane.xlu0 %225  ;;  %v223_v54 = vpop.xlane.xlu1 %222 }
 0x21b   :  { %v230_v55 = vadd.f32 %v226_v53, %v223_v54 }
 0x21e   :  { %v229_v56 = vpop.xlane.xlu0 %228 }
 0x21f   :  { %v231_v57 = vsel %vm193_vm7, %v229_v56, 0.0 }
 0x220   :  { %v232_v63 = vadd.f32 %v231_v57, %v230_v55 }
 0x222   :  { %v233_v2 = vrot.slane %v232_v63, 4 }
 0x224   :  { %v234_v5 = vadd.f32 %v233_v2, %v232_v63 }
 0x226   :  { %v235_v6 = vrot.slane %v234_v5, 2 }
 0x228   :  { %v236_v7 = vadd.f32 %v235_v6, %v234_v5 }
 0x22a   :  { %v237_v8 = vrot.slane %v236_v7, 1 }
 0x22c   :  { %v238_v9 = vadd.f32 %v237_v8, %v236_v7 }
 0x22e   :  { %v239_v10 = vmul.f32 0.0030864198, %v238_v9 }
 0x230   :  { %v244_v11 = vmul.f32 %v239_v10, %v7486_v61 }
 0x232   :  { %v245_v12 = vmul.f32 %v244_v11, %v7486_v61 }
 0x234   :  { %v246_v13 = vadd.f32 1e-05, %v245_v12 }
 0x236   :  { %7203 = vrsqrt.f32 %v246_v13 }
 0x243   :  { %v7204_v16 = vpop.eup %7203 }
 0x244   :  { %v7575_v18 = vmul.f32 %v7204_v16, %v243_v15 }
 0x246   :  { %v354_v19 = vrot.slane %v7575_v18, 2  ;;  %v433_v22 = vpop.permute.xlu0 %432  ;;  %v1930_v18 = vld [vmem:[%s9102_s0 + $0x200] sm:$0xff] }
 0x248   :  { %6553 = vmatmul.mubr.msk.f32.vlgmr.msra.gmra.mxu0 %vm120_vm5, %v354_v19 }
 0x249   :  { %6576 = vmatprep.mubr.msk.f32.mxu0 %vm7356_vm2, %v7355_v0 }
 0x24a   :  { %v435_v21 = vpop.permute.xlu1 %434 }
 0x24b   :  { %6556 = vmatpush3.xpose.msk.msra.mxu1 %vm436_vm8, %v435_v21 }
 0x24c   :  { %6557 = vmatprep.subr.mxu1 %v7355_v0 }
 0x24e   :  { %v431_v61 = vpop.permute.xlu1 %430 }
 0x24f   :  { %6558 = vmatpush3.xpose.msk.msra.mxu1 %vm436_vm8, %v433_v22 }
 0x250   :  { %6559 = vmatprep.subr.mxu1 %v7355_v0 }
 0x253   :  { %6560 = vmatpush3.xpose.msk.msra.mxu1 %vm436_vm8, %v431_v61 }
 0x254   :  { %6600 = vmatprep.subr.mxu1 %v7355_v0 }
 0x256   :  { %6562 = vmatmul.mubr.msk.f32.vlgmr.msra.gmra.mxu1 %vm436_vm8, %v7564_v52 }
 0x257   :  { %6564 = vmatprep.mubr.msk.f32.mxu1 %vm7356_vm2, %v7355_v0 }
 0x25a   :  { %6565 = vmatmul.mubr.msk.f32.gmra.mxu1 %vm436_vm8, %v7558_v47 }
 0x25b   :  { %6567 = vmatprep.mubr.msk.f32.mxu1 %vm7356_vm2, %v7355_v0 }
 0x25e   :  { %6568 = vmatmul.mubr.msk.f32.gmra.mxu1 %vm436_vm8, %v7562_v50 }
 0x25f   :  { %6606 = vmatprep.mubr.msk.f32.mxu1 %vm7356_vm2, %v7355_v0 }
 0x308   :  { %v7601_v24 = vpop.f32.mrf.mxu0 }
 0x309   :  { %7161 = vpush %v7601_v24 }
 0x30a   :  { %v6554_v25 = vpop.f32.mrf.mxu0 }
 0x316   :  { %v515_v26 = vpop.f32.mrf.mxu1 }
 0x317   :  { %v529_v36 = vmul.f32 0.35355338, %v515_v26 }
 0x318   :  { %v6563_v27 = vpop.f32.mrf.mxu1 }
 0x319   :  { %v532_v40 = vadd.f32 %v529_v36, %v7613_v38 }
 0x31a   :  { %v520_v31 = vpop.f32.mrf.mxu1 }
 0x31b   :  { %v530_v37 = vmul.f32 0.35355338, %v520_v31 }
 0x31c   :  { %v6566_v32 = vpop.f32.mrf.mxu1 }
 0x31d   :  { %v533_v42 = vadd.f32 %v530_v37, %v7618_v39 }
 0x31e   :  { %v525_v1 = vpop.f32.mrf.mxu1 }
 0x31f   :  { %v531_v43 = vmul.f32 0.35355338, %v525_v1 }
 0x320   :  { %v6569_v4 = vpop.f32.mrf.mxu1 }
 0x321   :  { %v534_v51 = vadd.f32 %v531_v43, %v7625_v44 }
 0x33a   :  { %s7162_s1 = spop %7161 }
 0x33b   :  { %v537_v33 = vstv %s7162_s1 }
 0x33c   :  { %v539_v3 = vmul.f32 %v537_v33, %v7515_v28  ;;  %v540_v34 = vmul.f32 %v537_v33, %v7518_v29  ;;  %v541_v35 = vmul.f32 %v537_v33, %v7521_v30 }
 0x33e   :  { %547 = vrot.lane.b32.xlu0 %v540_v34, %s7357_s16  ;;  %545 = vrot.lane.b32.xlu1 %v539_v3, %s7357_s16 }
 0x342   :  { %549 = vrot.lane.b32.xlu1 %v541_v35, %s7357_s16 }
 0x3b0   :  { %v548_v45 = vpop.permute.xlu0 %547  ;;  %v546_v46 = vpop.permute.xlu1 %545 }
 0x3b1   :  { %v555_v48 = vadd.f32 %v548_v45, %v533_v42  ;;  %v554_v49 = vadd.f32 %v546_v46, %v532_v40 }
 0x3b3   :  { %v557_v53 = vsel %vm181_vm3, %v554_v49, -inf  ;;  %v560_v54 = vsel %vm181_vm3, %v555_v48, -inf }
 0x3b4   :  { %v550_v55 = vpop.permute.xlu1 %549  ;;  %558 = vmax.xlane.f32.xlu0 %v557_v53  ;;  %561 = vmax.xlane.f32.xlu1 %v560_v54 }
 0x3b5   :  { %v556_v56 = vadd.f32 %v550_v55, %v534_v51 }
 0x3b7   :  { %v563_v57 = vsel %vm188_vm4, %v556_v56, -inf }
 0x3b8   :  { %564 = vmax.xlane.f32.xlu0 %v563_v57 }
 0x3c5   :  { %594 = vrot.lane.b32.xlu1 %v7562_v50, %s7359_s27 }
 0x3c9   :  { %590 = vrot.lane.b32.xlu1 %v7564_v52, %s7359_s27 }
 0x3cd   :  { %699 = vrot.lane.b32.xlu1 %v7562_v50, %s7360_s28 }
 0x3ce   :  { %592 = vrot.lane.b32.xlu0 %v7558_v47, %s7359_s27 }
 0x43d   :  { %v559_v63 = vpop.xlane.xlu0 %558  ;;  %v562_v2 = vpop.xlane.xlu1 %561 }
 0x43e   :  { %v566_v5 = vsub.f32 %v554_v49, %v559_v63  ;;  %v567_v6 = vsub.f32 %v555_v48, %v562_v2 }
 0x440   :  { %v569_v7 = vmul.f32 1.442695, %v566_v5  ;;  %v571_v8 = vmul.f32 1.442695, %v567_v6 }
 0x441   :  { %v595_v9 = vpop.permute.xlu1 %594  ;;  %v565_v10 = vpop.xlane.xlu0 %564 }
 0x442   :  { %7205 = vpow2.f32 %v569_v7  ;;  %v568_v11 = vsub.f32 %v556_v56, %v565_v10  ;;  %6571 = vmatpush3.msk.msra.mxu0 %vm193_vm7, %v595_v9 }
 0x443   :  { %7207 = vpow2.f32 %v571_v8  ;;  %6572 = vmatprep.subr.mxu0 %v7355_v0 }
 0x444   :  { %v573_v12 = vmul.f32 1.442695, %v568_v11 }
 0x445   :  { %v593_v13 = vpop.permute.xlu0 %592  ;;  %v591_v14 = vpop.permute.xlu1 %590 }
 0x446   :  { %7209 = vpow2.f32 %v573_v12  ;;  %6573 = vmatpush3.msra.mxu0 %v593_v13 }
 0x447   :  { %6574 = vmatprep.subr.mxu0 %v7355_v0 }
 0x448   :  { %6575 = vmatpush3.msra.mxu0 %v591_v14 }
 0x449   :  { %6585 = vmatprep.subr.mxu0 %v7355_v0  ;;  %v700_v26 = vpop.permute.xlu1 %699 }
 0x44f   :  { %v7206_v15 = vpop.eup %7205 }
 0x450   :  { %v7208_v16 = vpop.eup %7207  ;;  %v575_v21 = vsel %vm181_vm3, %v7206_v15, 0.0 }
 0x451   :  { %v578_v22 = vsel %vm181_vm3, %v7208_v16, 0.0  ;;  %576 = vadd.xlane.f32.xlu0 %v575_v21 }
 0x452   :  { %579 = vadd.xlane.f32.xlu1 %v578_v22 }
 0x453   :  { %v7210_v61 = vpop.eup %7209 }
 0x454   :  { %v581_v25 = vsel %vm188_vm4, %v7210_v61, 0.0 }
 0x455   :  { %582 = vadd.xlane.f32.xlu0 %v581_v25 }
 0x463   :  { %695 = vrot.lane.b32.xlu1 %v7564_v52, %s7360_s28 }
 0x467   :  { %964 = vrot.lane.b32.xlu1 %v7562_v50, %s7361_s29 }
 0x46b   :  { %962 = vrot.lane.b32.xlu1 %v7558_v47, %s7361_s29  ;;  %697 = vrot.lane.b32.xlu0 %v7558_v47, %s7360_s28 }
 0x46f   :  { %960 = vrot.lane.b32.xlu1 %v7564_v52, %s7361_s29  ;;  %689 = vrot.lane.b32.xlu0 %v7564_v52, %s7362_s30 }
 0x473   :  { %1229 = vrot.lane.b32.xlu1 %v7562_v50, %s7363_s4  ;;  %691 = vrot.lane.b32.xlu0 %v7558_v47, %s7362_s30 }
 0x477   :  { %1227 = vrot.lane.b32.xlu1 %v7558_v47, %s7363_s4  ;;  %693 = vrot.lane.b32.xlu0 %v7562_v50, %s7362_s30 }
 0x47b   :  { %1225 = vrot.lane.b32.xlu1 %v7564_v52, %s7363_s4  ;;  %954 = vrot.lane.b32.xlu0 %v7564_v52, %s7364_s5 }
 0x47f   :  { %1221 = vrot.lane.b32.xlu1 %v7558_v47, %s7365_s6  ;;  %956 = vrot.lane.b32.xlu0 %v7558_v47, %s7364_s5 }
 0x483   :  { %799 = vrot.lane.b32.xlu1 %v7601_v24, %s7366_s7  ;;  %958 = vrot.lane.b32.xlu0 %v7562_v50, %s7364_s5 }
 0x487   :  { %1329 = vrot.lane.b32.xlu1 %v7601_v24, %s7367_s8  ;;  %1219 = vrot.lane.b32.xlu0 %v7564_v52, %s7365_s6 }
 0x48b   :  { %1223 = vrot.lane.b32.xlu0 %v7562_v50, %s7365_s6 }
 0x48f   :  { %1064 = vrot.lane.b32.xlu0 %v7601_v24, %s7368_s9 }
 0x4da   :  { %v577_v27 = vpop.xlane.xlu0 %576 }
 0x4db   :  { %v580_v31 = vpop.xlane.xlu1 %579  ;;  %7211 = vrcp.f32 %v577_v27 }
 0x4dc   :  { %7213 = vrcp.f32 %v580_v31 }
 0x4de   :  { %v583_v32 = vpop.xlane.xlu0 %582 }
 0x4df   :  { %v696_v1 = vpop.permute.xlu1 %695  ;;  %7215 = vrcp.f32 %v583_v32 }
 0x4e2   :  { %v698_v4 = vpop.permute.xlu0 %697 }
 0x4e3   :  { %v965_v33 = vpop.permute.xlu1 %964 }
 0x4e6   :  { %v690_v3 = vpop.permute.xlu0 %689 }
 0x4e7   :  { %v963_v34 = vpop.permute.xlu1 %962 }
 0x4e8   :  { %v7212_v35 = vpop.eup %7211 }
 0x4e9   :  { %v587_v36 = vmul.f32 %v7212_v35, %v7206_v15  ;;  %v7214_v37 = vpop.eup %7213 }
 0x4ea   :  { %v692_v40 = vpop.permute.xlu0 %691  ;;  %v588_v24 = vmul.f32 %v7214_v37, %v7208_v16 }
 0x4eb   :  { %v961_v42 = vpop.permute.xlu1 %960  ;;  %6577 = vmatmul.mubr.msk.f32.vlgmr.msra.gmra.mxu0 %vm181_vm3, %v587_v36 }
 0x4ec   :  { %6586 = vmatpush3.xpose.msk.msra.mxu0 %vm436_vm8, %v700_v26  ;;  %6579 = vmatprep.mubr.msk.f32.mxu0 %vm7356_vm2, %v7355_v0  ;;  %v7216_v43 = vpop.eup %7215 }
 0x4ed   :  { %6587 = vmatprep.subr.mxu0 %v7355_v0  ;;  %v589_v48 = vmul.f32 %v7216_v43, %v7210_v61 }
 0x4ee   :  { %v694_v45 = vpop.permute.xlu0 %693 }
 0x4ef   :  { %v1230_v46 = vpop.permute.xlu1 %1229  ;;  %6580 = vmatmul.mubr.msk.f32.gmra.mxu0 %vm181_vm3, %v588_v24 }
 0x4f0   :  { %6588 = vmatpush3.xpose.msk.msra.mxu0 %vm436_vm8, %v698_v4  ;;  %6582 = vmatprep.mubr.msk.f32.mxu0 %vm7356_vm2, %v7355_v0 }
 0x4f1   :  { %6589 = vmatprep.subr.mxu0 %v7355_v0 }
 0x4f2   :  { %v955_v49 = vpop.permute.xlu0 %954 }
 0x4f3   :  { %v1228_v51 = vpop.permute.xlu1 %1227  ;;  %6583 = vmatmul.mubr.msk.f32.gmra.mxu0 %vm181_vm3, %v589_v48 }
 0x4f4   :  { %6590 = vmatpush3.xpose.msk.msra.mxu0 %vm436_vm8, %v696_v1  ;;  %6591 = vmatprep.mubr.msk.f32.mxu0 %vm7356_vm2, %v7355_v0 }
 0x4f5   :  { %6615 = vmatprep.subr.mxu0 %v7355_v0 }
 0x4f6   :  { %v957_v53 = vpop.permute.xlu0 %956 }
 0x4f7   :  { %v1226_v54 = vpop.permute.xlu1 %1225  ;;  %6592 = vmatmul.mubr.msk.f32.vlgmr.msra.gmra.mxu0 %vm436_vm8, %v690_v3 }
 0x4f8   :  { %6616 = vmatpush3.xpose.msk.msra.mxu0 %vm436_vm8, %v965_v33  ;;  %6594 = vmatprep.mubr.msk.f32.mxu0 %vm7356_vm2, %v7355_v0 }
 0x4f9   :  { %6617 = vmatprep.subr.mxu0 %v7355_v0 }
 0x4fa   :  { %v959_v55 = vpop.permute.xlu0 %958 }
 0x4fb   :  { %v1222_v56 = vpop.permute.xlu1 %1221  ;;  %6595 = vmatmul.mubr.msk.f32.gmra.mxu0 %vm436_vm8, %v692_v40 }
 0x4fc   :  { %6618 = vmatpush3.xpose.msk.msra.mxu0 %vm436_vm8, %v963_v34  ;;  %6597 = vmatprep.mubr.msk.f32.mxu0 %vm7356_vm2, %v7355_v0 }
 0x4fd   :  { %6619 = vmatprep.subr.mxu0 %v7355_v0 }
 0x4fe   :  { %v1220_v57 = vpop.permute.xlu0 %1219 }
 0x4ff   :  { %v800_v63 = vpop.permute.xlu1 %799  ;;  %6598 = vmatmul.mubr.msk.f32.gmra.mxu0 %vm436_vm8, %v694_v45 }
 0x500   :  { %7163 = vpush %v800_v63  ;;  %6620 = vmatpush3.xpose.msk.msra.mxu0 %vm436_vm8, %v961_v42  ;;  %6621 = vmatprep.mubr.msk.f32.mxu0 %vm7356_vm2, %v7355_v0 }
 0x501   :  { %6645 = vmatprep.subr.mxu0 %v7355_v0 }
 0x502   :  { %v1224_v2 = vpop.permute.xlu0 %1223 }
 0x503   :  { %6622 = vmatmul.mubr.msk.f32.vlgmr.msra.gmra.mxu0 %vm436_vm8, %v955_v49  ;;  %v1330_v6 = vpop.permute.xlu1 %1329 }
 0x504   :  { %6646 = vmatpush3.xpose.msk.msra.mxu0 %vm436_vm8, %v1230_v46  ;;  %6624 = vmatprep.mubr.msk.f32.mxu0 %vm7356_vm2, %v7355_v0 }
 0x505   :  { %6647 = vmatprep.subr.mxu0 %v7355_v0 }
 0x506   :  { %v1065_v5 = vpop.permute.xlu0 %1064 }
 0x507   :  { %6625 = vmatmul.mubr.msk.f32.gmra.mxu0 %vm436_vm8, %v957_v53  ;;  %7165 = vpush %v1065_v5 }
 0x508   :  { %6648 = vmatpush3.xpose.msk.msra.mxu0 %vm436_vm8, %v1228_v51  ;;  %7167 = vpush %v1330_v6  ;;  %6627 = vmatprep.mubr.msk.f32.mxu0 %vm7356_vm2, %v7355_v0 }
 0x509   :  { %6649 = vmatprep.subr.mxu0 %v7355_v0 }
 0x50b   :  { %6628 = vmatmul.mubr.msk.f32.gmra.mxu0 %vm436_vm8, %v959_v55 }
 0x50c   :  { %6650 = vmatpush3.xpose.msk.msra.mxu0 %vm436_vm8, %v1226_v54  ;;  %6651 = vmatprep.mubr.msk.f32.mxu0 %vm7356_vm2, %v7355_v0 }
 0x50d   :  { %6675 = vmatprep.subr.mxu0 %v7355_v0 }
 0x50f   :  { %6652 = vmatmul.mubr.msk.f32.vlgmr.msra.gmra.mxu0 %vm436_vm8, %v1220_v57 }
 0x510   :  { %6654 = vmatprep.mubr.msk.f32.mxu0 %vm7356_vm2, %v7355_v0 }
 0x513   :  { %6655 = vmatmul.mubr.msk.f32.gmra.mxu0 %vm436_vm8, %v1222_v56 }
 0x514   :  { %6657 = vmatprep.mubr.msk.f32.mxu0 %vm7356_vm2, %v7355_v0 }
 0x517   :  { %6658 = vmatmul.mubr.msk.f32.gmra.mxu0 %vm436_vm8, %v1224_v2 }
 0x518   :  { %6683 = vmatprep.mubr.msk.f32.mxu0 %vm7356_vm2, %v7355_v0 }
 0x531   :  { %s7164_s10 = spop %7163 }
 0x532   :  { %v802_v7 = vstv %s7164_s10  ;;  %s7374_s10 = smov 24  }
 0x533   :  { %v804_v8 = vmul.f32 %v802_v7, %v7515_v28  ;;  %v805_v9 = vmul.f32 %v802_v7, %v7518_v29  ;;  %v806_v10 = vmul.f32 %v802_v7, %v7521_v30 }
 0x535   :  { %812 = vrot.lane.b32.xlu1 %v805_v9, %s7357_s16  ;;  %810 = vrot.lane.b32.xlu0 %v804_v8, %s7357_s16 }
 0x538   :  { %s7166_s11 = spop %7165 }
 0x539   :  { %814 = vrot.lane.b32.xlu0 %v806_v10, %s7357_s16  ;;  %v1067_v11 = vstv %s7166_s11  ;;  %s7168_s12 = spop %7167 }
 0x53a   :  { %v1069_v12 = vmul.f32 %v1067_v11, %v7515_v28  ;;  %v1070_v13 = vmul.f32 %v1067_v11, %v7518_v29  ;;  %v1332_v14 = vstv %s7168_s12  ;;  %v1071_v15 = vmul.f32 %v1067_v11, %v7521_v30  ;;  %s7375_s12 = smov 124  }
 0x53b   :  { %v1334_v16 = vmul.f32 %v1332_v14, %v7515_v28  ;;  %v1335_v21 = vmul.f32 %v1332_v14, %v7518_v29  ;;  %v1336_v22 = vmul.f32 %v1332_v14, %v7521_v30 }
 0x53c   :  { %1075 = vrot.lane.b32.xlu1 %v1069_v12, %s7357_s16 }
 0x53d   :  { %1077 = vrot.lane.b32.xlu0 %v1070_v13, %s7357_s16 }
 0x540   :  { %1079 = vrot.lane.b32.xlu1 %v1071_v15, %s7357_s16 }
 0x541   :  { %1340 = vrot.lane.b32.xlu0 %v1334_v16, %s7357_s16 }
 0x544   :  { %1342 = vrot.lane.b32.xlu1 %v1335_v21, %s7357_s16 }
 0x545   :  { %1344 = vrot.lane.b32.xlu0 %v1336_v22, %s7357_s16 }
 0x5a7   :  { %v811_v34 = vpop.permute.xlu0 %810  ;;  %v813_v43 = vpop.permute.xlu1 %812 }
 0x5ab   :  { %v7758_v61 = vpop.f32.mrf.mxu0  ;;  %v815_v54 = vpop.permute.xlu0 %814 }
 0x5ad   :  { %v6578_v25 = vpop.f32.mrf.mxu0 }
 0x5ae   :  { %v1076_v6 = vpop.permute.xlu1 %1075 }
 0x5af   :  { %v7760_v26 = vpop.f32.mrf.mxu0  ;;  %v1078_v13 = vpop.permute.xlu0 %1077 }
 0x5b1   :  { %v6581_v27 = vpop.f32.mrf.mxu0 }
 0x5b2   :  { %v1080_v27 = vpop.permute.xlu1 %1079 }
 0x5b3   :  { %v7762_v31 = vpop.f32.mrf.mxu0 }
 0x5b5   :  { %v6584_v32 = vpop.f32.mrf.mxu0 }
 0x5b7   :  { %v779_v1 = vpop.f32.mrf.mxu0 }
 0x5b8   :  { %v793_v4 = vmul.f32 0.35355338, %v779_v1 }
 0x5b9   :  { %v6593_v33 = vpop.f32.mrf.mxu0 }
 0x5ba   :  { %v796_v3 = vadd.f32 %v793_v4, %v7613_v38 }
 0x5bb   :  { %v784_v35 = vpop.f32.mrf.mxu0 }
 0x5bc   :  { %v794_v36 = vmul.f32 0.35355338, %v784_v35  ;;  %v7765_v37 = vadd.f32 %v811_v34, %v796_v3  ;;  %v1341_v35 = vpop.permute.xlu0 %1340 }
 0x5bd   :  { %v6596_v40 = vpop.f32.mrf.mxu0 }
 0x5be   :  { %v797_v42 = vadd.f32 %v794_v36, %v7618_v39  ;;  %v822_v24 = vsel %vm181_vm3, %v7765_v37, -inf }
 0x5bf   :  { %v789_v45 = vpop.f32.mrf.mxu0  ;;  %823 = vmax.xlane.f32.xlu1 %v822_v24 }
 0x5c0   :  { %v795_v46 = vmul.f32 0.35355338, %v789_v45  ;;  %v7770_v48 = vadd.f32 %v813_v43, %v797_v42 }
 0x5c1   :  { %v6599_v49 = vpop.f32.mrf.mxu0 }
 0x5c2   :  { %v798_v51 = vadd.f32 %v795_v46, %v7625_v44  ;;  %v825_v53 = vsel %vm181_vm3, %v7770_v48, -inf  ;;  %v1343_v46 = vpop.permute.xlu1 %1342 }
 0x5c3   :  { %v1044_v55 = vpop.f32.mrf.mxu0  ;;  %826 = vmax.xlane.f32.xlu0 %v825_v53 }
 0x5c4   :  { %v1058_v56 = vmul.f32 0.35355338, %v1044_v55  ;;  %v7775_v57 = vadd.f32 %v815_v54, %v798_v51 }
 0x5c5   :  { %v6623_v63 = vpop.f32.mrf.mxu0 }
 0x5c6   :  { %v1061_v2 = vadd.f32 %v1058_v56, %v7613_v38  ;;  %v828_v5 = vsel %vm188_vm4, %v7775_v57, -inf  ;;  %v1345_v56 = vpop.permute.xlu0 %1344 }
 0x5c7   :  { %v1049_v7 = vpop.f32.mrf.mxu0  ;;  %829 = vmax.xlane.f32.xlu0 %v828_v5 }
 0x5c8   :  { %v1059_v8 = vmul.f32 0.35355338, %v1049_v7  ;;  %v1084_v9 = vadd.f32 %v1076_v6, %v1061_v2 }
 0x5c9   :  { %v6626_v10 = vpop.f32.mrf.mxu0 }
 0x5ca   :  { %v1062_v11 = vadd.f32 %v1059_v8, %v7618_v39  ;;  %v1087_v12 = vsel %vm181_vm3, %v1084_v9, -inf }
 0x5cb   :  { %v1054_v14 = vpop.f32.mrf.mxu0  ;;  %1088 = vmax.xlane.f32.xlu1 %v1087_v12 }
 0x5cc   :  { %v1060_v15 = vmul.f32 0.35355338, %v1054_v14  ;;  %v7782_v16 = vadd.f32 %v1078_v13, %v1062_v11 }
 0x5cd   :  { %v6629_v21 = vpop.f32.mrf.mxu0 }
 0x5ce   :  { %v1063_v22 = vadd.f32 %v1060_v15, %v7625_v44  ;;  %v1090_v25 = vsel %vm181_vm3, %v7782_v16, -inf }
 0x5cf   :  { %v1309_v32 = vpop.f32.mrf.mxu0  ;;  %1091 = vmax.xlane.f32.xlu0 %v1090_v25 }
 0x5d0   :  { %v1323_v1 = vmul.f32 0.35355338, %v1309_v32  ;;  %v1086_v4 = vadd.f32 %v1080_v27, %v1063_v22 }
 0x5d1   :  { %v6653_v33 = vpop.f32.mrf.mxu0 }
 0x5d2   :  { %v1326_v3 = vadd.f32 %v1323_v1, %v7613_v38  ;;  %v1093_v34 = vsel %vm188_vm4, %v1086_v4, -inf }
 0x5d3   :  { %v1314_v36 = vpop.f32.mrf.mxu0  ;;  %1094 = vmax.xlane.f32.xlu1 %v1093_v34 }
 0x5d4   :  { %v1324_v40 = vmul.f32 0.35355338, %v1314_v36  ;;  %v1349_v42 = vadd.f32 %v1341_v35, %v1326_v3 }
 0x5d5   :  { %v6656_v24 = vpop.f32.mrf.mxu0 }
 0x5d6   :  { %v1327_v43 = vadd.f32 %v1324_v40, %v7618_v39  ;;  %v1352_v45 = vsel %vm181_vm3, %v1349_v42, -inf }
 0x5d7   :  { %v1319_v49 = vpop.f32.mrf.mxu0  ;;  %1353 = vmax.xlane.f32.xlu0 %v1352_v45 }
 0x5d8   :  { %v1325_v51 = vmul.f32 0.35355338, %v1319_v49  ;;  %v7791_v53 = vadd.f32 %v1343_v46, %v1327_v43 }
 0x5d9   :  { %v6659_v54 = vpop.f32.mrf.mxu0 }
 0x5da   :  { %v1328_v38 = vadd.f32 %v1325_v51, %v7625_v44  ;;  %v1355_v55 = vsel %vm181_vm3, %v7791_v53, -inf }
 0x5db   :  { %1356 = vmax.xlane.f32.xlu1 %v1355_v55 }
 0x5dc   :  { %v1351_v63 = vadd.f32 %v1345_v56, %v1328_v38 }
 0x5de   :  { %v1358_v2 = vsel %vm188_vm4, %v1351_v63, -inf }
 0x5df   :  { %1359 = vmax.xlane.f32.xlu0 %v1358_v2 }
 0x5ec   :  { %859 = vrot.lane.b32.xlu1 %v7562_v50, %s7369_s13 }
 0x5f0   :  { %855 = vrot.lane.b32.xlu1 %v7564_v52, %s7369_s13 }
 0x5f4   :  { %1124 = vrot.lane.b32.xlu1 %v7562_v50, %s7370_s14 }
 0x5f5   :  { %857 = vrot.lane.b32.xlu0 %v7558_v47, %s7369_s13 }
 0x5f8   :  { %1120 = vrot.lane.b32.xlu1 %v7564_v52, %s7370_s14 }
 0x5f9   :  { %1122 = vrot.lane.b32.xlu0 %v7558_v47, %s7370_s14 }
 0x648   :  { %v824_v39 = vpop.xlane.xlu1 %823 }
 0x649   :  { %v831_v44 = vsub.f32 %v7765_v37, %v824_v39 }
 0x64b   :  { %v834_v5 = vmul.f32 1.442695, %v831_v44 }
 0x64c   :  { %v827_v6 = vpop.xlane.xlu0 %826 }
 0x64d   :  { %7217 = vpow2.f32 %v834_v5  ;;  %v832_v7 = vsub.f32 %v7770_v48, %v827_v6 }
 0x64f   :  { %v836_v8 = vmul.f32 1.442695, %v832_v7 }
 0x650   :  { %v830_v13 = vpop.xlane.xlu0 %829 }
 0x651   :  { %7219 = vpow2.f32 %v836_v8 }
 0x654   :  { %v1089_v10 = vpop.xlane.xlu1 %1088 }
 0x655   :  { %v1096_v11 = vsub.f32 %v1084_v9, %v1089_v10 }
 0x657   :  { %v1099_v12 = vmul.f32 1.442695, %v1096_v11 }
 0x658   :  { %v1092_v21 = vpop.xlane.xlu0 %1091 }
 0x659   :  { %7221 = vpow2.f32 %v1099_v12  ;;  %v1097_v55 = vsub.f32 %v7782_v16, %v1092_v21 }
 0x65a   :  { %v7811_v14 = vpop.eup %7217 }
 0x65b   :  { %v840_v15 = vsel %vm181_vm3, %v7811_v14, 0.0  ;;  %v1101_v56 = vmul.f32 1.442695, %v1097_v55 }
 0x65c   :  { %841 = vadd.xlane.f32.xlu1 %v840_v15  ;;  %v1095_v37 = vpop.xlane.xlu1 %1094 }
 0x65d   :  { %v1098_v22 = vsub.f32 %v1086_v4, %v1095_v37 }
 0x65e   :  { %v7815_v25 = vpop.eup %7219 }
 0x65f   :  { %v1103_v27 = vmul.f32 1.442695, %v1098_v22  ;;  %v843_v48 = vsel %vm181_vm3, %v7815_v25, 0.0 }
 0x660   :  { %844 = vadd.xlane.f32.xlu0 %v843_v48  ;;  %v1354_v9 = vpop.xlane.xlu0 %1353 }
 0x661   :  { %7223 = vpow2.f32 %v1103_v27  ;;  %v1361_v32 = vsub.f32 %v1349_v42, %v1354_v9 }
 0x663   :  { %v1364_v1 = vmul.f32 1.442695, %v1361_v32 }
 0x664   :  { %v1357_v33 = vpop.xlane.xlu1 %1356 }
 0x665   :  { %7225 = vpow2.f32 %v1364_v1 }
 0x666   :  { %v7819_v3 = vpop.eup %7221 }
 0x667   :  { %v1105_v34 = vsel %vm181_vm3, %v7819_v3, 0.0 }
 0x668   :  { %v860_v35 = vpop.permute.xlu1 %859  ;;  %1106 = vadd.xlane.f32.xlu0 %v1105_v34  ;;  %v1360_v4 = vpop.xlane.xlu0 %1359 }
 0x669   :  { %v1363_v36 = vsub.f32 %v1351_v63, %v1360_v4  ;;  %6601 = vmatpush3.msk.msra.mxu1 %vm193_vm7, %v860_v35  ;;  %v1362_v63 = vsub.f32 %v7791_v53, %v1357_v33 }
 0x66a   :  { %6602 = vmatprep.subr.mxu1 %v7355_v0 }
 0x66b   :  { %v1368_v40 = vmul.f32 1.442695, %v1363_v36  ;;  %v1366_v2 = vmul.f32 1.442695, %v1362_v63  ;;  %v1532_v63 = vld [vmem:[%s9102_s0 + $0x180] sm:$0xff] }
 0x66c   :  { %v858_v24 = vpop.permute.xlu0 %857  ;;  %v856_v43 = vpop.permute.xlu1 %855 }
 0x66d   :  { %7227 = vpow2.f32 %v1368_v40  ;;  %1389 = vrot.lane.b32.xlu1 %v7562_v50, %s7371_s15  ;;  %6603 = vmatpush3.msra.mxu1 %v858_v24  ;;  %v833_v50 = vsub.f32 %v7775_v57, %v830_v13 }
 0x66e   :  { %v7827_v42 = vpop.eup %7223  ;;  %6604 = vmatprep.subr.mxu1 %v7355_v0 }
 0x66f   :  { %6605 = vmatpush3.msra.mxu1 %v856_v43  ;;  %v1111_v45 = vsel %vm188_vm4, %v7827_v42, 0.0  ;;  %v838_v38 = vmul.f32 1.442695, %v833_v50 }
 0x670   :  { %1112 = vadd.xlane.f32.xlu0 %v1111_v45  ;;  %6630 = vmatprep.subr.mxu1 %v7355_v0  ;;  %v1125_v53 = vpop.permute.xlu1 %1124  ;;  %v1123_v8 = vpop.permute.xlu0 %1122 }
 0x671   :  { %7229 = vpow2.f32 %v838_v38 }
 0x672   :  { %v7833_v46 = vpop.eup %7225  ;;  %7231 = vpow2.f32 %v1101_v56  ;;  %v1534_v56 = vld [vmem:[%s9102_s0 + $0x190] sm:$0xff] }
 0x673   :  { %v1370_v49 = vsel %vm181_vm3, %v7833_v46, 0.0  ;;  %7233 = vpow2.f32 %v1366_v2  ;;  %6676 = vmatpush3.msra.mxu0 %v1534_v56 }
 0x674   :  { %1371 = vadd.xlane.f32.xlu0 %v1370_v49  ;;  %v1121_v7 = vpop.permute.xlu1 %1120  ;;  %6677 = vmatprep.subr.mxu0 %v7355_v0 }
 0x67a   :  { %v7838_v51 = vpop.eup %7227 }
 0x67b   :  { %v1376_v54 = vsel %vm188_vm4, %v7838_v51, 0.0 }
 0x67c   :  { %1377 = vadd.xlane.f32.xlu0 %v1376_v54 }
 0x67e   :  { %v7230_v39 = vpop.eup %7229 }
 0x67f   :  { %v846_v44 = vsel %vm188_vm4, %v7230_v39, 0.0  ;;  %v7232_v57 = vpop.eup %7231 }
 0x680   :  { %v1108_v5 = vsel %vm181_vm3, %v7232_v57, 0.0  ;;  %v7848_v6 = vpop.eup %7233 }
 0x681   :  { %v1373_v16 = vsel %vm181_vm3, %v7848_v6, 0.0 }
 0x691   :  { %847 = vadd.xlane.f32.xlu1 %v846_v44 }
 0x692   :  { %1387 = vrot.lane.b32.xlu0 %v7558_v47, %s7371_s15 }
 0x695   :  { %1109 = vadd.xlane.f32.xlu1 %v1108_v5 }
 0x699   :  { %1374 = vadd.xlane.f32.xlu1 %v1373_v16 }
 0x6aa   :  { %1385 = vrot.lane.b32.xlu1 %v7564_v52, %s7371_s15 }
 0x6e5   :  { %v842_v10 = vpop.xlane.xlu1 %841 }
 0x6e6   :  { %7235 = vrcp.f32 %v842_v10 }
 0x6e9   :  { %v845_v11 = vpop.xlane.xlu0 %844 }
 0x6ea   :  { %7237 = vrcp.f32 %v845_v11 }
 0x6f1   :  { %v1107_v15 = vpop.xlane.xlu0 %1106 }
 0x6f3   :  { %v7236_v47 = vpop.eup %7235 }
 0x6f4   :  { %v852_v12 = vmul.f32 %v7236_v47, %v7811_v14  ;;  %v1390_v14 = vpop.permute.xlu1 %1389 }
 0x6f6   :  { %6607 = vmatmul.mubr.msk.f32.vlgmr.msra.gmra.mxu1 %vm181_vm3, %v852_v12 }
 0x6f7   :  { %v7238_v13 = vpop.eup %7237  ;;  %6631 = vmatpush3.msk.msra.mxu1 %vm193_vm7, %v1125_v53  ;;  %6609 = vmatprep.mubr.msk.f32.mxu1 %vm7356_vm2, %v7355_v0 }
 0x6f8   :  { %6632 = vmatprep.subr.mxu1 %v7355_v0  ;;  %v853_v52 = vmul.f32 %v7238_v13, %v7815_v25 }
 0x6f9   :  { %6633 = vmatpush3.msra.mxu1 %v1123_v8  ;;  %v1113_v22 = vpop.xlane.xlu0 %1112 }
 0x6fa   :  { %6634 = vmatprep.subr.mxu1 %v7355_v0  ;;  %6610 = vmatmul.mubr.msk.f32.gmra.mxu1 %vm181_vm3, %v853_v52 }
 0x6fb   :  { %6635 = vmatpush3.msra.mxu1 %v1121_v7  ;;  %6612 = vmatprep.mubr.msk.f32.mxu1 %vm7356_vm2, %v7355_v0 }
 0x6fc   :  { %6660 = vmatprep.subr.mxu1 %v7355_v0 }
 0x6fd   :  { %v1372_v25 = vpop.xlane.xlu0 %1371 }
 0x705   :  { %v1378_v1 = vpop.xlane.xlu0 %1377 }
 0x709   :  { %v1388_v35 = vpop.permute.xlu0 %1387 }
 0x71a   :  { %v848_v21 = vpop.xlane.xlu1 %847 }
 0x71b   :  { %7239 = vrcp.f32 %v848_v21 }
 0x71c   :  { %7241 = vrcp.f32 %v1107_v15 }
 0x71e   :  { %v1110_v37 = vpop.xlane.xlu1 %1109 }
 0x71f   :  { %7243 = vrcp.f32 %v1110_v37 }
 0x720   :  { %7245 = vrcp.f32 %v1113_v22 }
 0x721   :  { %7247 = vrcp.f32 %v1372_v25 }
 0x722   :  { %v1375_v32 = vpop.xlane.xlu1 %1374 }
 0x723   :  { %7249 = vrcp.f32 %v1375_v32 }
 0x724   :  { %7251 = vrcp.f32 %v1378_v1 }
 0x726   :  { %v1386_v40 = vpop.permute.xlu1 %1385 }
 0x728   :  { %v7240_v27 = vpop.eup %7239 }
 0x729   :  { %v854_v48 = vmul.f32 %v7240_v27, %v7230_v39  ;;  %v7242_v9 = vpop.eup %7241 }
 0x72a   :  { %v1117_v33 = vmul.f32 %v7242_v9, %v7819_v3 }
 0x72b   :  { %6613 = vmatmul.mubr.msk.f32.gmra.mxu1 %vm181_vm3, %v854_v48 }
 0x72c   :  { %6636 = vmatprep.mubr.msk.f32.mxu1 %vm7356_vm2, %v7355_v0  ;;  %v7244_v34 = vpop.eup %7243 }
 0x72d   :  { %v1118_v4 = vmul.f32 %v7244_v34, %v7232_v57  ;;  %v7246_v36 = vpop.eup %7245  ;;  %v1531_v57 = vld [vmem:[%s9102_s0 + $0x178] sm:$0xff] }
 0x72e   :  { %v1119_v3 = vmul.f32 %v7246_v36, %v7827_v42  ;;  %v7248_v24 = vpop.eup %7247  ;;  %v1683_v36 = vld [vmem:[%s9102_s0 + $0x1d0] sm:$0xff] }
 0x72f   :  { %6637 = vmatmul.mubr.msk.f32.vlgmr.msra.gmra.mxu1 %vm181_vm3, %v1117_v33  ;;  %v1382_v43 = vmul.f32 %v7248_v24, %v7833_v46  ;;  %v1783_v24 = vld [vmem:[%s9102_s0 + $0x1f0] sm:$0xff] }
 0x730   :  { %6661 = vmatpush3.msk.msra.mxu1 %vm193_vm7, %v1390_v14  ;;  %6639 = vmatprep.mubr.msk.f32.mxu1 %vm7356_vm2, %v7355_v0  ;;  %v7250_v45 = vpop.eup %7249 }
 0x731   :  { %6662 = vmatprep.subr.mxu1 %v7355_v0  ;;  %v1383_v49 = vmul.f32 %v7250_v45, %v7848_v6  ;;  %v7252_v50 = vpop.eup %7251  ;;  %v7967_v45 = vsub.s32 7, %v7478_v59 }
 0x732   :  { %6663 = vmatpush3.msra.mxu1 %v1388_v35  ;;  %v1384_v42 = vmul.f32 %v7252_v50, %v7838_v51  ;;  %v1533_v51 = vld [vmem:[%s9102_s0 + $0x188] sm:$0xff] }
 0x733   :  { %6664 = vmatprep.subr.mxu1 %v7355_v0  ;;  %6640 = vmatmul.mubr.msk.f32.gmra.mxu1 %vm181_vm3, %v1118_v4 }
 0x734   :  { %6665 = vmatpush3.msra.mxu1 %v1386_v40  ;;  %6642 = vmatprep.mubr.msk.f32.mxu1 %vm7356_vm2, %v7355_v0  ;;  %v1681_v40 = vld [vmem:[%s9102_s0 + $0x1c0] sm:$0xff] }
 0x735   :  { %6692 = vmatprep.subr.mxu1 %v7355_v0  ;;  %6678 = vmatpush3.msra.mxu0 %v1533_v51 }
 0x736   :  { %6679 = vmatprep.subr.mxu0 %v7355_v0 }
 0x737   :  { %6643 = vmatmul.mubr.msk.f32.gmra.mxu1 %vm181_vm3, %v1119_v3  ;;  %6680 = vmatpush3.msra.mxu0 %v1532_v63  ;;  %v1680_v3 = vld [vmem:[%s9102_s0 + $0x1b8] sm:$0xff] }
 0x738   :  { %6666 = vmatprep.mubr.msk.f32.mxu1 %vm7356_vm2, %v7355_v0  ;;  %6681 = vmatprep.subr.mxu0 %v7355_v0 }
 0x739   :  { %6682 = vmatpush3.msra.mxu0 %v1531_v57 }
 0x73a   :  { %6709 = vmatprep.subr.mxu0 %v7355_v0 }
 0x73b   :  { %6667 = vmatmul.mubr.msk.f32.vlgmr.msra.gmra.mxu1 %vm181_vm3, %v1382_v43  ;;  %v1782_v43 = vld [vmem:[%s9102_s0 + $0x1e8] sm:$0xff] }
 0x73c   :  { %6669 = vmatprep.mubr.msk.f32.mxu1 %vm7356_vm2, %v7355_v0  ;;  %6693 = vmatpush3.msra.mxu1 %v1683_v36  ;;  %v7988_v36 = vld [vmem:[%s9102_s0 + $0x2a8] sm:$0xff] }
 0x73d   :  { %6694 = vmatprep.subr.mxu1 %v7355_v0 }
 0x73f   :  { %6670 = vmatmul.mubr.msk.f32.gmra.mxu1 %vm181_vm3, %v1383_v49  ;;  %v7349_v49 = vld [vmem:[%s9102_s0 + $0x2a0] sm:$0xff] }
 0x740   :  { %6672 = vmatprep.mubr.msk.f32.mxu1 %vm7356_vm2, %v7355_v0  ;;  %v1538_v50 = vrot.slane %v7349_v49, %v7967_v45 }
 0x743   :  { %6673 = vmatmul.mubr.msk.f32.gmra.mxu1 %vm181_vm3, %v1384_v42 }
 0x744   :  { %6700 = vmatprep.mubr.msk.f32.mxu1 %vm7356_vm2, %v7355_v0 }
 0x7b6   :  { %v940_v46 = vpop.f32.mrf.mxu1 }
 0x7b7   :  { %1487 = vrot.lane.b32.xlu0 %v940_v46, %s7372_s17 }
 0x7b8   :  { %v6608_v54 = vpop.f32.mrf.mxu1 }
 0x7ba   :  { %v945_v38 = vpop.f32.mrf.mxu1 }
 0x7bb   :  { %1489 = vrot.lane.b32.xlu1 %v945_v38, %s7372_s17 }
 0x7bc   :  { %v6611_v55 = vpop.f32.mrf.mxu1 }
 0x7eb   :  { %v950_v2 = vpop.f32.mrf.mxu1 }
 0x7ed   :  { %v6614_v39 = vpop.f32.mrf.mxu1 }
 0x7ef   :  { %v1205_v44 = vpop.f32.mrf.mxu1 }
 0x7f0   :  { %1499 = vrot.lane.b32.xlu1 %v1205_v44, %s7373_s26 }
 0x7f1   :  { %v6638_v5 = vpop.f32.mrf.mxu1 }
 0x7f3   :  { %v1210_v6 = vpop.f32.mrf.mxu1 }
 0x7f4   :  { %1501 = vrot.lane.b32.xlu0 %v1210_v6, %s7373_s26 }
 0x7f5   :  { %v6641_v16 = vpop.f32.mrf.mxu1 }
 0x7f7   :  { %v1215_v53 = vpop.f32.mrf.mxu1 }
 0x7f9   :  { %v6644_v7 = vpop.f32.mrf.mxu1 }
 0x7fb   :  { %v1470_v8 = vpop.f32.mrf.mxu1 }
 0x7fc   :  { %1511 = vrot.lane.b32.xlu0 %v1470_v8, %s7374_s10 }
 0x7fd   :  { %v6668_v10 = vpop.f32.mrf.mxu1 }
 0x7ff   :  { %v1475_v11 = vpop.f32.mrf.mxu1 }
 0x800   :  { %1491 = vrot.lane.b32.xlu0 %v950_v2, %s7372_s17  ;;  %1513 = vrot.lane.b32.xlu1 %v1475_v11, %s7374_s10 }
 0x801   :  { %v6671_v47 = vpop.f32.mrf.mxu1 }
 0x803   :  { %v1480_v12 = vpop.f32.mrf.mxu1 }
 0x804   :  { %1503 = vrot.lane.b32.xlu1 %v1215_v53, %s7373_s26  ;;  %1515 = vrot.lane.b32.xlu0 %v1480_v12, %s7374_s10 }
 0x805   :  { %v6674_v13 = vpop.f32.mrf.mxu1 }
 0x829   :  { %v1488_v52 = vpop.permute.xlu0 %1487 }
 0x82a   :  { %v1520_v37 = vsel %vm436_vm8, %v7758_v61, %v1488_v52 }
 0x82d   :  { %v1490_v14 = vpop.permute.xlu1 %1489 }
 0x82e   :  { %v1521_v48 = vsel %vm436_vm8, %v7760_v26, %v1490_v14 }
 0x862   :  { %v1500_v21 = vpop.permute.xlu1 %1499 }
 0x863   :  { %v1524_v22 = vsel %vm1523_vm9, %v1520_v37, %v1500_v21 }
 0x866   :  { %v1502_v15 = vpop.permute.xlu0 %1501 }
 0x867   :  { %v1525_v9 = vsel %vm1523_vm9, %v1521_v48, %v1502_v15 }
 0x86e   :  { %v1512_v25 = vpop.permute.xlu0 %1511 }
 0x86f   :  { %v1528_v27 = vsel %vm1527_vm10, %v1524_v22, %v1512_v25 }
 0x870   :  { %6684 = vmatmul.mubr.msk.f32.vlgmr.msra.gmra.mxu0 %vm120_vm5, %v1528_v27 }
 0x871   :  { %6686 = vmatprep.mubr.msk.f32.mxu0 %vm7356_vm2, %v7355_v0  ;;  %6710 = vmatpush3.msra.mxu0 %v1783_v24 }
 0x872   :  { %v1492_v32 = vpop.permute.xlu0 %1491  ;;  %v1514_v1 = vpop.permute.xlu1 %1513  ;;  %6711 = vmatprep.subr.mxu0 %v7355_v0 }
 0x873   :  { %v1529_v33 = vsel %vm1527_vm10, %v1525_v9, %v1514_v1  ;;  %v1522_v61 = vsel %vm436_vm8, %v7762_v31, %v1492_v32  ;;  %v1682_v31 = vld [vmem:[%s9102_s0 + $0x1c8] sm:$0xff]  ;;  %6712 = vmatpush3.msra.mxu0 %v1782_v43 }
 0x874   :  { %6687 = vmatmul.mubr.msk.f32.gmra.mxu0 %vm120_vm5, %v1529_v33  ;;  %6695 = vmatpush3.msra.mxu1 %v1682_v31  ;;  %v7991_v31 = vsub.s32 4, %v7478_v59 }
 0x875   :  { %6689 = vmatprep.mubr.msk.f32.mxu0 %vm7356_vm2, %v7355_v0  ;;  %6696 = vmatprep.subr.mxu1 %v7355_v0 }
 0x876   :  { %v1504_v34 = vpop.permute.xlu1 %1503  ;;  %v1516_v35 = vpop.permute.xlu0 %1515  ;;  %6697 = vmatpush3.msra.mxu1 %v1681_v40  ;;  %6713 = vmatprep.subr.mxu0 %v7355_v0  ;;  %v1676_v43 = vrot.slane %v7988_v36, %v7991_v31 }
 0x877   :  { %v1526_v26 = vsel %vm1523_vm9, %v1522_v61, %v1504_v34  ;;  %6698 = vmatprep.subr.mxu1 %v7355_v0 }
 0x878   :  { %v1530_v4 = vsel %vm1527_vm10, %v1526_v26, %v1516_v35  ;;  %6699 = vmatpush3.msra.mxu1 %v1680_v3 }
 0x879   :  { %6690 = vmatmul.mubr.msk.f32.gmra.mxu0 %vm120_vm5, %v1530_v4  ;;  %6726 = vmatprep.subr.mxu1 %v7355_v0  ;;  %v7983_v4 = vsub.s32 3, %v7478_v59 }
 0x87a   :  { %6717 = vmatprep.mubr.msk.f32.mxu0 %vm7356_vm2, %v7355_v0 }
 0x87b   :  { %v1669_v40 = vrot.slane %v7988_v36, %v7983_v4 }
 0x930   :  { %v1614_v42 = vpop.f32.mrf.mxu0 }
 0x931   :  { %v1615_v54 = vadd.f32 %v1614_v42, %v1538_v50 }
 0x932   :  { %v6685_v46 = vpop.f32.mrf.mxu0 }
 0x933   :  { %v1628_v63 = vadd.f32 %v1615_v54, %v7496_v17 }
 0x934   :  { %v1619_v38 = vpop.f32.mrf.mxu0 }
 0x935   :  { %v1620_v55 = vadd.f32 %v1619_v38, %v1538_v50  ;;  %v1631_v5 = vsel %vm120_vm5, %v1628_v63, 0.0 }
 0x936   :  { %v6688_v56 = vpop.f32.mrf.mxu0 }
 0x937   :  { %v1629_v51 = vadd.f32 %v1620_v55, %v7500_v20 }
 0x939   :  { %v1624_v2 = vpop.f32.mrf.mxu0  ;;  %v1632_v39 = vsel %vm120_vm5, %v1629_v51, 0.0 }
 0x93a   :  { %v1625_v44 = vadd.f32 %v1624_v2, %v1538_v50  ;;  %v1633_v16 = vadd.f32 %v1632_v39, %v1631_v5  ;;  %v1687_v2 = vrot.slane %v7988_v36, %v7489_v62 }
 0x93b   :  { %v6691_v57 = vpop.f32.mrf.mxu0 }
 0x93c   :  { %v1630_v6 = vadd.f32 %v1625_v44, %v7506_v23 }
 0x93e   :  { %v1634_v53 = vsel %vm124_vm6, %v1630_v6, 0.0 }
 0x93f   :  { %v1635_v7 = vadd.f32 %v1634_v53, %v1633_v16 }
 0x941   :  { %v1636_v8 = vrot.slane %v1635_v7, 4 }
 0x943   :  { %v1637_v10 = vadd.f32 %v1636_v8, %v1635_v7  ;;  %v2028_v7 = vld [vmem:[%s9102_s0 + $0x248] sm:$0xff] }
 0x945   :  { %v1638_v11 = vrot.slane %v1637_v10, 2 }
 0x947   :  { %v1639_v47 = vadd.f32 %v1638_v11, %v1637_v10  ;;  %v2027_v11 = vld [vmem:[%s9102_s0 + $0x240] sm:$0xff] }
 0x949   :  { %v1640_v20 = vrot.slane %v1639_v47, 1 }
 0x94b   :  { %v1641_v12 = vadd.f32 %v1640_v20, %v1639_v47 }
 0x94d   :  { %v1642_v17 = vmul.f32 0.055555556, %v1641_v12  ;;  %v2026_v12 = vld [vmem:[%s9102_s0 + $0x238] sm:$0xff] }
 0x94f   :  { %v1643_v13 = vsub.f32 %v1628_v63, %v1642_v17  ;;  %v1644_v52 = vsub.f32 %v1629_v51, %v1642_v17  ;;  %v1645_v14 = vsub.f32 %v1630_v6, %v1642_v17  ;;  %v1781_v51 = vld [vmem:[%s9102_s0 + $0x1e0] sm:$0xff]  ;;  %v1780_v63 = vld [vmem:[%s9102_s0 + $0x1d8] sm:$0xff]  ;;  %v2029_v6 = vld [vmem:[%s9102_s0 + $0x250] sm:$0xff] }
 0x950   :  { %6714 = vmatpush3.msra.mxu0 %v1781_v51 }
 0x951   :  { %v1646_v15 = vmul.f32 %v1643_v13, %v1643_v13  ;;  %v1647_v21 = vmul.f32 %v1644_v52, %v1644_v52  ;;  %v1648_v37 = vmul.f32 %v1645_v14, %v1645_v14  ;;  %6715 = vmatprep.subr.mxu0 %v7355_v0 }
 0x952   :  { %6716 = vmatpush3.msra.mxu0 %v1780_v63 }
 0x953   :  { %v1649_v22 = vsel %vm120_vm5, %v1646_v15, 0.0  ;;  %v1650_v23 = vsel %vm120_vm5, %v1647_v21, 0.0  ;;  %v1652_v27 = vsel %vm124_vm6, %v1648_v37, 0.0  ;;  %6743 = vmatprep.subr.mxu0 %v7355_v0  ;;  %v8072_v15 = vsub.s32 2, %v7478_v59 }
 0x954   :  { %v1651_v25 = vadd.f32 %v1650_v23, %v1649_v22 }
 0x955   :  { %v1787_v21 = vrot.slane %v7988_v36, %v8072_v15 }
 0x956   :  { %v1653_v48 = vadd.f32 %v1652_v27, %v1651_v25 }
 0x958   :  { %v1654_v9 = vrot.slane %v1653_v48, 4 }
 0x95a   :  { %v1655_v32 = vadd.f32 %v1654_v9, %v1653_v48 }
 0x95c   :  { %v1656_v1 = vrot.slane %v1655_v32, 2 }
 0x95e   :  { %v1657_v33 = vadd.f32 %v1656_v1, %v1655_v32 }
 0x960   :  { %v1658_v61 = vrot.slane %v1657_v33, 1 }
 0x962   :  { %v1659_v34 = vadd.f32 %v1658_v61, %v1657_v33 }
 0x964   :  { %v1660_v35 = vmul.f32 0.055555556, %v1659_v34 }
 0x966   :  { %v1661_v26 = vadd.f32 1e-05, %v1660_v35 }
 0x968   :  { %7253 = vrsqrt.f32 %v1661_v26 }
 0x975   :  { %v7254_v3 = vpop.eup %7253 }
 0x976   :  { %v1663_v24 = vmul.f32 %v7254_v3, %v1643_v13  ;;  %v1664_v49 = vmul.f32 %v7254_v3, %v1644_v52  ;;  %v1665_v42 = vmul.f32 %v7254_v3, %v1645_v14  ;;  %v1932_v52 = vld [vmem:[%s9102_s0 + $0x210] sm:$0xff]  ;;  %v1931_v14 = vld [vmem:[%s9102_s0 + $0x208] sm:$0xff] }
 0x978   :  { %v1670_v50 = vmul.f32 %v1669_v40, %v1663_v24  ;;  %v1671_v54 = vmul.f32 %v1669_v40, %v1664_v49  ;;  %v1672_v38 = vmul.f32 %v1669_v40, %v1665_v42 }
 0x97a   :  { %v7997_v46 = vadd.f32 %v1676_v43, %v1670_v50  ;;  %v8003_v55 = vadd.f32 %v1676_v43, %v1671_v54  ;;  %v8009_v56 = vadd.f32 %v1676_v43, %v1672_v38 }
 0x97c   :  { %6701 = vmatmul.mubr.msk.f32.vlgmr.msra.gmra.mxu1 %vm120_vm5, %v7997_v46 }
 0x97d   :  { %6703 = vmatprep.mubr.msk.f32.mxu1 %vm7356_vm2, %v7355_v0  ;;  %6727 = vmatpush3.msra.mxu1 %v1932_v52  ;;  %v8089_v52 = vsub.s32 5, %v7478_v59 }
 0x97e   :  { %6728 = vmatprep.subr.mxu1 %v7355_v0 }
 0x97f   :  { %6729 = vmatpush3.msra.mxu1 %v1931_v14  ;;  %v1918_v14 = vrot.slane %v7988_v36, %v8089_v52 }
 0x980   :  { %6704 = vmatmul.mubr.msk.f32.gmra.mxu1 %vm120_vm5, %v8003_v55  ;;  %6730 = vmatprep.subr.mxu1 %v7355_v0 }
 0x981   :  { %6706 = vmatprep.mubr.msk.f32.mxu1 %vm7356_vm2, %v7355_v0  ;;  %6731 = vmatpush3.msra.mxu1 %v1930_v18 }
 0x982   :  { %6732 = vmatprep.subr.mxu1 %v7355_v0 }
 0x984   :  { %6707 = vmatmul.mubr.msk.f32.gmra.mxu1 %vm120_vm5, %v8009_v56 }
 0x985   :  { %6734 = vmatprep.mubr.msk.f32.mxu1 %vm7356_vm2, %v7355_v0 }
 0xa3c   :  { %v1763_v39 = vpop.f32.mrf.mxu1 }
 0xa3d   :  { %v1764_v44 = vadd.f32 %v1763_v39, %v1687_v2 }
 0xa3e   :  { %v6702_v57 = vpop.f32.mrf.mxu1 }
 0xa3f   :  { %v1777_v5 = vmax.f32 %v1764_v44, 0.0 }
 0xa40   :  { %v1768_v16 = vpop.f32.mrf.mxu1 }
 0xa41   :  { %v1769_v53 = vadd.f32 %v1768_v16, %v1687_v2  ;;  %6718 = vmatmul.mubr.msk.f32.vlgmr.msra.gmra.mxu0 %vm120_vm5, %v1777_v5 }
 0xa42   :  { %v6705_v8 = vpop.f32.mrf.mxu1  ;;  %6720 = vmatprep.mubr.msk.f32.mxu0 %vm7356_vm2, %v7355_v0  ;;  %6744 = vmatpush3.msra.mxu0 %v2029_v6 }
 0xa43   :  { %v1778_v10 = vmax.f32 %v1769_v53, 0.0  ;;  %6745 = vmatprep.subr.mxu0 %v7355_v0 }
 0xa44   :  { %v1773_v47 = vpop.f32.mrf.mxu1  ;;  %6746 = vmatpush3.msra.mxu0 %v2028_v7 }
 0xa45   :  { %v1774_v20 = vadd.f32 %v1773_v47, %v1687_v2  ;;  %6721 = vmatmul.mubr.msk.f32.gmra.mxu0 %vm120_vm5, %v1778_v10  ;;  %6747 = vmatprep.subr.mxu0 %v7355_v0 }
 0xa46   :  { %v6708_v17 = vpop.f32.mrf.mxu1  ;;  %6723 = vmatprep.mubr.msk.f32.mxu0 %vm7356_vm2, %v7355_v0  ;;  %6748 = vmatpush3.msra.mxu0 %v2027_v11 }
 0xa47   :  { %v1779_v13 = vmax.f32 %v1774_v20, 0.0  ;;  %6749 = vmatprep.subr.mxu0 %v7355_v0 }
 0xa48   :  { %6750 = vmatpush3.msra.mxu0 %v2026_v12 }
 0xa49   :  { %6724 = vmatmul.mubr.msk.f32.gmra.mxu0 %vm120_vm5, %v1779_v13  ;;  %6769 = vmatprep.subr.mxu0 %v7355_v0 }
 0xa4a   :  { %6751 = vmatprep.mubr.msk.f32.mxu0 %vm7356_vm2, %v7355_v0 }
 0xa4d   :  { %6752 = vmatmul.mubr.msk.f32.vlgmr.msra.gmra.mxu0 %vm120_vm5, %v354_v19  ;;  %v1929_v19 = vld [vmem:[%s9102_s0 + $0x1f8] sm:$0xff] }
 0xa4e   :  { %6775 = vmatprep.mubr.msk.f32.mxu0 %vm7356_vm2, %v7355_v0  ;;  %6733 = vmatpush3.msra.mxu1 %v1929_v19  ;;  %v1925_v19 = vrot.slane %v7988_v36, %v7552_v41 }
 0xa4f   :  { %6754 = vmatprep.subr.mxu1 %v7355_v0 }
 0xb01   :  { %v1863_v37 = vpop.f32.mrf.mxu0 }
 0xb02   :  { %v1864_v23 = vadd.f32 %v1863_v37, %v1787_v21 }
 0xb03   :  { %v6719_v22 = vpop.f32.mrf.mxu0 }
 0xb04   :  { %v1877_v9 = vadd.f32 %v1864_v23, %v7997_v46 }
 0xb05   :  { %v1868_v25 = vpop.f32.mrf.mxu0 }
 0xb06   :  { %v1869_v27 = vadd.f32 %v1868_v25, %v1787_v21  ;;  %v1880_v35 = vsel %vm120_vm5, %v1877_v9, 0.0 }
 0xb07   :  { %v6722_v48 = vpop.f32.mrf.mxu0 }
 0xb08   :  { %v1878_v32 = vadd.f32 %v1869_v27, %v8003_v55 }
 0xb09   :  { %v1873_v1 = vpop.f32.mrf.mxu0 }
 0xb0a   :  { %v1881_v33 = vsel %vm120_vm5, %v1878_v32, 0.0  ;;  %v1874_v61 = vadd.f32 %v1873_v1, %v1787_v21 }
 0xb0b   :  { %v6725_v34 = vpop.f32.mrf.mxu0  ;;  %v1882_v40 = vadd.f32 %v1881_v33, %v1880_v35  ;;  %v1936_v33 = vrot.slane %v7988_v36, %v7967_v45 }
 0xb0c   :  { %v1879_v26 = vadd.f32 %v1874_v61, %v8009_v56 }
 0xb0d   :  { %v8081_v3 = vpop.f32.mrf.mxu0 }
 0xb0e   :  { %v1883_v24 = vsel %vm124_vm6, %v1879_v26, 0.0  ;;  %7169 = vpush %v8081_v3 }
 0xb0f   :  { %v1884_v43 = vadd.f32 %v1883_v24, %v1882_v40  ;;  %v6753_v49 = vpop.f32.mrf.mxu0 }
 0xb11   :  { %v1885_v50 = vrot.slane %v1884_v43, 4 }
 0xb13   :  { %v1886_v42 = vadd.f32 %v1885_v50, %v1884_v43 }
 0xb15   :  { %v1887_v46 = vrot.slane %v1886_v42, 2 }
 0xb17   :  { %v1888_v54 = vadd.f32 %v1887_v46, %v1886_v42 }
 0xb19   :  { %v1889_v38 = vrot.slane %v1888_v54, 1 }
 0xb1b   :  { %v1890_v55 = vadd.f32 %v1889_v38, %v1888_v54 }
 0xb1d   :  { %v1891_v51 = vmul.f32 0.055555556, %v1890_v55 }
 0xb1f   :  { %v1892_v63 = vsub.f32 %v1877_v9, %v1891_v51  ;;  %v1893_v2 = vsub.f32 %v1878_v32, %v1891_v51  ;;  %v1894_v39 = vsub.f32 %v1879_v26, %v1891_v51 }
 0xb21   :  { %v1895_v56 = vmul.f32 %v1892_v63, %v1892_v63  ;;  %v1896_v44 = vmul.f32 %v1893_v2, %v1893_v2  ;;  %v1897_v57 = vmul.f32 %v1894_v39, %v1894_v39 }
 0xb23   :  { %v1898_v5 = vsel %vm120_vm5, %v1895_v56, 0.0  ;;  %v1899_v6 = vsel %vm120_vm5, %v1896_v44, 0.0  ;;  %v1901_v53 = vsel %vm124_vm6, %v1897_v57, 0.0 }
 0xb24   :  { %v1900_v16 = vadd.f32 %v1899_v6, %v1898_v5 }
 0xb26   :  { %v1902_v7 = vadd.f32 %v1901_v53, %v1900_v16 }
 0xb28   :  { %v1903_v8 = vrot.slane %v1902_v7, 4 }
 0xb2a   :  { %v1904_v10 = vadd.f32 %v1903_v8, %v1902_v7 }
 0xb2c   :  { %v1905_v11 = vrot.slane %v1904_v10, 2 }
 0xb2e   :  { %v1906_v47 = vadd.f32 %v1905_v11, %v1904_v10 }
 0xb30   :  { %v1907_v20 = vrot.slane %v1906_v47, 1 }
 0xb32   :  { %v1908_v12 = vadd.f32 %v1907_v20, %v1906_v47 }
 0xb34   :  { %v1909_v17 = vmul.f32 0.055555556, %v1908_v12 }
 0xb36   :  { %v1910_v13 = vadd.f32 1e-05, %v1909_v17 }
 0xb38   :  { %7255 = vrsqrt.f32 %v1910_v13 }
 0xb3f   :  { %s7170_s22 = spop %7169 }
 0xb40   :  { %v2209_v36 = vstv %s7170_s22 }
 0xb41   :  { %v2212_v49 = vmul.f32 %v2209_v36, %v7518_v29  ;;  %v2211_v50 = vmul.f32 %v2209_v36, %v7515_v28  ;;  %v2213_v42 = vmul.f32 %v2209_v36, %v7521_v30 }
 0xb45   :  { %v7256_v18 = vpop.eup %7255 }
 0xb46   :  { %v1912_v21 = vmul.f32 %v7256_v18, %v1892_v63  ;;  %v1913_v37 = vmul.f32 %v7256_v18, %v1893_v2  ;;  %v1914_v23 = vmul.f32 %v7256_v18, %v1894_v39 }
 0xb48   :  { %v1919_v22 = vmul.f32 %v1918_v14, %v1912_v21  ;;  %v1920_v27 = vmul.f32 %v1918_v14, %v1913_v37  ;;  %v1921_v59 = vmul.f32 %v1918_v14, %v1914_v23 }
 0xb4a   :  { %v8095_v25 = vadd.f32 %v1925_v19, %v1919_v22  ;;  %v8101_v48 = vadd.f32 %v1925_v19, %v1920_v27  ;;  %v8107_v9 = vadd.f32 %v1925_v19, %v1921_v59 }
 0xb4c   :  { %6735 = vmatmul.mubr.msk.f32.vlgmr.msra.gmra.mxu1 %vm120_vm5, %v8095_v25 }
 0xb4d   :  { %6737 = vmatprep.mubr.msk.f32.mxu1 %vm7356_vm2, %v7355_v0 }
 0xb50   :  { %6738 = vmatmul.mubr.msk.f32.gmra.mxu1 %vm120_vm5, %v8101_v48 }
 0xb51   :  { %6740 = vmatprep.mubr.msk.f32.mxu1 %vm7356_vm2, %v7355_v0 }
 0xb54   :  { %6741 = vmatmul.mubr.msk.f32.gmra.mxu1 %vm120_vm5, %v8107_v9 }
 0xb55   :  { %6760 = vmatprep.mubr.msk.f32.mxu1 %vm7356_vm2, %v7355_v0 }
 0xc0c   :  { %v2012_v32 = vpop.f32.mrf.mxu1 }
 0xc0d   :  { %v8125_v43 = vadd.f32 %v2012_v32, %v1936_v33 }
 0xc0e   :  { %v6736_v1 = vpop.f32.mrf.mxu1 }
 0xc10   :  { %v2017_v61 = vpop.f32.mrf.mxu1 }
 0xc11   :  { %v8115_v34 = vadd.f32 %v2017_v61, %v1936_v33 }
 0xc12   :  { %v6739_v35 = vpop.f32.mrf.mxu1 }
 0xc13   :  { %2105 = vrot.lane.b32.xlu0 %v8115_v34, %s7358_s20 }
 0xc14   :  { %v2022_v26 = vpop.f32.mrf.mxu1 }
 0xc15   :  { %v8119_v40 = vadd.f32 %v2022_v26, %v1936_v33 }
 0xc16   :  { %v6742_v24 = vpop.f32.mrf.mxu1 }
 0xc17   :  { %2371 = vrot.lane.b32.xlu0 %v8119_v40, %s7360_s28  ;;  %2107 = vrot.lane.b32.xlu1 %v8119_v40, %s7358_s20  ;;  %v8271_v24 = vld [vmem:[%s9102_s0 + $0x118] sm:$0xff] }
 0xc1b   :  { %2367 = vrot.lane.b32.xlu0 %v8125_v43, %s7360_s28  ;;  %2103 = vrot.lane.b32.xlu1 %v8125_v43, %s7358_s20 }
 0xc1f   :  { %2636 = vrot.lane.b32.xlu0 %v8119_v40, %s7361_s29  ;;  %2369 = vrot.lane.b32.xlu1 %v8115_v34, %s7360_s28 }
 0xc23   :  { %2634 = vrot.lane.b32.xlu0 %v8115_v34, %s7361_s29  ;;  %2361 = vrot.lane.b32.xlu1 %v8125_v43, %s7362_s30 }
 0xc27   :  { %2632 = vrot.lane.b32.xlu0 %v8125_v43, %s7361_s29  ;;  %2363 = vrot.lane.b32.xlu1 %v8115_v34, %s7362_s30 }
 0xc2b   :  { %2901 = vrot.lane.b32.xlu0 %v8119_v40, %s7363_s4  ;;  %2365 = vrot.lane.b32.xlu1 %v8119_v40, %s7362_s30 }
 0xc2f   :  { %2899 = vrot.lane.b32.xlu0 %v8115_v34, %s7363_s4  ;;  %2626 = vrot.lane.b32.xlu1 %v8125_v43, %s7364_s5 }
 0xc33   :  { %2897 = vrot.lane.b32.xlu0 %v8125_v43, %s7363_s4  ;;  %2628 = vrot.lane.b32.xlu1 %v8115_v34, %s7364_s5 }
 0xc37   :  { %2893 = vrot.lane.b32.xlu0 %v8115_v34, %s7365_s6  ;;  %2630 = vrot.lane.b32.xlu1 %v8119_v40, %s7364_s5 }
 0xc3b   :  { %2471 = vrot.lane.b32.xlu0 %v8081_v3, %s7366_s7  ;;  %2891 = vrot.lane.b32.xlu1 %v8125_v43, %s7365_s6 }
 0xc3f   :  { %3001 = vrot.lane.b32.xlu0 %v8081_v3, %s7367_s8  ;;  %2895 = vrot.lane.b32.xlu1 %v8119_v40, %s7365_s6 }
 0xc43   :  { %2219 = vrot.lane.b32.xlu0 %v2212_v49, %s7357_s16  ;;  %2736 = vrot.lane.b32.xlu1 %v8081_v3, %s7368_s9 }
 0xc47   :  { %2217 = vrot.lane.b32.xlu1 %v2211_v50, %s7357_s16 }
 0xc4b   :  { %2221 = vrot.lane.b32.xlu1 %v2213_v42, %s7357_s16 }
 0xc85   :  { %v2106_v46 = vpop.permute.xlu0 %2105 }
 0xc89   :  { %v2372_v54 = vpop.permute.xlu0 %2371  ;;  %v2108_v38 = vpop.permute.xlu1 %2107 }
 0xc8a   :  { %6755 = vmatpush3.xpose.msk.msra.mxu1 %vm436_vm8, %v2108_v38 }
 0xc8b   :  { %6756 = vmatprep.subr.mxu1 %v7355_v0 }
 0xc8d   :  { %v2368_v55 = vpop.permute.xlu0 %2367  ;;  %v2104_v51 = vpop.permute.xlu1 %2103 }
 0xc8e   :  { %6757 = vmatpush3.xpose.msk.msra.mxu1 %vm436_vm8, %v2106_v46 }
 0xc8f   :  { %6758 = vmatprep.subr.mxu1 %v7355_v0 }
 0xc91   :  { %v2637_v3 = vpop.permute.xlu0 %2636  ;;  %v2370_v63 = vpop.permute.xlu1 %2369 }
 0xc92   :  { %6759 = vmatpush3.xpose.msk.msra.mxu1 %vm436_vm8, %v2104_v51 }
 0xc93   :  { %6784 = vmatprep.subr.mxu1 %v7355_v0 }
 0xc95   :  { %v2635_v2 = vpop.permute.xlu0 %2634  ;;  %6761 = vmatmul.mubr.msk.f32.vlgmr.msra.gmra.mxu1 %vm436_vm8, %v8125_v43  ;;  %v2362_v39 = vpop.permute.xlu1 %2361 }
 0xc96   :  { %6785 = vmatpush3.xpose.msk.msra.mxu1 %vm436_vm8, %v2372_v54  ;;  %6763 = vmatprep.mubr.msk.f32.mxu1 %vm7356_vm2, %v7355_v0 }
 0xc97   :  { %6786 = vmatprep.subr.mxu1 %v7355_v0 }
 0xc99   :  { %v2633_v56 = vpop.permute.xlu0 %2632  ;;  %6764 = vmatmul.mubr.msk.f32.gmra.mxu1 %vm436_vm8, %v8115_v34  ;;  %v2364_v44 = vpop.permute.xlu1 %2363 }
 0xc9a   :  { %6787 = vmatpush3.xpose.msk.msra.mxu1 %vm436_vm8, %v2370_v63  ;;  %6766 = vmatprep.mubr.msk.f32.mxu1 %vm7356_vm2, %v7355_v0 }
 0xc9b   :  { %6788 = vmatprep.subr.mxu1 %v7355_v0 }
 0xc9d   :  { %v2902_v57 = vpop.permute.xlu0 %2901  ;;  %6767 = vmatmul.mubr.msk.f32.gmra.mxu1 %vm436_vm8, %v8119_v40  ;;  %v2366_v5 = vpop.permute.xlu1 %2365 }
 0xc9e   :  { %6789 = vmatpush3.xpose.msk.msra.mxu1 %vm436_vm8, %v2368_v55  ;;  %6790 = vmatprep.mubr.msk.f32.mxu1 %vm7356_vm2, %v7355_v0  ;;  %v8279_v55 = vld [vmem:[%s9102_s0 + $0x120] sm:$0xff] }
 0xc9f   :  { %6814 = vmatprep.subr.mxu1 %v7355_v0 }
 0xca1   :  { %v2900_v6 = vpop.permute.xlu0 %2899  ;;  %6791 = vmatmul.mubr.msk.f32.vlgmr.msra.gmra.mxu1 %vm436_vm8, %v2362_v39  ;;  %v2627_v16 = vpop.permute.xlu1 %2626 }
 0xca2   :  { %6815 = vmatpush3.xpose.msk.msra.mxu1 %vm436_vm8, %v2637_v3  ;;  %6793 = vmatprep.mubr.msk.f32.mxu1 %vm7356_vm2, %v7355_v0 }
 0xca3   :  { %6816 = vmatprep.subr.mxu1 %v7355_v0 }
 0xca5   :  { %v2898_v53 = vpop.permute.xlu0 %2897  ;;  %6794 = vmatmul.mubr.msk.f32.gmra.mxu1 %vm436_vm8, %v2364_v44  ;;  %v2629_v7 = vpop.permute.xlu1 %2628 }
 0xca6   :  { %6817 = vmatpush3.xpose.msk.msra.mxu1 %vm436_vm8, %v2635_v2  ;;  %6796 = vmatprep.mubr.msk.f32.mxu1 %vm7356_vm2, %v7355_v0 }
 0xca7   :  { %6818 = vmatprep.subr.mxu1 %v7355_v0 }
 0xca9   :  { %v2894_v8 = vpop.permute.xlu0 %2893  ;;  %6797 = vmatmul.mubr.msk.f32.gmra.mxu1 %vm436_vm8, %v2366_v5  ;;  %v2631_v10 = vpop.permute.xlu1 %2630  ;;  %v8289_v5 = vld [vmem:[%s9102_s0 + $0x128] sm:$0x3] }
 0xcaa   :  { %6819 = vmatpush3.xpose.msk.msra.mxu1 %vm436_vm8, %v2633_v56  ;;  %6820 = vmatprep.mubr.msk.f32.mxu1 %vm7356_vm2, %v7355_v0 }
 0xcab   :  { %6844 = vmatprep.subr.mxu1 %v7355_v0 }
 0xcad   :  { %v2472_v11 = vpop.permute.xlu0 %2471  ;;  %6821 = vmatmul.mubr.msk.f32.vlgmr.msra.gmra.mxu1 %vm436_vm8, %v2627_v16  ;;  %v2892_v47 = vpop.permute.xlu1 %2891 }
 0xcae   :  { %7171 = vpush %v2472_v11  ;;  %6845 = vmatpush3.xpose.msk.msra.mxu1 %vm436_vm8, %v2902_v57  ;;  %6823 = vmatprep.mubr.msk.f32.mxu1 %vm7356_vm2, %v7355_v0 }
 0xcaf   :  { %6846 = vmatprep.subr.mxu1 %v7355_v0 }
 0xcb1   :  { %6824 = vmatmul.mubr.msk.f32.gmra.mxu1 %vm436_vm8, %v2629_v7  ;;  %v2896_v20 = vpop.permute.xlu1 %2895  ;;  %v3002_v17 = vpop.permute.xlu0 %3001 }
 0xcb2   :  { %6847 = vmatpush3.xpose.msk.msra.mxu1 %vm436_vm8, %v2900_v6  ;;  %6826 = vmatprep.mubr.msk.f32.mxu1 %vm7356_vm2, %v7355_v0 }
 0xcb3   :  { %6848 = vmatprep.subr.mxu1 %v7355_v0 }
 0xcb5   :  { %6827 = vmatmul.mubr.msk.f32.gmra.mxu1 %vm436_vm8, %v2631_v10  ;;  %v2737_v12 = vpop.permute.xlu1 %2736 }
 0xcb6   :  { %7173 = vpush %v2737_v12  ;;  %6849 = vmatpush3.xpose.msk.msra.mxu1 %vm436_vm8, %v2898_v53  ;;  %6850 = vmatprep.mubr.msk.f32.mxu1 %vm7356_vm2, %v7355_v0 }
 0xcb7   :  { %7175 = vpush %v3002_v17  ;;  %6874 = vmatprep.subr.mxu1 %v7355_v0 }
 0xcb9   :  { %6851 = vmatmul.mubr.msk.f32.vlgmr.msra.gmra.mxu1 %vm436_vm8, %v2892_v47 }
 0xcba   :  { %6853 = vmatprep.mubr.msk.f32.mxu1 %vm7356_vm2, %v7355_v0 }
 0xcbd   :  { %6854 = vmatmul.mubr.msk.f32.gmra.mxu1 %vm436_vm8, %v2894_v8 }
 0xcbe   :  { %6856 = vmatprep.mubr.msk.f32.mxu1 %vm7356_vm2, %v7355_v0 }
 0xcc1   :  { %6857 = vmatmul.mubr.msk.f32.gmra.mxu1 %vm436_vm8, %v2896_v20 }
 0xcc2   :  { %6882 = vmatprep.mubr.msk.f32.mxu1 %vm7356_vm2, %v7355_v0 }
 0xcdf   :  { %s7172_s7 = spop %7171 }
 0xce0   :  { %v2474_v13 = vstv %s7172_s7 }
 0xce1   :  { %v2476_v14 = vmul.f32 %v2474_v13, %v7515_v28  ;;  %v2477_v18 = vmul.f32 %v2474_v13, %v7518_v29  ;;  %v2478_v19 = vmul.f32 %v2474_v13, %v7521_v30 }
 0xce3   :  { %2482 = vrot.lane.b32.xlu0 %v2476_v14, %s7357_s16  ;;  %2484 = vrot.lane.b32.xlu1 %v2477_v18, %s7357_s16 }
 0xce7   :  { %2486 = vrot.lane.b32.xlu0 %v2478_v19, %s7357_s16  ;;  %s7174_s8 = spop %7173 }
 0xce8   :  { %v2739_v21 = vstv %s7174_s8  ;;  %s7176_s9 = spop %7175 }
 0xce9   :  { %v2741_v37 = vmul.f32 %v2739_v21, %v7515_v28  ;;  %v2742_v22 = vmul.f32 %v2739_v21, %v7518_v29  ;;  %v3004_v23 = vstv %s7176_s9  ;;  %v2743_v27 = vmul.f32 %v2739_v21, %v7521_v30 }
 0xcea   :  { %v3006_v59 = vmul.f32 %v3004_v23, %v7515_v28  ;;  %v3007_v32 = vmul.f32 %v3004_v23, %v7518_v29  ;;  %v3008_v1 = vmul.f32 %v3004_v23, %v7521_v30  ;;  %v2220_v28 = vpop.permute.xlu0 %2219  ;;  %v2218_v29 = vpop.permute.xlu1 %2217 }
 0xceb   :  { %2749 = vrot.lane.b32.xlu0 %v2742_v22, %s7357_s16  ;;  %2747 = vrot.lane.b32.xlu1 %v2741_v37, %s7357_s16 }
 0xcee   :  { %v2222_v26 = vpop.permute.xlu1 %2221 }
 0xcef   :  { %3012 = vrot.lane.b32.xlu0 %v3006_v59, %s7357_s16  ;;  %2751 = vrot.lane.b32.xlu1 %v2743_v27, %s7357_s16 }
 0xcf3   :  { %3016 = vrot.lane.b32.xlu0 %v3008_v1, %s7357_s16  ;;  %3014 = vrot.lane.b32.xlu1 %v3007_v32, %s7357_s16 }
 0xcf7   :  { %2262 = vrot.lane.b32.xlu0 %v8125_v43, %s7359_s27  ;;  %2264 = vrot.lane.b32.xlu1 %v8115_v34, %s7359_s27 }
 0xcfb   :  { %2527 = vrot.lane.b32.xlu0 %v8125_v43, %s7369_s13  ;;  %2529 = vrot.lane.b32.xlu1 %v8115_v34, %s7369_s13 }
 0xcff   :  { %2266 = vrot.lane.b32.xlu0 %v8119_v40, %s7359_s27 }
 0xd03   :  { %2531 = vrot.lane.b32.xlu0 %v8119_v40, %s7369_s13 }
 0xd55   :  { %v2483_v30 = vpop.permute.xlu0 %2482  ;;  %v2187_v33 = vpop.f32.mrf.mxu1 }
 0xd56   :  { %v2201_v61 = vmul.f32 0.35355338, %v2187_v33  ;;  %v2485_v38 = vpop.permute.xlu1 %2484 }
 0xd57   :  { %v6762_v35 = vpop.f32.mrf.mxu1 }
 0xd58   :  { %v2204_v36 = vadd.f32 %v8271_v24, %v2201_v61 }
 0xd59   :  { %v2487_v49 = vpop.permute.xlu0 %2486  ;;  %v2192_v50 = vpop.f32.mrf.mxu1 }
 0xd5a   :  { %v2202_v42 = vmul.f32 0.35355338, %v2192_v50  ;;  %v8274_v46 = vadd.f32 %v2218_v29, %v2204_v36 }
 0xd5b   :  { %v6765_v54 = vpop.f32.mrf.mxu1 }
 0xd5c   :  { %v2205_v51 = vadd.f32 %v8279_v55, %v2202_v42  ;;  %v2229_v63 = vsel %vm181_vm3, %v8274_v46, -inf }
 0xd5d   :  { %v2750_v3 = vpop.permute.xlu0 %2749  ;;  %2230 = vmax.xlane.f32.xlu1 %v2229_v63  ;;  %v2197_v2 = vpop.f32.mrf.mxu1 }
 0xd5e   :  { %v2203_v39 = vmul.f32 0.35355338, %v2197_v2  ;;  %v8284_v56 = vadd.f32 %v2220_v28, %v2205_v51  ;;  %v2748_v57 = vpop.permute.xlu1 %2747 }
 0xd5f   :  { %v6768_v44 = vpop.f32.mrf.mxu1 }
 0xd60   :  { %v2206_v6 = vadd.f32 %v8289_v5, %v2203_v39  ;;  %v2232_v53 = vsel %vm181_vm3, %v8284_v56, -inf }
 0xd61   :  { %v8292_v16 = vpop.permute.xlu0 %3012  ;;  %2233 = vmax.xlane.f32.xlu0 %v2232_v53  ;;  %v2451_v7 = vpop.f32.mrf.mxu1 }
 0xd62   :  { %v2465_v8 = vmul.f32 0.35355338, %v2451_v7  ;;  %v8296_v10 = vadd.f32 %v2222_v26, %v2206_v6  ;;  %v2752_v13 = vpop.permute.xlu1 %2751 }
 0xd63   :  { %v6792_v11 = vpop.f32.mrf.mxu1 }
 0xd64   :  { %v2468_v47 = vadd.f32 %v8271_v24, %v2465_v8  ;;  %v2235_v12 = vsel %vm188_vm4, %v8296_v10, -inf }
 0xd65   :  { %v8299_v20 = vpop.permute.xlu0 %3016  ;;  %2236 = vmax.xlane.f32.xlu0 %v2235_v12  ;;  %v2456_v17 = vpop.f32.mrf.mxu1 }
 0xd66   :  { %v2466_v14 = vmul.f32 0.35355338, %v2456_v17  ;;  %v8303_v18 = vadd.f32 %v2483_v30, %v2468_v47  ;;  %v3015_v1 = vpop.permute.xlu1 %3014 }
 0xd67   :  { %v6795_v19 = vpop.f32.mrf.mxu1 }
 0xd68   :  { %v2469_v21 = vadd.f32 %v8279_v55, %v2466_v14  ;;  %v2494_v22 = vsel %vm181_vm3, %v8303_v18, -inf }
 0xd69   :  { %v2263_v37 = vpop.permute.xlu0 %2262  ;;  %2495 = vmax.xlane.f32.xlu1 %v2494_v22  ;;  %v2461_v23 = vpop.f32.mrf.mxu1 }
 0xd6a   :  { %v2467_v27 = vmul.f32 0.35355338, %v2461_v23  ;;  %v8308_v59 = vadd.f32 %v2485_v38, %v2469_v21  ;;  %v2265_v38 = vpop.permute.xlu1 %2264 }
 0xd6b   :  { %v6798_v32 = vpop.f32.mrf.mxu1 }
 0xd6c   :  { %v2470_v28 = vadd.f32 %v8289_v5, %v2467_v27  ;;  %v2497_v30 = vsel %vm181_vm3, %v8308_v59, -inf }
 0xd6d   :  { %v8311_v29 = vpop.permute.xlu0 %2527  ;;  %2498 = vmax.xlane.f32.xlu0 %v2497_v30  ;;  %v2716_v33 = vpop.f32.mrf.mxu1 }
 0xd6e   :  { %v2730_v61 = vmul.f32 0.35355338, %v2716_v33  ;;  %v8315_v35 = vadd.f32 %v2487_v49, %v2470_v28  ;;  %v8361_v33 = vpop.permute.xlu1 %2529 }
 0xd6f   :  { %v6822_v26 = vpop.f32.mrf.mxu1 }
 0xd70   :  { %v2733_v36 = vadd.f32 %v8271_v24, %v2730_v61  ;;  %v2500_v42 = vsel %vm188_vm4, %v8315_v35, -inf }
 0xd71   :  { %v2267_v50 = vpop.permute.xlu0 %2266  ;;  %2501 = vmax.xlane.f32.xlu1 %v2500_v42  ;;  %v2721_v54 = vpop.f32.mrf.mxu1 }
 0xd72   :  { %6770 = vmatpush3.msk.msra.mxu0 %vm193_vm7, %v2267_v50  ;;  %v2731_v51 = vmul.f32 0.35355338, %v2721_v54  ;;  %v8322_v63 = vadd.f32 %v2748_v57, %v2733_v36 }
 0xd73   :  { %6771 = vmatprep.subr.mxu0 %v7355_v0  ;;  %v6825_v2 = vpop.f32.mrf.mxu1 }
 0xd74   :  { %6772 = vmatpush3.msra.mxu0 %v2265_v38  ;;  %v2734_v49 = vadd.f32 %v8279_v55, %v2731_v51  ;;  %v2759_v39 = vsel %vm181_vm3, %v8322_v63, -inf }
 0xd75   :  { %6773 = vmatprep.subr.mxu0 %v7355_v0  ;;  %2760 = vmax.xlane.f32.xlu0 %v2759_v39  ;;  %v2726_v44 = vpop.f32.mrf.mxu1  ;;  %v8363_v61 = vpop.permute.xlu0 %2531 }
 0xd76   :  { %6774 = vmatpush3.msra.mxu0 %v2263_v37  ;;  %v2732_v6 = vmul.f32 0.35355338, %v2726_v44  ;;  %v8328_v53 = vadd.f32 %v2750_v3, %v2734_v49 }
 0xd77   :  { %6799 = vmatprep.subr.mxu0 %v7355_v0  ;;  %v6828_v7 = vpop.f32.mrf.mxu1 }
 0xd78   :  { %v2735_v57 = vadd.f32 %v8289_v5, %v2732_v6  ;;  %v2762_v8 = vsel %vm181_vm3, %v8328_v53, -inf }
 0xd79   :  { %2763 = vmax.xlane.f32.xlu1 %v2762_v8  ;;  %v2981_v11 = vpop.f32.mrf.mxu1 }
 0xd7a   :  { %v2995_v47 = vmul.f32 0.35355338, %v2981_v11  ;;  %v8334_v12 = vadd.f32 %v2752_v13, %v2735_v57 }
 0xd7b   :  { %v6852_v17 = vpop.f32.mrf.mxu1 }
 0xd7c   :  { %v2998_v14 = vadd.f32 %v8271_v24, %v2995_v47  ;;  %v2765_v3 = vsel %vm188_vm4, %v8334_v12, -inf }
 0xd7d   :  { %2766 = vmax.xlane.f32.xlu0 %v2765_v3  ;;  %v2986_v19 = vpop.f32.mrf.mxu1 }
 0xd7e   :  { %v2996_v21 = vmul.f32 0.35355338, %v2986_v19  ;;  %v8340_v37 = vadd.f32 %v8292_v16, %v2998_v14 }
 0xd7f   :  { %v6855_v22 = vpop.f32.mrf.mxu1 }
 0xd80   :  { %v2999_v23 = vadd.f32 %v8279_v55, %v2996_v21  ;;  %v3024_v27 = vsel %vm181_vm3, %v8340_v37, -inf }
 0xd81   :  { %3025 = vmax.xlane.f32.xlu1 %v3024_v27  ;;  %v2991_v13 = vpop.f32.mrf.mxu1 }
 0xd82   :  { %v8345_v32 = vadd.f32 %v3015_v1, %v2999_v23  ;;  %v2997_v16 = vmul.f32 0.35355338, %v2991_v13 }
 0xd83   :  { %v6858_v24 = vpop.f32.mrf.mxu1 }
 0xd84   :  { %v3027_v28 = vsel %vm181_vm3, %v8345_v32, -inf  ;;  %v3000_v55 = vadd.f32 %v8289_v5, %v2997_v16 }
 0xd85   :  { %3028 = vmax.xlane.f32.xlu0 %v3027_v28 }
 0xd86   :  { %v8355_v30 = vadd.f32 %v8299_v20, %v3000_v55 }
 0xd88   :  { %v3030_v1 = vsel %vm188_vm4, %v8355_v30, -inf }
 0xd92   :  { %2794 = vrot.lane.b32.xlu1 %v8115_v34, %s7370_s14 }
 0xd9b   :  { %2796 = vrot.lane.b32.xlu0 %v8119_v40, %s7370_s14 }
 0xdb6   :  { %3031 = vmax.xlane.f32.xlu1 %v3030_v1 }
 0xdc7   :  { %2792 = vrot.lane.b32.xlu1 %v8125_v43, %s7370_s14 }
 0xde6   :  { %v2231_v26 = vpop.xlane.xlu1 %2230 }
 0xde7   :  { %v2238_v36 = vsub.f32 %v8274_v46, %v2231_v26 }
 0xde9   :  { %v2241_v50 = vmul.f32 1.442695, %v2238_v36 }
 0xdea   :  { %v2234_v42 = vpop.xlane.xlu0 %2233 }
 0xdeb   :  { %7257 = vpow2.f32 %v2241_v50  ;;  %v2239_v5 = vsub.f32 %v8284_v56, %v2234_v42 }
 0xded   :  { %v2243_v20 = vmul.f32 1.442695, %v2239_v5 }
 0xdee   :  { %v2237_v54 = vpop.xlane.xlu0 %2236 }
 0xdef   :  { %7259 = vpow2.f32 %v2243_v20  ;;  %v2240_v38 = vsub.f32 %v8296_v10, %v2237_v54 }
 0xdf1   :  { %v2245_v51 = vmul.f32 1.442695, %v2240_v38 }
 0xdf2   :  { %v2496_v2 = vpop.xlane.xlu1 %2495 }
 0xdf3   :  { %7261 = vpow2.f32 %v2245_v51  ;;  %v2503_v49 = vsub.f32 %v8303_v18, %v2496_v2 }
 0xdf5   :  { %v2506_v39 = vmul.f32 1.442695, %v2503_v49 }
 0xdf6   :  { %v2499_v44 = vpop.xlane.xlu0 %2498 }
 0xdf7   :  { %7263 = vpow2.f32 %v2506_v39  ;;  %v2504_v46 = vsub.f32 %v8308_v59, %v2499_v44 }
 0xdf8   :  { %v8370_v6 = vpop.eup %7257 }
 0xdf9   :  { %v2508_v7 = vmul.f32 1.442695, %v2504_v46  ;;  %v2247_v56 = vsel %vm181_vm3, %v8370_v6, 0.0 }
 0xdfa   :  { %v2502_v57 = vpop.xlane.xlu1 %2501  ;;  %2248 = vadd.xlane.f32.xlu0 %v2247_v56 }
 0xdfb   :  { %7265 = vpow2.f32 %v2508_v7  ;;  %v2505_v10 = vsub.f32 %v8315_v35, %v2502_v57 }
 0xdfc   :  { %v8375_v8 = vpop.eup %7259 }
 0xdfd   :  { %v2510_v11 = vmul.f32 1.442695, %v2505_v10  ;;  %v2250_v18 = vsel %vm181_vm3, %v8375_v8, 0.0 }
 0xdfe   :  { %v2761_v47 = vpop.xlane.xlu0 %2760  ;;  %2251 = vadd.xlane.f32.xlu1 %v2250_v18 }
 0xdff   :  { %7267 = vpow2.f32 %v2510_v11  ;;  %v2768_v59 = vsub.f32 %v8322_v63, %v2761_v47 }
 0xe00   :  { %v8380_v17 = vpop.eup %7261 }
 0xe01   :  { %v2771_v14 = vmul.f32 1.442695, %v2768_v59  ;;  %v2253_v3 = vsel %vm188_vm4, %v8380_v17, 0.0 }
 0xe02   :  { %v2764_v19 = vpop.xlane.xlu1 %2763  ;;  %2254 = vadd.xlane.f32.xlu0 %v2253_v3 }
 0xe03   :  { %7269 = vpow2.f32 %v2771_v14  ;;  %v2769_v35 = vsub.f32 %v8328_v53, %v2764_v19 }
 0xe04   :  { %v8385_v21 = vpop.eup %7263 }
 0xe05   :  { %v2773_v22 = vmul.f32 1.442695, %v2769_v35  ;;  %v2512_v23 = vsel %vm181_vm3, %v8385_v21, 0.0 }
 0xe06   :  { %2513 = vadd.xlane.f32.xlu1 %v2512_v23  ;;  %v2767_v13 = vpop.xlane.xlu0 %2766 }
 0xe07   :  { %7271 = vpow2.f32 %v2773_v22  ;;  %v2770_v51 = vsub.f32 %v8334_v12, %v2767_v13 }
 0xe08   :  { %v8389_v63 = vpop.eup %7265 }
 0xe09   :  { %v2515_v27 = vsel %vm181_vm3, %v8389_v63, 0.0  ;;  %v2775_v2 = vmul.f32 1.442695, %v2770_v51 }
 0xe0a   :  { %v3026_v24 = vpop.xlane.xlu1 %3025  ;;  %2516 = vadd.xlane.f32.xlu0 %v2515_v27 }
 0xe0b   :  { %v3033_v28 = vsub.f32 %v8340_v37, %v3026_v24 }
 0xe0c   :  { %v8394_v16 = vpop.eup %7267 }
 0xe0d   :  { %v3036_v53 = vmul.f32 1.442695, %v3033_v28  ;;  %v2518_v55 = vsel %vm188_vm4, %v8394_v16, 0.0 }
 0xe0e   :  { %v3029_v1 = vpop.xlane.xlu0 %3028  ;;  %2519 = vadd.xlane.f32.xlu1 %v2518_v55  ;;  %v2795_v39 = vpop.permute.xlu1 %2794 }
 0xe0f   :  { %7273 = vpow2.f32 %v3036_v53  ;;  %v3034_v26 = vsub.f32 %v8345_v32, %v3029_v1 }
 0xe10   :  { %v8399_v36 = vpop.eup %7269 }
 0xe11   :  { %v3038_v50 = vmul.f32 1.442695, %v3034_v26  ;;  %v2777_v42 = vsel %vm181_vm3, %v8399_v36, 0.0 }
 0xe12   :  { %2778 = vadd.xlane.f32.xlu1 %v2777_v42 }
 0xe13   :  { %7275 = vpow2.f32 %v3038_v50 }
 0xe14   :  { %v8403_v37 = vpop.eup %7271  ;;  %7277 = vpow2.f32 %v2775_v2 }
 0xe15   :  { %v2780_v5 = vsel %vm181_vm3, %v8403_v37, 0.0 }
 0xe16   :  { %2781 = vadd.xlane.f32.xlu1 %v2780_v5 }
 0xe1c   :  { %v8407_v20 = vpop.eup %7273 }
 0xe1d   :  { %v3042_v54 = vsel %vm181_vm3, %v8407_v20, 0.0 }
 0xe1e   :  { %3043 = vadd.xlane.f32.xlu1 %v3042_v54 }
 0xe20   :  { %v8411_v32 = vpop.eup %7275  ;;  %3061 = vrot.lane.b32.xlu0 %v8119_v40, %s7371_s15 }
 0xe21   :  { %v3045_v38 = vsel %vm181_vm3, %v8411_v32, 0.0  ;;  %v8420_v49 = vpop.eup %7277 }
 0xe22   :  { %3046 = vadd.xlane.f32.xlu1 %v3045_v38  ;;  %v2783_v44 = vsel %vm188_vm4, %v8420_v49, 0.0 }
 0xe33   :  { %3059 = vrot.lane.b32.xlu1 %v8115_v34, %s7371_s15  ;;  %v2797_v34 = vpop.permute.xlu0 %2796 }
 0xe3f   :  { %2784 = vadd.xlane.f32.xlu0 %v2783_v44  ;;  %v3032_v46 = vpop.xlane.xlu1 %3031 }
 0xe40   :  { %v3035_v40 = vsub.f32 %v8355_v30, %v3032_v46 }
 0xe42   :  { %v3040_v7 = vmul.f32 1.442695, %v3035_v40 }
 0xe43   :  { %v2793_v57 = vpop.permute.xlu1 %2792 }
 0xe44   :  { %7279 = vpow2.f32 %v3040_v7 }
 0xe51   :  { %v8425_v56 = vpop.eup %7279 }
 0xe52   :  { %v3048_v12 = vsel %vm188_vm4, %v8425_v56, 0.0 }
 0xe53   :  { %3049 = vadd.xlane.f32.xlu0 %v3048_v12 }
 0xe69   :  { %3057 = vrot.lane.b32.xlu0 %v8125_v43, %s7371_s15 }
 0xe83   :  { %v2249_v10 = vpop.xlane.xlu0 %2248 }
 0xe84   :  { %7281 = vrcp.f32 %v2249_v10  ;;  %v3202_v10 = vld [vmem:[%s9102_s0 + $0x220] sm:$0xff] }
 0xe87   :  { %v2252_v11 = vpop.xlane.xlu1 %2251 }
 0xe88   :  { %7283 = vrcp.f32 %v2252_v11 }
 0xe8b   :  { %v2255_v18 = vpop.xlane.xlu0 %2254 }
 0xe8c   :  { %7285 = vrcp.f32 %v2255_v18 }
 0xe8f   :  { %v2514_v30 = vpop.xlane.xlu1 %2513 }
 0xe90   :  { %7287 = vrcp.f32 %v2514_v30 }
 0xe91   :  { %v7282_v47 = vpop.eup %7281 }
 0xe92   :  { %v2259_v59 = vmul.f32 %v7282_v47, %v8370_v6 }
 0xe93   :  { %v2517_v14 = vpop.xlane.xlu0 %2516 }
 0xe94   :  { %7289 = vrcp.f32 %v2517_v14  ;;  %6776 = vmatmul.mubr.msk.f32.vlgmr.msra.gmra.mxu0 %vm181_vm3, %v2259_v59 }
 0xe95   :  { %v7284_v3 = vpop.eup %7283  ;;  %6800 = vmatpush3.msk.msra.mxu0 %vm193_vm7, %v8363_v61  ;;  %6778 = vmatprep.mubr.msk.f32.mxu0 %vm7356_vm2, %v7355_v0 }
 0xe96   :  { %6801 = vmatprep.subr.mxu0 %v7355_v0  ;;  %v2260_v43 = vmul.f32 %v7284_v3, %v8375_v8  ;;  %v3201_v3 = vld [vmem:[%s9102_s0 + $0x218] sm:$0xff] }
 0xe97   :  { %6802 = vmatpush3.msra.mxu0 %v8361_v33  ;;  %v2520_v19 = vpop.xlane.xlu1 %2519  ;;  %v3062_v28 = vpop.permute.xlu0 %3061 }
 0xe98   :  { %6803 = vmatprep.subr.mxu0 %v7355_v0  ;;  %7291 = vrcp.f32 %v2520_v19  ;;  %6779 = vmatmul.mubr.msk.f32.gmra.mxu0 %vm181_vm3, %v2260_v43 }
 0xe99   :  { %v7286_v6 = vpop.eup %7285  ;;  %6804 = vmatpush3.msra.mxu0 %v8311_v29  ;;  %6781 = vmatprep.mubr.msk.f32.mxu0 %vm7356_vm2, %v7355_v0 }
 0xe9a   :  { %v2261_v61 = vmul.f32 %v7286_v6, %v8380_v17  ;;  %6829 = vmatprep.subr.mxu0 %v7355_v0 }
 0xe9b   :  { %v2779_v35 = vpop.xlane.xlu1 %2778 }
 0xe9c   :  { %7293 = vrcp.f32 %v2779_v35  ;;  %6782 = vmatmul.mubr.msk.f32.gmra.mxu0 %vm181_vm3, %v2261_v61 }
 0xe9d   :  { %v7288_v33 = vpop.eup %7287  ;;  %6805 = vmatprep.mubr.msk.f32.mxu0 %vm7356_vm2, %v7355_v0 }
 0xe9e   :  { %v2524_v8 = vmul.f32 %v7288_v33, %v8385_v21 }
 0xe9f   :  { %v2782_v22 = vpop.xlane.xlu1 %2781 }
 0xea0   :  { %7295 = vrcp.f32 %v2782_v22  ;;  %6806 = vmatmul.mubr.msk.f32.vlgmr.msra.gmra.mxu0 %vm181_vm3, %v2524_v8 }
 0xea1   :  { %v7290_v29 = vpop.eup %7289  ;;  %6830 = vmatpush3.msk.msra.mxu0 %vm193_vm7, %v2797_v34  ;;  %6808 = vmatprep.mubr.msk.f32.mxu0 %vm7356_vm2, %v7355_v0  ;;  %v3203_v34 = vld [vmem:[%s9102_s0 + $0x228] sm:$0xff] }
 0xea2   :  { %6831 = vmatprep.subr.mxu0 %v7355_v0  ;;  %v2525_v17 = vmul.f32 %v7290_v29, %v8389_v63 }
 0xea3   :  { %6832 = vmatpush3.msra.mxu0 %v2795_v39 }
 0xea4   :  { %6833 = vmatprep.subr.mxu0 %v7355_v0  ;;  %6809 = vmatmul.mubr.msk.f32.gmra.mxu0 %vm181_vm3, %v2525_v17 }
 0xea5   :  { %v7292_v21 = vpop.eup %7291  ;;  %6834 = vmatpush3.msra.mxu0 %v2793_v57  ;;  %6811 = vmatprep.mubr.msk.f32.mxu0 %vm7356_vm2, %v7355_v0 }
 0xea6   :  { %v2526_v23 = vmul.f32 %v7292_v21, %v8394_v16  ;;  %6859 = vmatprep.subr.mxu0 %v7355_v0 }
 0xea7   :  { %v3044_v27 = vpop.xlane.xlu1 %3043 }
 0xea8   :  { %6812 = vmatmul.mubr.msk.f32.gmra.mxu0 %vm181_vm3, %v2526_v23 }
 0xea9   :  { %v7294_v13 = vpop.eup %7293  ;;  %6835 = vmatprep.mubr.msk.f32.mxu0 %vm7356_vm2, %v7355_v0 }
 0xeaa   :  { %v2789_v63 = vmul.f32 %v7294_v13, %v8399_v36 }
 0xeab   :  { %v3047_v24 = vpop.xlane.xlu1 %3046 }
 0xeac   :  { %6836 = vmatmul.mubr.msk.f32.vlgmr.msra.gmra.mxu0 %vm181_vm3, %v2789_v63 }
 0xead   :  { %v7296_v53 = vpop.eup %7295  ;;  %6860 = vmatpush3.msk.msra.mxu0 %vm193_vm7, %v3062_v28  ;;  %6838 = vmatprep.mubr.msk.f32.mxu0 %vm7356_vm2, %v7355_v0 }
 0xeae   :  { %6861 = vmatprep.subr.mxu0 %v7355_v0  ;;  %v2790_v16 = vmul.f32 %v7296_v53, %v8403_v37 }
 0xeaf   :  { %v3060_v55 = vpop.permute.xlu1 %3059 }
 0xeb0   :  { %6839 = vmatmul.mubr.msk.f32.gmra.mxu0 %vm181_vm3, %v2790_v16 }
 0xeb1   :  { %6862 = vmatpush3.msra.mxu0 %v3060_v55  ;;  %6841 = vmatprep.mubr.msk.f32.mxu0 %vm7356_vm2, %v7355_v0 }
 0xeb2   :  { %6863 = vmatprep.subr.mxu0 %v7355_v0 }
 0xec8   :  { %v2785_v1 = vpop.xlane.xlu0 %2784 }
 0xec9   :  { %7297 = vrcp.f32 %v2785_v1 }
 0xeca   :  { %7299 = vrcp.f32 %v3044_v27 }
 0xecb   :  { %7301 = vrcp.f32 %v3047_v24 }
 0xed6   :  { %v7298_v26 = vpop.eup %7297 }
 0xed7   :  { %v2791_v36 = vmul.f32 %v7298_v26, %v8420_v49  ;;  %v7300_v42 = vpop.eup %7299 }
 0xed8   :  { %v3054_v37 = vmul.f32 %v7300_v42, %v8407_v20  ;;  %v7302_v54 = vpop.eup %7301 }
 0xed9   :  { %6842 = vmatmul.mubr.msk.f32.gmra.mxu0 %vm181_vm3, %v2791_v36  ;;  %v3055_v38 = vmul.f32 %v7302_v54, %v8411_v32  ;;  %v3352_v54 = vld [vmem:[%s9102_s0 + $0x268] sm:$0xff] }
 0xeda   :  { %6865 = vmatprep.mubr.msk.f32.mxu0 %vm7356_vm2, %v7355_v0 }
 0xedc   :  { %v3050_v50 = vpop.xlane.xlu0 %3049 }
 0xedd   :  { %7303 = vrcp.f32 %v3050_v50 }
 0xee0   :  { %v3058_v5 = vpop.permute.xlu0 %3057 }
 0xee1   :  { %6864 = vmatpush3.msra.mxu0 %v3058_v5  ;;  %v3353_v5 = vld [vmem:[%s9102_s0 + $0x270] sm:$0xff] }
 0xee2   :  { %6866 = vmatmul.mubr.msk.f32.vlgmr.msra.gmra.mxu0 %vm181_vm3, %v3054_v37  ;;  %6891 = vmatprep.subr.mxu0 %v7355_v0 }
 0xee3   :  { %6868 = vmatprep.mubr.msk.f32.mxu0 %vm7356_vm2, %v7355_v0  ;;  %6892 = vmatpush3.msra.mxu0 %v3353_v5 }
 0xee4   :  { %6893 = vmatprep.subr.mxu0 %v7355_v0 }
 0xee5   :  { %6894 = vmatpush3.msra.mxu0 %v3352_v54 }
 0xee6   :  { %6869 = vmatmul.mubr.msk.f32.gmra.mxu0 %vm181_vm3, %v3055_v38  ;;  %v3351_v38 = vld [vmem:[%s9102_s0 + $0x260] sm:$0xff]  ;;  %6895 = vmatprep.subr.mxu0 %v7355_v0 }
 0xee7   :  { %6871 = vmatprep.mubr.msk.f32.mxu0 %vm7356_vm2, %v7355_v0  ;;  %6896 = vmatpush3.msra.mxu0 %v3351_v38 }
 0xee8   :  { %6897 = vmatprep.subr.mxu0 %v7355_v0 }
 0xeea   :  { %v7304_v51 = vpop.eup %7303 }
 0xeeb   :  { %v3056_v20 = vmul.f32 %v7304_v51, %v8425_v56  ;;  %v3204_v56 = vld [vmem:[%s9102_s0 + $0x230] sm:$0xff]  ;;  %v3350_v51 = vld [vmem:[%s9102_s0 + $0x258] sm:$0xff] }
 0xeec   :  { %6875 = vmatpush3.msra.mxu1 %v3204_v56  ;;  %6898 = vmatpush3.msra.mxu0 %v3350_v51 }
 0xeed   :  { %6872 = vmatmul.mubr.msk.f32.gmra.mxu0 %vm181_vm3, %v3056_v20  ;;  %6876 = vmatprep.subr.mxu1 %v7355_v0  ;;  %v3453_v20 = vld [vmem:[%s9102_s0 + $0x290] sm:$0xff] }
 0xeee   :  { %6899 = vmatprep.mubr.msk.f32.mxu0 %vm7356_vm2, %v7355_v0  ;;  %6877 = vmatpush3.msra.mxu1 %v3203_v34 }
 0xeef   :  { %6878 = vmatprep.subr.mxu1 %v7355_v0  ;;  %6925 = vmatprep.subr.mxu0 %v7355_v0 }
 0xef0   :  { %6879 = vmatpush3.msra.mxu1 %v3202_v10 }
 0xef1   :  { %6880 = vmatprep.subr.mxu1 %v7355_v0 }
 0xef2   :  { %6881 = vmatpush3.msra.mxu1 %v3201_v3 }
 0xef3   :  { %6908 = vmatprep.subr.mxu1 %v7355_v0 }
 0xf54   :  { %v2347_v2 = vpop.f32.mrf.mxu0 }
 0xf56   :  { %v6777_v49 = vpop.f32.mrf.mxu0 }
 0xf57   :  { %v8564_v49 = vld [vmem:[%s9102_s0 + $0x2b0] sm:$0xff] }
 0xf58   :  { %v2352_v39 = vpop.f32.mrf.mxu0  ;;  %v3346_v5 = vrot.slane %v8564_v49, %v8089_v52 }
 0xf5a   :  { %v6780_v44 = vpop.f32.mrf.mxu0 }
 0xf5b   :  { %v3208_v44 = vrot.slane %v8564_v49, %v7481_v60 }
 0xf5c   :  { %v2357_v46 = vpop.f32.mrf.mxu0 }
 0xf5e   :  { %v6783_v40 = vpop.f32.mrf.mxu0 }
 0xf60   :  { %v2612_v32 = vpop.f32.mrf.mxu0 }
 0xf61   :  { %3159 = vrot.lane.b32.xlu1 %v2612_v32, %s7372_s17 }
 0xf62   :  { %v6807_v7 = vpop.f32.mrf.mxu0 }
 0xf64   :  { %v2617_v12 = vpop.f32.mrf.mxu0 }
 0xf65   :  { %3161 = vrot.lane.b32.xlu0 %v2617_v12, %s7372_s17 }
 0xf66   :  { %v6810_v57 = vpop.f32.mrf.mxu0 }
 0xf68   :  { %v2622_v11 = vpop.f32.mrf.mxu0 }
 0xf6a   :  { %v6813_v18 = vpop.f32.mrf.mxu0 }
 0xf6c   :  { %v2877_v30 = vpop.f32.mrf.mxu0 }
 0xf6d   :  { %3171 = vrot.lane.b32.xlu0 %v2877_v30, %s7373_s26 }
 0xf6e   :  { %v6837_v47 = vpop.f32.mrf.mxu0 }
 0xf70   :  { %v2882_v59 = vpop.f32.mrf.mxu0 }
 0xf71   :  { %3173 = vrot.lane.b32.xlu1 %v2882_v59, %s7373_s26 }
 0xf72   :  { %v6840_v14 = vpop.f32.mrf.mxu0 }
 0xf99   :  { %v2887_v43 = vpop.f32.mrf.mxu0 }
 0xf9b   :  { %v6843_v19 = vpop.f32.mrf.mxu0 }
 0xfa2   :  { %v3142_v6 = vpop.f32.mrf.mxu0 }
 0xfa3   :  { %3183 = vrot.lane.b32.xlu1 %v3142_v6, %s7374_s10 }
 0xfa4   :  { %v6867_v61 = vpop.f32.mrf.mxu0 }
 0xfa6   :  { %v3147_v35 = vpop.f32.mrf.mxu0 }
 0xfa7   :  { %3163 = vrot.lane.b32.xlu1 %v2622_v11, %s7372_s17  ;;  %3185 = vrot.lane.b32.xlu0 %v3147_v35, %s7374_s10 }
 0xfa8   :  { %v6870_v33 = vpop.f32.mrf.mxu0 }
 0xfab   :  { %3175 = vrot.lane.b32.xlu0 %v2887_v43, %s7373_s26 }
 0xfad   :  { %v3152_v8 = vpop.f32.mrf.mxu0 }
 0xfae   :  { %3187 = vrot.lane.b32.xlu1 %v3152_v8, %s7374_s10 }
 0xfaf   :  { %v6873_v22 = vpop.f32.mrf.mxu0 }
 0xfd3   :  { %v3160_v29 = vpop.permute.xlu1 %3159 }
 0xfd4   :  { %v3192_v27 = vsel %vm436_vm8, %v2347_v2, %v3160_v29  ;;  %v3452_v2 = vld [vmem:[%s9102_s0 + $0x288] sm:$0xff] }
 0xfd7   :  { %v3162_v17 = vpop.permute.xlu0 %3161 }
 0xfd8   :  { %v3193_v28 = vsel %vm436_vm8, %v2352_v39, %v3162_v17 }
 0xfdf   :  { %v3172_v23 = vpop.permute.xlu0 %3171 }
 0xfe0   :  { %v3195_v13 = vsel %vm1523_vm9, %v3192_v27, %v3172_v23 }
 0xfe3   :  { %v3174_v21 = vpop.permute.xlu1 %3173 }
 0xfe4   :  { %v3196_v53 = vsel %vm1523_vm9, %v3193_v28, %v3174_v21 }
0x1015   :  { %v3184_v63 = vpop.permute.xlu1 %3183 }
0x1016   :  { %v3198_v24 = vsel %vm1527_vm10, %v3195_v13, %v3184_v63 }
0x1017   :  { %6883 = vmatmul.mubr.msk.f32.vlgmr.msra.gmra.mxu1 %vm120_vm5, %v3198_v24 }
0x1018   :  { %6885 = vmatprep.mubr.msk.f32.mxu1 %vm7356_vm2, %v7355_v0  ;;  %6909 = vmatpush3.msra.mxu1 %v3453_v20 }
0x1019   :  { %v3186_v16 = vpop.permute.xlu0 %3185  ;;  %v3164_v1 = vpop.permute.xlu1 %3163  ;;  %6910 = vmatprep.subr.mxu1 %v7355_v0 }
0x101a   :  { %v3199_v55 = vsel %vm1527_vm10, %v3196_v53, %v3186_v16  ;;  %v3194_v36 = vsel %vm436_vm8, %v2357_v46, %v3164_v1  ;;  %6911 = vmatpush3.msra.mxu1 %v3452_v2 }
0x101b   :  { %6886 = vmatmul.mubr.msk.f32.gmra.mxu1 %vm120_vm5, %v3199_v55  ;;  %6912 = vmatprep.subr.mxu1 %v7355_v0 }
0x101c   :  { %6888 = vmatprep.mubr.msk.f32.mxu1 %vm7356_vm2, %v7355_v0 }
0x101d   :  { %v3176_v26 = vpop.permute.xlu0 %3175 }
0x101e   :  { %v3197_v50 = vsel %vm1523_vm9, %v3194_v36, %v3176_v26 }
0x1020   :  { %v3188_v42 = vpop.permute.xlu1 %3187 }
0x1021   :  { %v3200_v37 = vsel %vm1527_vm10, %v3197_v50, %v3188_v42  ;;  %v3339_v50 = vrot.slane %v8564_v49, %v7991_v31 }
0x1022   :  { %6889 = vmatmul.mubr.msk.f32.gmra.mxu1 %vm120_vm5, %v3200_v37 }
0x1023   :  { %6916 = vmatprep.mubr.msk.f32.mxu1 %vm7356_vm2, %v7355_v0 }
0x10d7   :  { %v3284_v39 = vpop.f32.mrf.mxu1 }
0x10d8   :  { %v3285_v7 = vadd.f32 %v3284_v39, %v3208_v44 }
0x10d9   :  { %v6884_v46 = vpop.f32.mrf.mxu1 }
0x10da   :  { %v3298_v34 = vadd.f32 %v3285_v7, %v8095_v25  ;;  %v3357_v7 = vrot.slane %v8564_v49, %v8072_v15 }
0x10db   :  { %v3289_v40 = vpop.f32.mrf.mxu1 }
0x10dc   :  { %v3290_v32 = vadd.f32 %v3289_v40, %v3208_v44  ;;  %v3301_v30 = vsel %vm120_vm5, %v3298_v34, 0.0  ;;  %v3451_v40 = vld [vmem:[%s9102_s0 + $0x280] sm:$0xff] }
0x10dd   :  { %v6887_v12 = vpop.f32.mrf.mxu1  ;;  %6913 = vmatpush3.msra.mxu1 %v3451_v40 }
0x10de   :  { %v3299_v56 = vadd.f32 %v3290_v32, %v8101_v48  ;;  %6914 = vmatprep.subr.mxu1 %v7355_v0  ;;  %v3450_v32 = vld [vmem:[%s9102_s0 + $0x278] sm:$0xff] }
0x10df   :  { %6915 = vmatpush3.msra.mxu1 %v3450_v32 }
0x10e0   :  { %v3302_v10 = vsel %vm120_vm5, %v3299_v56, 0.0  ;;  %6942 = vmatprep.subr.mxu1 %v7355_v0 }
0x10e1   :  { %v3303_v59 = vadd.f32 %v3302_v10, %v3301_v30 }
0x10e2   :  { %v3294_v57 = vpop.f32.mrf.mxu1 }
0x10e3   :  { %v3295_v11 = vadd.f32 %v3294_v57, %v3208_v44 }
0x10e4   :  { %v6890_v18 = vpop.f32.mrf.mxu1 }
0x10e5   :  { %v3300_v47 = vadd.f32 %v3295_v11, %v8107_v9 }
0x10e7   :  { %v3304_v14 = vsel %vm124_vm6, %v3300_v47, 0.0 }
0x10e8   :  { %v3305_v3 = vadd.f32 %v3304_v14, %v3303_v59 }
0x10ea   :  { %v3306_v43 = vrot.slane %v3305_v3, 4 }
0x10ec   :  { %v3307_v19 = vadd.f32 %v3306_v43, %v3305_v3  ;;  %v3699_v43 = vld [vmem:[%s9102_s0 + $0x60] sm:$0xff] }
0x10ee   :  { %v3308_v6 = vrot.slane %v3307_v19, 2 }
0x10f0   :  { %v3309_v61 = vadd.f32 %v3308_v6, %v3307_v19  ;;  %v3602_v19 = vld [vmem:[%s9102_s0 + $0x38] sm:$0xff] }
0x10f1   :  { %v3698_v6 = vld [vmem:[%s9102_s0 + $0x58] sm:$0xff] }
0x10f2   :  { %v3310_v48 = vrot.slane %v3309_v61, 1 }
0x10f4   :  { %v3311_v35 = vadd.f32 %v3310_v48, %v3309_v61  ;;  %v3601_v61 = vld [vmem:[%s9102_s0 + $0x30] sm:$0xff]  ;;  %v3600_v48 = vld [vmem:[%s9102_s0 + $0x28] sm:$0xff] }
0x10f6   :  { %v3312_v25 = vmul.f32 0.055555556, %v3311_v35  ;;  %v3697_v35 = vld [vmem:[%s9102_s0 + $0x50] sm:$0xff] }
0x10f8   :  { %v3313_v33 = vsub.f32 %v3298_v34, %v3312_v25  ;;  %v3314_v8 = vsub.f32 %v3299_v56, %v3312_v25  ;;  %v3315_v22 = vsub.f32 %v3300_v47, %v3312_v25  ;;  %v3599_v25 = vld [vmem:[%s9102_s0 + $0x20] sm:$0xff] }
0x10fa   :  { %v3316_v29 = vmul.f32 %v3313_v33, %v3313_v33  ;;  %v3317_v17 = vmul.f32 %v3314_v8, %v3314_v8  ;;  %v3318_v21 = vmul.f32 %v3315_v22, %v3315_v22 }
0x10fc   :  { %v3319_v23 = vsel %vm120_vm5, %v3316_v29, 0.0  ;;  %v3320_v9 = vsel %vm120_vm5, %v3317_v17, 0.0  ;;  %v3322_v13 = vsel %vm124_vm6, %v3318_v21, 0.0 }
0x10fd   :  { %v3321_v27 = vadd.f32 %v3320_v9, %v3319_v23 }
0x10ff   :  { %v3323_v63 = vadd.f32 %v3322_v13, %v3321_v27 }
0x1101   :  { %v3324_v24 = vrot.slane %v3323_v63, 4 }
0x1103   :  { %v3325_v28 = vadd.f32 %v3324_v24, %v3323_v63 }
0x1105   :  { %v3326_v53 = vrot.slane %v3325_v28, 2 }
0x1107   :  { %v3327_v16 = vadd.f32 %v3326_v53, %v3325_v28 }
0x1109   :  { %v3328_v55 = vrot.slane %v3327_v16, 1 }
0x110b   :  { %v3329_v1 = vadd.f32 %v3328_v55, %v3327_v16 }
0x110d   :  { %v3330_v26 = vmul.f32 0.055555556, %v3329_v1 }
0x110f   :  { %v3331_v36 = vadd.f32 1e-05, %v3330_v26 }
0x1111   :  { %7305 = vrsqrt.f32 %v3331_v36 }
0x111e   :  { %v7306_v42 = vpop.eup %7305 }
0x111f   :  { %v3333_v37 = vmul.f32 %v7306_v42, %v3313_v33  ;;  %v3334_v54 = vmul.f32 %v7306_v42, %v3314_v8  ;;  %v3335_v51 = vmul.f32 %v7306_v42, %v3315_v22  ;;  %v3696_v33 = vld [vmem:[%s9102_s0 + $0x48] sm:$0xff]  ;;  %v3457_v8 = vrot.slane %v8564_v49, %v7983_v4 }
0x1121   :  { %v3340_v38 = vmul.f32 %v3339_v50, %v3333_v37  ;;  %v3341_v2 = vmul.f32 %v3339_v50, %v3334_v54  ;;  %v3342_v39 = vmul.f32 %v3339_v50, %v3335_v51 }
0x1123   :  { %v8581_v20 = vadd.f32 %v3346_v5, %v3340_v38  ;;  %v8587_v44 = vadd.f32 %v3346_v5, %v3341_v2  ;;  %v8593_v46 = vadd.f32 %v3346_v5, %v3342_v39 }
0x1125   :  { %6900 = vmatmul.mubr.msk.f32.vlgmr.msra.gmra.mxu0 %vm120_vm5, %v8581_v20 }
0x1126   :  { %6902 = vmatprep.mubr.msk.f32.mxu0 %vm7356_vm2, %v7355_v0  ;;  %6926 = vmatpush3.msra.mxu0 %v3602_v19 }
0x1127   :  { %6927 = vmatprep.subr.mxu0 %v7355_v0 }
0x1128   :  { %6928 = vmatpush3.msra.mxu0 %v3601_v61 }
0x1129   :  { %6903 = vmatmul.mubr.msk.f32.gmra.mxu0 %vm120_vm5, %v8587_v44  ;;  %6929 = vmatprep.subr.mxu0 %v7355_v0 }
0x112a   :  { %6905 = vmatprep.mubr.msk.f32.mxu0 %vm7356_vm2, %v7355_v0  ;;  %6930 = vmatpush3.msra.mxu0 %v3600_v48 }
0x112b   :  { %6931 = vmatprep.subr.mxu0 %v7355_v0 }
0x112c   :  { %6932 = vmatpush3.msra.mxu0 %v3599_v25 }
0x112d   :  { %6906 = vmatmul.mubr.msk.f32.gmra.mxu0 %vm120_vm5, %v8593_v46  ;;  %6959 = vmatprep.subr.mxu0 %v7355_v0 }
0x112e   :  { %6933 = vmatprep.mubr.msk.f32.mxu0 %vm7356_vm2, %v7355_v0 }
0x11e5   :  { %v3433_v12 = vpop.f32.mrf.mxu0 }
0x11e6   :  { %v3434_v56 = vadd.f32 %v3433_v12, %v3357_v7 }
0x11e7   :  { %v6901_v34 = vpop.f32.mrf.mxu0 }
0x11e8   :  { %v3447_v57 = vmax.f32 %v3434_v56, 0.0 }
0x11e9   :  { %v3438_v10 = vpop.f32.mrf.mxu0 }
0x11ea   :  { %v3439_v11 = vadd.f32 %v3438_v10, %v3357_v7  ;;  %6917 = vmatmul.mubr.msk.f32.vlgmr.msra.gmra.mxu1 %vm120_vm5, %v3447_v57 }
0x11eb   :  { %v6904_v18 = vpop.f32.mrf.mxu0  ;;  %6919 = vmatprep.mubr.msk.f32.mxu1 %vm7356_vm2, %v7355_v0  ;;  %6943 = vmatpush3.msra.mxu1 %v3699_v43 }
0x11ec   :  { %v3448_v30 = vmax.f32 %v3439_v11, 0.0  ;;  %6944 = vmatprep.subr.mxu1 %v7355_v0 }
0x11ed   :  { %v3443_v47 = vpop.f32.mrf.mxu0  ;;  %6945 = vmatpush3.msra.mxu1 %v3698_v6  ;;  %v3595_v6 = vrot.slane %v8564_v49, %v7967_v45 }
0x11ee   :  { %v3444_v59 = vadd.f32 %v3443_v47, %v3357_v7  ;;  %6920 = vmatmul.mubr.msk.f32.gmra.mxu1 %vm120_vm5, %v3448_v30  ;;  %6946 = vmatprep.subr.mxu1 %v7355_v0 }
0x11ef   :  { %v6907_v14 = vpop.f32.mrf.mxu0  ;;  %6922 = vmatprep.mubr.msk.f32.mxu1 %vm7356_vm2, %v7355_v0  ;;  %6947 = vmatpush3.msra.mxu1 %v3697_v35 }
0x11f0   :  { %v3449_v3 = vmax.f32 %v3444_v59, 0.0  ;;  %6948 = vmatprep.subr.mxu1 %v7355_v0 }
0x11f1   :  { %6949 = vmatpush3.msra.mxu1 %v3696_v33 }
0x11f2   :  { %6923 = vmatmul.mubr.msk.f32.gmra.mxu1 %vm120_vm5, %v3449_v3  ;;  %6964 = vmatprep.subr.mxu1 %v7355_v0  ;;  %v3588_v3 = vrot.slane %v8564_v49, %v7552_v41 }
0x11f3   :  { %6950 = vmatprep.mubr.msk.f32.mxu1 %vm7356_vm2, %v7355_v0 }
0x12aa   :  { %v3533_v22 = vpop.f32.mrf.mxu1 }
0x12ab   :  { %v3534_v17 = vadd.f32 %v3533_v22, %v3457_v8 }
0x12ac   :  { %v6918_v29 = vpop.f32.mrf.mxu1 }
0x12ad   :  { %v3547_v27 = vadd.f32 %v3534_v17, %v8581_v20  ;;  %v8688_v17 = vld [vmem:[%s9103_s2] sm:$0x3f] }
0x12ae   :  { %v3538_v21 = vpop.f32.mrf.mxu1 }
0x12af   :  { %v3539_v23 = vadd.f32 %v3538_v21, %v3457_v8  ;;  %v3550_v16 = vsel %vm120_vm5, %v3547_v27, 0.0 }
0x12b0   :  { %v6921_v9 = vpop.f32.mrf.mxu1 }
0x12b1   :  { %v3548_v13 = vadd.f32 %v3539_v23, %v8587_v44 }
0x12b2   :  { %v3543_v63 = vpop.f32.mrf.mxu1 }
0x12b3   :  { %v3551_v24 = vsel %vm120_vm5, %v3548_v13, 0.0  ;;  %v3544_v28 = vadd.f32 %v3543_v63, %v3457_v8  ;;  %v3784_v8 = vld [vmem:[%s9102_s0 + $0x40] sm:$0xf] }
0x12b4   :  { %v6924_v53 = vpop.f32.mrf.mxu1  ;;  %v3552_v1 = vadd.f32 %v3551_v24, %v3550_v16 }
0x12b5   :  { %v3549_v55 = vadd.f32 %v3544_v28, %v8593_v46 }
0x12b7   :  { %v3553_v26 = vsel %vm124_vm6, %v3549_v55, 0.0 }
0x12b8   :  { %v3554_v36 = vadd.f32 %v3553_v26, %v3552_v1 }
0x12ba   :  { %v3555_v50 = vrot.slane %v3554_v36, 4 }
0x12bc   :  { %v3556_v42 = vadd.f32 %v3555_v50, %v3554_v36 }
0x12be   :  { %v3557_v37 = vrot.slane %v3556_v42, 2 }
0x12c0   :  { %v3558_v5 = vadd.f32 %v3557_v37, %v3556_v42 }
0x12c2   :  { %v3559_v54 = vrot.slane %v3558_v5, 1 }
0x12c4   :  { %v3560_v38 = vadd.f32 %v3559_v54, %v3558_v5 }
0x12c6   :  { %v3561_v51 = vmul.f32 0.055555556, %v3560_v38 }
0x12c8   :  { %v3562_v20 = vsub.f32 %v3547_v27, %v3561_v51  ;;  %v3563_v2 = vsub.f32 %v3548_v13, %v3561_v51  ;;  %v3564_v39 = vsub.f32 %v3549_v55, %v3561_v51  ;;  %v8700_v13 = vld [vmem:[%s9102_s0 + $0x298] sm:$0xff] }
0x12c9   :  { %v3703_v63 = vrot.slane %v8700_v13, %v7967_v45  ;;  %v3788_v37 = vrot.slane %v8700_v13, %v7552_v41  ;;  %v8738_v41 = vld [vmem:[%s9102_s0 + $0x130] sm:$0x3f] }
0x12ca   :  { %v3565_v44 = vmul.f32 %v3562_v20, %v3562_v20  ;;  %v3566_v40 = vmul.f32 %v3563_v2, %v3563_v2  ;;  %v3567_v32 = vmul.f32 %v3564_v39, %v3564_v39 }
0x12cc   :  { %v3568_v7 = vsel %vm120_vm5, %v3565_v44, 0.0  ;;  %v3569_v46 = vsel %vm120_vm5, %v3566_v40, 0.0  ;;  %v3571_v56 = vsel %vm124_vm6, %v3567_v32, 0.0  ;;  %vm6066_vm6 = vcmask 23552  }
0x12cd   :  { %v3570_v12 = vadd.f32 %v3569_v46, %v3568_v7 }
0x12cf   :  { %v3572_v34 = vadd.f32 %v3571_v56, %v3570_v12 }
0x12d1   :  { %v3573_v57 = vrot.slane %v3572_v34, 4 }
0x12d3   :  { %v3574_v10 = vadd.f32 %v3573_v57, %v3572_v34 }
0x12d5   :  { %v3575_v11 = vrot.slane %v3574_v10, 2 }
0x12d7   :  { %v3576_v18 = vadd.f32 %v3575_v11, %v3574_v10 }
0x12d9   :  { %v3577_v30 = vrot.slane %v3576_v18, 1 }
0x12db   :  { %v3578_v47 = vadd.f32 %v3577_v30, %v3576_v18 }
0x12dd   :  { %v3579_v59 = vmul.f32 0.055555556, %v3578_v47 }
0x12df   :  { %v3580_v14 = vadd.f32 1e-05, %v3579_v59 }
0x12e1   :  { %7307 = vrsqrt.f32 %v3580_v14 }
0x12ee   :  { %v7308_v43 = vpop.eup %7307 }
0x12ef   :  { %v3582_v19 = vmul.f32 %v7308_v43, %v3562_v20  ;;  %v3583_v61 = vmul.f32 %v7308_v43, %v3563_v2  ;;  %v3584_v35 = vmul.f32 %v7308_v43, %v3564_v39 }
0x12f1   :  { %v3589_v48 = vmul.f32 %v3588_v3, %v3582_v19  ;;  %v3590_v33 = vmul.f32 %v3588_v3, %v3583_v61  ;;  %v3591_v49 = vmul.f32 %v3588_v3, %v3584_v35 }
0x12f3   :  { %v3596_v25 = vadd.f32 %v3595_v6, %v3589_v48  ;;  %v3597_v22 = vadd.f32 %v3595_v6, %v3590_v33  ;;  %v3598_v29 = vadd.f32 %v3595_v6, %v3591_v49 }
0x12f5   :  { %6934 = vmatmul.mubr.msk.f32.vlgmr.msra.gmra.mxu0 %vm120_vm5, %v3596_v25  ;;  %6951 = vmatmul.mubr.msk.f32.vlgmr.msra.gmra.mxu1 %vm120_vm5, %v3596_v25 }
0x12f6   :  { %6936 = vmatprep.mubr.msk.f32.mxu0 %vm7356_vm2, %v7355_v0  ;;  %6953 = vmatprep.mubr.msk.f32.mxu1 %vm7356_vm2, %v7355_v0 }
0x12f7   :  { %6960 = vmatpush3.msk.msra.mxu0 %vm3793_vm11, %v3784_v8 }
0x12f8   :  { %6973 = vmatprep.subr.mxu0 %v7355_v0 }
0x12f9   :  { %6937 = vmatmul.mubr.msk.f32.gmra.mxu0 %vm120_vm5, %v3597_v22  ;;  %6954 = vmatmul.mubr.msk.f32.gmra.mxu1 %vm120_vm5, %v3597_v22 }
0x12fa   :  { %6939 = vmatprep.mubr.msk.f32.mxu0 %vm7356_vm2, %v7355_v0  ;;  %6956 = vmatprep.mubr.msk.f32.mxu1 %vm7356_vm2, %v7355_v0 }
0x12fd   :  { %6940 = vmatmul.mubr.msk.f32.gmra.mxu0 %vm120_vm5, %v3598_v29  ;;  %6957 = vmatmul.mubr.msk.f32.gmra.mxu1 %vm120_vm5, %v3598_v29 }
0x12fe   :  { %6961 = vmatprep.mubr.msk.f32.mxu0 %vm7356_vm2, %v7355_v0  ;;  %6970 = vmatprep.mubr.msk.f32.mxu1 %vm7356_vm2, %v7355_v0 }
0x1301   :  { %6962 = vmatmul.mubr.msk.f32.vlgmr.msra.gmra.mxu0 %vm3789_vm12, %v8688_v17 }
0x1302   :  { %6979 = vmatprep.mubr.msk.f32.mxu0 %vm7356_vm2, %v7355_v0 }
0x13b5   :  { %v8695_v21 = vpop.f32.mrf.mxu0  ;;  %v3770_v23 = vpop.f32.mrf.mxu1 }
0x13b6   :  { %v8724_v54 = vadd.f32 %v3770_v23, %v3703_v63 }
0x13b7   :  { %v6935_v9 = vpop.f32.mrf.mxu0  ;;  %v6952_v27 = vpop.f32.mrf.mxu1 }
0x13b9   :  { %v8704_v24 = vpop.f32.mrf.mxu0  ;;  %v3775_v28 = vpop.f32.mrf.mxu1 }
0x13ba   :  { %v8706_v53 = vadd.f32 %v3775_v28, %v3703_v63 }
0x13bb   :  { %v6938_v16 = vpop.f32.mrf.mxu0  ;;  %v6955_v55 = vpop.f32.mrf.mxu1 }
0x13bc   :  { %3966 = vrot.lane.b32.xlu1 %v8706_v53, %s7358_s20 }
0x13bd   :  { %v8710_v1 = vpop.f32.mrf.mxu0  ;;  %v3780_v26 = vpop.f32.mrf.mxu1 }
0x13be   :  { %v8712_v36 = vadd.f32 %v3780_v26, %v3703_v63 }
0x13bf   :  { %v6941_v50 = vpop.f32.mrf.mxu0  ;;  %v6958_v42 = vpop.f32.mrf.mxu1 }
0x13c0   :  { %4053 = vrot.lane.b32.xlu1 %v8712_v36, %s7362_s30  ;;  %6965 = vmatpush3.xpose.msk.msra.mxu1 %vm436_vm8, %v8712_v36 }
0x13c1   :  { %6966 = vmatprep.subr.mxu1 %v7355_v0  ;;  %v3863_v45 = vpop.f32.mrf.mxu0 }
0x13c2   :  { %v8726_v38 = vadd.f32 %v3863_v45, %v3788_v37 }
0x13c3   :  { %v6963_v5 = vpop.f32.mrf.mxu0 }
0x13c4   :  { %6967 = vmatpush3.xpose.msk.msra.mxu1 %vm436_vm8, %v8706_v53 }
0x13c5   :  { %6968 = vmatprep.subr.mxu1 %v7355_v0 }
0x13c8   :  { %6969 = vmatpush3.xpose.msk.msra.mxu1 %vm436_vm8, %v8724_v54 }
0x13c9   :  { %6991 = vmatprep.subr.mxu1 %v7355_v0 }
0x13cb   :  { %6971 = vmatmul.mubr.msk.f32.vlgmr.msra.gmra.mxu1 %vm436_vm8, %v8726_v38 }
0x13cc   :  { %6997 = vmatprep.mubr.msk.f32.mxu1 %vm7356_vm2, %v7355_v0 }
0x142e   :  { %v3967_v12 = vpop.permute.xlu1 %3966 }
0x1432   :  { %v4054_v30 = vpop.permute.xlu1 %4053 }
0x148b   :  { %v3946_v51 = vpop.f32.mrf.mxu1 }
0x148c   :  { %v3950_v20 = vmul.f32 0.35355338, %v3946_v51 }
0x148d   :  { %v6972_v2 = vpop.f32.mrf.mxu1 }
0x148e   :  { %v3951_v39 = vadd.f32 %v3950_v20, %v8738_v41 }
0x1490   :  { %v3953_v44 = vsel %vm3952_vm13, %v3951_v39, -inf }
0x1491   :  { %3954 = vmax.xlane.f32.xlu0 %v3953_v44 }
0x14a7   :  { %3968 = vrot.lane.b32.xlu0 %v8712_v36, %s7358_s20 }
0x14ab   :  { %3964 = vrot.lane.b32.xlu0 %v8724_v54, %s7358_s20 }
0x14af   :  { %4051 = vrot.lane.b32.xlu0 %v8706_v53, %s7362_s30 }
0x14b3   :  { %4047 = vrot.lane.b32.xlu0 %v8726_v38, %s7362_s30 }
0x14b7   :  { %4150 = vrot.lane.b32.xlu0 %v8712_v36, %s7360_s28 }
0x151a   :  { %v3955_v40 = vpop.xlane.xlu0 %3954 }
0x151b   :  { %v3956_v32 = vsub.f32 %v3951_v39, %v3955_v40 }
0x151d   :  { %v3957_v7 = vmul.f32 1.442695, %v3956_v32 }
0x151e   :  { %v3969_v46 = vpop.permute.xlu0 %3968 }
0x151f   :  { %7309 = vpow2.f32 %v3957_v7  ;;  %6974 = vmatpush3.msk.msra.mxu0 %vm193_vm7, %v3969_v46 }
0x1520   :  { %6975 = vmatprep.subr.mxu0 %v7355_v0 }
0x1521   :  { %6976 = vmatpush3.msra.mxu0 %v3967_v12 }
0x1522   :  { %6977 = vmatprep.subr.mxu0 %v7355_v0  ;;  %v3965_v56 = vpop.permute.xlu0 %3964 }
0x1523   :  { %6978 = vmatpush3.msra.mxu0 %v3965_v56 }
0x1524   :  { %6982 = vmatprep.subr.mxu0 %v7355_v0 }
0x1526   :  { %v4052_v34 = vpop.permute.xlu0 %4051 }
0x152a   :  { %v4048_v57 = vpop.permute.xlu0 %4047 }
0x152c   :  { %v7310_v10 = vpop.eup %7309 }
0x152d   :  { %v3959_v11 = vsel %vm3952_vm13, %v7310_v10, 0.0 }
0x152e   :  { %3960 = vadd.xlane.f32.xlu1 %v3959_v11  ;;  %v4151_v18 = vpop.permute.xlu0 %4150 }
0x152f   :  { %6992 = vmatpush3.msk.msra.mxu1 %vm193_vm7, %v4151_v18 }
0x1530   :  { %6993 = vmatprep.subr.mxu1 %v7355_v0 }
0x153f   :  { %4049 = vrot.lane.b32.xlu1 %v8724_v54, %s7362_s30 }
0x15b7   :  { %v3961_v47 = vpop.xlane.xlu1 %3960 }
0x15b8   :  { %7311 = vrcp.f32 %v3961_v47 }
0x15bb   :  { %v4050_v3 = vpop.permute.xlu1 %4049 }
0x15c5   :  { %v7312_v59 = vpop.eup %7311 }
0x15c6   :  { %v3963_v14 = vmul.f32 %v7312_v59, %v7310_v10 }
0x15c8   :  { %6980 = vmatmul.mubr.msk.f32.vlgmr.msra.gmra.mxu0 %vm181_vm3, %v3963_v14 }
0x15c9   :  { %6983 = vmatpush3.xpose.msk.msra.mxu0 %vm436_vm8, %v4054_v30  ;;  %6988 = vmatprep.mubr.msk.f32.mxu0 %vm7356_vm2, %v7355_v0 }
0x15ca   :  { %6984 = vmatprep.subr.mxu0 %v7355_v0 }
0x15cd   :  { %6985 = vmatpush3.xpose.msk.msra.mxu0 %vm436_vm8, %v4052_v34 }
0x15ce   :  { %6986 = vmatprep.subr.mxu0 %v7355_v0 }
0x15d1   :  { %6987 = vmatpush3.xpose.msk.msra.mxu0 %vm436_vm8, %v4050_v3 }
0x15d2   :  { %7009 = vmatprep.subr.mxu0 %v7355_v0 }
0x15d4   :  { %6989 = vmatmul.mubr.msk.f32.vlgmr.msra.gmra.mxu0 %vm436_vm8, %v4048_v57 }
0x15d5   :  { %7015 = vmatprep.mubr.msk.f32.mxu0 %vm7356_vm2, %v7355_v0 }
0x1688   :  { %v8773_v43 = vpop.f32.mrf.mxu0 }
0x168a   :  { %v6981_v19 = vpop.f32.mrf.mxu0 }
0x1694   :  { %v4129_v6 = vpop.f32.mrf.mxu0 }
0x1695   :  { %v4133_v61 = vmul.f32 0.35355338, %v4129_v6 }
0x1696   :  { %v6990_v48 = vpop.f32.mrf.mxu0 }
0x1697   :  { %v4134_v35 = vadd.f32 %v4133_v61, %v8738_v41 }
0x1699   :  { %v4135_v25 = vsel %vm3952_vm13, %v4134_v35, -inf }
0x169a   :  { %4136 = vmax.xlane.f32.xlu1 %v4135_v25 }
0x16ab   :  { %4148 = vrot.lane.b32.xlu1 %v8706_v53, %s7360_s28 }
0x16af   :  { %4146 = vrot.lane.b32.xlu1 %v8724_v54, %s7360_s28 }
0x16b3   :  { %4233 = vrot.lane.b32.xlu1 %v8706_v53, %s7364_s5 }
0x16b7   :  { %4229 = vrot.lane.b32.xlu1 %v8726_v38, %s7364_s5 }
0x16bb   :  { %4330 = vrot.lane.b32.xlu1 %v8706_v53, %s7361_s29 }
0x16bf   :  { %4417 = vrot.lane.b32.xlu1 %v8712_v36, %s7365_s6 }
0x1723   :  { %v4137_v33 = vpop.xlane.xlu1 %4136 }
0x1724   :  { %v4138_v8 = vsub.f32 %v4134_v35, %v4137_v33 }
0x1726   :  { %v4139_v49 = vmul.f32 1.442695, %v4138_v8 }
0x1727   :  { %v4149_v22 = vpop.permute.xlu1 %4148 }
0x1728   :  { %7313 = vpow2.f32 %v4139_v49  ;;  %6994 = vmatpush3.msra.mxu1 %v4149_v22 }
0x1729   :  { %6995 = vmatprep.subr.mxu1 %v7355_v0 }
0x172b   :  { %v4147_v29 = vpop.permute.xlu1 %4146 }
0x172c   :  { %6996 = vmatpush3.msra.mxu1 %v4147_v29  ;;  %v4611_v29 = vld [vmem:[%s9102_s0 + $0x80] sm:$0xff] }
0x172d   :  { %7000 = vmatprep.subr.mxu1 %v7355_v0 }
0x172f   :  { %v4234_v55 = vpop.permute.xlu1 %4233 }
0x1733   :  { %v4230_v50 = vpop.permute.xlu1 %4229 }
0x1735   :  { %v7314_v23 = vpop.eup %7313 }
0x1736   :  { %v4141_v9 = vsel %vm3952_vm13, %v7314_v23, 0.0 }
0x1737   :  { %4142 = vadd.xlane.f32.xlu0 %v4141_v9  ;;  %v4331_v7 = vpop.permute.xlu1 %4330  ;;  %v4609_v9 = vld [vmem:[%s9102_s0 + $0x70] sm:$0xff] }
0x173b   :  { %v4418_v56 = vpop.permute.xlu1 %4417 }
0x174d   :  { %4235 = vrot.lane.b32.xlu0 %v8712_v36, %s7364_s5 }
0x1751   :  { %4231 = vrot.lane.b32.xlu0 %v8724_v54, %s7364_s5 }
0x17c0   :  { %v4143_v27 = vpop.xlane.xlu0 %4142 }
0x17c1   :  { %7315 = vrcp.f32 %v4143_v27  ;;  %v4608_v27 = vld [vmem:[%s9102_s0 + $0x68] sm:$0xff] }
0x17c4   :  { %v4236_v16 = vpop.permute.xlu0 %4235 }
0x17c8   :  { %v4232_v26 = vpop.permute.xlu0 %4231 }
0x17ce   :  { %v7316_v63 = vpop.eup %7315 }
0x17cf   :  { %v4145_v28 = vmul.f32 %v7316_v63, %v7314_v23  ;;  %v4610_v23 = vld [vmem:[%s9102_s0 + $0x78] sm:$0xff] }
0x17d1   :  { %6998 = vmatmul.mubr.msk.f32.vlgmr.msra.gmra.mxu1 %vm181_vm3, %v4145_v28 }
0x17d2   :  { %7001 = vmatpush3.xpose.msk.msra.mxu1 %vm436_vm8, %v4236_v16  ;;  %7006 = vmatprep.mubr.msk.f32.mxu1 %vm7356_vm2, %v7355_v0 }
0x17d3   :  { %7002 = vmatprep.subr.mxu1 %v7355_v0 }
0x17d6   :  { %7003 = vmatpush3.xpose.msk.msra.mxu1 %vm436_vm8, %v4234_v55 }
0x17d7   :  { %7004 = vmatprep.subr.mxu1 %v7355_v0 }
0x17da   :  { %7005 = vmatpush3.xpose.msk.msra.mxu1 %vm436_vm8, %v4232_v26 }
0x17db   :  { %7027 = vmatprep.subr.mxu1 %v7355_v0 }
0x17dd   :  { %7007 = vmatmul.mubr.msk.f32.vlgmr.msra.gmra.mxu1 %vm436_vm8, %v4230_v50 }
0x17de   :  { %7033 = vmatprep.mubr.msk.f32.mxu1 %vm7356_vm2, %v7355_v0 }
0x1891   :  { %v8808_v42 = vpop.f32.mrf.mxu1 }
0x1893   :  { %v6999_v45 = vpop.f32.mrf.mxu1 }
0x189d   :  { %v4311_v37 = vpop.f32.mrf.mxu1 }
0x189e   :  { %v4315_v5 = vmul.f32 0.35355338, %v4311_v37  ;;  %v4769_v37 = vld [vmem:[%s9102_s0 + $0xa0] sm:$0xff] }
0x189f   :  { %v7008_v51 = vpop.f32.mrf.mxu1 }
0x18a0   :  { %v4316_v20 = vadd.f32 %v4315_v5, %v8738_v41  ;;  %v4768_v5 = vld [vmem:[%s9102_s0 + $0x98] sm:$0xff]  ;;  %v8898_v51 = vld [vmem:[%s9102_s0 + $0x2a0] sm:$0xff] }
0x18a2   :  { %v4317_v2 = vsel %vm3952_vm13, %v4316_v20, -inf }
0x18a3   :  { %4318 = vmax.xlane.f32.xlu0 %v4317_v2 }
0x18b9   :  { %4332 = vrot.lane.b32.xlu0 %v8712_v36, %s7361_s29 }
0x18bd   :  { %4328 = vrot.lane.b32.xlu0 %v8724_v54, %s7361_s29 }
0x18c1   :  { %4415 = vrot.lane.b32.xlu0 %v8706_v53, %s7365_s6 }
0x18c5   :  { %4411 = vrot.lane.b32.xlu0 %v8726_v38, %s7365_s6 }
0x192c   :  { %v4319_v39 = vpop.xlane.xlu0 %4318 }
0x192d   :  { %v4320_v44 = vsub.f32 %v4316_v20, %v4319_v39  ;;  %v4615_v20 = vrot.slane %v8898_v51, %v7481_v60  ;;  %v4848_v60 = vld [vmem:[%s9102_s0 + $0xb0] sm:$0xff] }
0x192f   :  { %v4321_v40 = vmul.f32 1.442695, %v4320_v44 }
0x1930   :  { %v4333_v32 = vpop.permute.xlu0 %4332 }
0x1931   :  { %7317 = vpow2.f32 %v4321_v40  ;;  %7010 = vmatpush3.msk.msra.mxu0 %vm193_vm7, %v4333_v32  ;;  %v4850_v32 = vld [vmem:[%s9102_s0 + $0xc0] sm:$0xff] }
0x1932   :  { %7011 = vmatprep.subr.mxu0 %v7355_v0 }
0x1933   :  { %7012 = vmatpush3.msra.mxu0 %v4331_v7  ;;  %v4849_v7 = vld [vmem:[%s9102_s0 + $0xb8] sm:$0xff] }
0x1934   :  { %7013 = vmatprep.subr.mxu0 %v7355_v0  ;;  %v4329_v46 = vpop.permute.xlu0 %4328 }
0x1935   :  { %7014 = vmatpush3.msra.mxu0 %v4329_v46  ;;  %v4847_v46 = vld [vmem:[%s9102_s0 + $0xa8] sm:$0xff] }
0x1936   :  { %7018 = vmatprep.subr.mxu0 %v7355_v0 }
0x1938   :  { %v4416_v11 = vpop.permute.xlu0 %4415 }
0x193c   :  { %v4412_v30 = vpop.permute.xlu0 %4411 }
0x193e   :  { %v7318_v12 = vpop.eup %7317 }
0x193f   :  { %v4323_v38 = vsel %vm3952_vm13, %v7318_v12, 0.0 }
0x1940   :  { %4324 = vadd.xlane.f32.xlu1 %v4323_v38 }
0x1951   :  { %4413 = vrot.lane.b32.xlu1 %v8724_v54, %s7365_s6 }
0x19c9   :  { %v4325_v34 = vpop.xlane.xlu1 %4324 }
0x19ca   :  { %7319 = vrcp.f32 %v4325_v34  ;;  %v4854_v34 = vrot.slane %v8898_v51, %v8072_v15  ;;  %v4773_v15 = vrot.slane %v8898_v51, %v7489_v62 }
0x19cd   :  { %v4414_v18 = vpop.permute.xlu1 %4413 }
0x19d7   :  { %v7320_v57 = vpop.eup %7319 }
0x19d8   :  { %v4327_v10 = vmul.f32 %v7320_v57, %v7318_v12  ;;  %v4766_v12 = vld [vmem:[%s9102_s0 + $0x88] sm:$0xff] }
0x19da   :  { %7016 = vmatmul.mubr.msk.f32.vlgmr.msra.gmra.mxu0 %vm181_vm3, %v4327_v10 }
0x19db   :  { %7019 = vmatpush3.xpose.msk.msra.mxu0 %vm436_vm8, %v4418_v56  ;;  %7024 = vmatprep.mubr.msk.f32.mxu0 %vm7356_vm2, %v7355_v0 }
0x19dc   :  { %7020 = vmatprep.subr.mxu0 %v7355_v0 }
0x19df   :  { %7021 = vmatpush3.xpose.msk.msra.mxu0 %vm436_vm8, %v4416_v11 }
0x19e0   :  { %7022 = vmatprep.subr.mxu0 %v7355_v0 }
0x19e3   :  { %7023 = vmatpush3.xpose.msk.msra.mxu0 %vm436_vm8, %v4414_v18 }
0x19e4   :  { %7047 = vmatprep.subr.mxu0 %v7355_v0 }
0x19e6   :  { %7025 = vmatmul.mubr.msk.f32.vlgmr.msra.gmra.mxu0 %vm436_vm8, %v4412_v30 }
0x19e7   :  { %7049 = vmatprep.mubr.msk.f32.mxu0 %vm7356_vm2, %v7355_v0 }
0x1a9a   :  { %v4407_v47 = vpop.f32.mrf.mxu0 }
0x1a9c   :  { %v7017_v59 = vpop.f32.mrf.mxu0 }
0x1aa6   :  { %v4493_v14 = vpop.f32.mrf.mxu0 }
0x1aa7   :  { %v4497_v3 = vmul.f32 0.35355338, %v4493_v14 }
0x1aa8   :  { %v7026_v19 = vpop.f32.mrf.mxu0 }
0x1aa9   :  { %v4498_v6 = vadd.f32 %v4497_v3, %v8738_v41 }
0x1aab   :  { %v4499_v61 = vsel %vm3952_vm13, %v4498_v6, -inf }
0x1aac   :  { %4500 = vmax.xlane.f32.xlu1 %v4499_v61  ;;  %v4927_v61 = vld [vmem:[%s9102_s0 + $0x138] sm:$0x3] }
0x1abd   :  { %4512 = vrot.lane.b32.xlu1 %v8706_v53, %s7363_s4 }
0x1ac1   :  { %4510 = vrot.lane.b32.xlu1 %v8724_v54, %s7363_s4 }
0x1ac5   :  { %4598 = vrot.lane.b32.xlu1 %v4407_v47, %s7373_s26 }
0x1ac9   :  { %4689 = vrot.lane.b32.xlu1 %v8688_v17, %s7375_s12 }
0x1b35   :  { %v4501_v48 = vpop.xlane.xlu1 %4500 }
0x1b36   :  { %v4502_v35 = vsub.f32 %v4498_v6, %v4501_v48 }
0x1b38   :  { %v4503_v25 = vmul.f32 1.442695, %v4502_v35 }
0x1b39   :  { %v4513_v41 = vpop.permute.xlu1 %4512 }
0x1b3a   :  { %7321 = vpow2.f32 %v4503_v25 }
0x1b3d   :  { %v4511_v49 = vpop.permute.xlu1 %4510 }
0x1b41   :  { %v4599_v26 = vpop.permute.xlu1 %4598 }
0x1b45   :  { %v4690_v44 = vpop.permute.xlu1 %4689 }
0x1b47   :  { %v7322_v33 = vpop.eup %7321 }
0x1b48   :  { %v4505_v8 = vsel %vm3952_vm13, %v7322_v33, 0.0 }
0x1b49   :  { %4506 = vadd.xlane.f32.xlu0 %v4505_v8 }
0x1b5f   :  { %4514 = vrot.lane.b32.xlu0 %v8712_v36, %s7363_s4 }
0x1b63   :  { %4594 = vrot.lane.b32.xlu0 %v8808_v42, %s7372_s17 }
0x1bd2   :  { %v4507_v53 = vpop.xlane.xlu0 %4506 }
0x1bd3   :  { %7323 = vrcp.f32 %v4507_v53 }
0x1bd6   :  { %v4515_v54 = vpop.permute.xlu0 %4514 }
0x1bd7   :  { %7028 = vmatpush3.msk.msra.mxu1 %vm193_vm7, %v4515_v54 }
0x1bd8   :  { %7029 = vmatprep.subr.mxu1 %v7355_v0 }
0x1bd9   :  { %7030 = vmatpush3.msra.mxu1 %v4513_v41 }
0x1bda   :  { %7031 = vmatprep.subr.mxu1 %v7355_v0  ;;  %v4595_v16 = vpop.permute.xlu0 %4594 }
0x1bdb   :  { %7032 = vmatpush3.msra.mxu1 %v4511_v49  ;;  %v4605_v55 = vsel %vm436_vm8, %v8773_v43, %v4595_v16  ;;  %v4767_v43 = vld [vmem:[%s9102_s0 + $0x90] sm:$0xff] }
0x1bdc   :  { %7036 = vmatprep.subr.mxu1 %v7355_v0  ;;  %v4606_v50 = vsel %vm1523_vm9, %v4605_v55, %v4599_v26 }
0x1be0   :  { %v7324_v22 = vpop.eup %7323 }
0x1be1   :  { %v4509_v36 = vmul.f32 %v7324_v22, %v7322_v33 }
0x1be3   :  { %7034 = vmatmul.mubr.msk.f32.vlgmr.msra.gmra.mxu1 %vm181_vm3, %v4509_v36 }
0x1be4   :  { %7044 = vmatprep.mubr.msk.f32.mxu1 %vm7356_vm2, %v7355_v0  ;;  %7037 = vmatpush3.msra.mxu1 %v4611_v29 }
0x1be5   :  { %7038 = vmatprep.subr.mxu1 %v7355_v0 }
0x1be6   :  { %7039 = vmatpush3.msra.mxu1 %v4610_v23 }
0x1be7   :  { %7040 = vmatprep.subr.mxu1 %v7355_v0 }
0x1be8   :  { %7041 = vmatpush3.msra.mxu1 %v4609_v9 }
0x1be9   :  { %7042 = vmatprep.subr.mxu1 %v7355_v0 }
0x1bea   :  { %7043 = vmatpush3.msra.mxu1 %v4608_v27 }
0x1beb   :  { %7052 = vmatprep.subr.mxu1 %v7355_v0 }
0x1ca3   :  { %v4589_v63 = vpop.f32.mrf.mxu1 }
0x1ca4   :  { %4602 = vrot.lane.b32.xlu0 %v4589_v63, %s7374_s10 }
0x1ca5   :  { %v7035_v28 = vpop.f32.mrf.mxu1 }
0x1d16   :  { %v4603_v42 = vpop.permute.xlu0 %4602 }
0x1d17   :  { %v4607_v45 = vsel %vm1527_vm10, %v4606_v50, %v4603_v42 }
0x1d18   :  { %7045 = vmatmul.mubr.msk.f32.vlgmr.msra.gmra.mxu1 %vm120_vm5, %v4607_v45 }
0x1d19   :  { %7060 = vmatprep.mubr.msk.f32.mxu1 %vm7356_vm2, %v7355_v0  ;;  %7053 = vmatpush3.msra.mxu1 %v4769_v37 }
0x1d1a   :  { %7054 = vmatprep.subr.mxu1 %v7355_v0 }
0x1d1b   :  { %7055 = vmatpush3.msra.mxu1 %v4768_v5 }
0x1d1c   :  { %7056 = vmatprep.subr.mxu1 %v7355_v0 }
0x1d1d   :  { %7057 = vmatpush3.msra.mxu1 %v4767_v43 }
0x1d1e   :  { %7058 = vmatprep.subr.mxu1 %v7355_v0 }
0x1d1f   :  { %7059 = vmatpush3.msra.mxu1 %v4766_v12 }
0x1d20   :  { %7074 = vmatprep.subr.mxu1 %v7355_v0 }
0x1dd8   :  { %v4685_v2 = vpop.f32.mrf.mxu1 }
0x1dd9   :  { %v4686_v39 = vadd.f32 %v4685_v2, %v4615_v20 }
0x1dda   :  { %v7046_v40 = vpop.f32.mrf.mxu1 }
0x1ddb   :  { %7048 = vmatpush3.msk.msra.mxu0 %vm36_vm0, %v4686_v39 }
0x1ddc   :  { %7050 = vmatmul.mubr.msk.f32.vlgmr.msra.gmra.mxu0 %vm26_vm1, %v4690_v44  ;;  %7063 = vmatprep.subr.mxu0 %v7355_v0 }
0x1ddd   :  { %7064 = vmatpush3.msra.mxu0 %v4850_v32  ;;  %7071 = vmatprep.mubr.msk.f32.mxu0 %vm7356_vm2, %v7355_v0 }
0x1dde   :  { %7065 = vmatprep.subr.mxu0 %v7355_v0 }
0x1ddf   :  { %7066 = vmatpush3.msra.mxu0 %v4849_v7 }
0x1de0   :  { %7067 = vmatprep.subr.mxu0 %v7355_v0 }
0x1de1   :  { %7068 = vmatpush3.msra.mxu0 %v4848_v60 }
0x1de2   :  { %7069 = vmatprep.subr.mxu0 %v7355_v0 }
0x1de3   :  { %7070 = vmatpush3.msra.mxu0 %v4847_v46 }
0x1de4   :  { %7072 = vmatmul.mubr.msk.f32.vlgmr.msra.gmra.mxu0 %vm120_vm5, %v4686_v39  ;;  %7079 = vmatprep.subr.mxu0 %v7355_v0 }
0x1de5   :  { %7081 = vmatprep.mubr.msk.f32.mxu0 %vm7356_vm2, %v7355_v0 }
0x1e9c   :  { %v4762_v38 = vpop.f32.mrf.mxu0 }
0x1e9d   :  { %7061 = vmatmul.mubr.msk.f32.vlgmr.msra.gmra.mxu1 %vm120_vm5, %v4762_v38 }
0x1e9e   :  { %v7051_v56 = vpop.f32.mrf.mxu0  ;;  %7076 = vmatprep.mubr.msk.f32.mxu1 %vm7356_vm2, %v7355_v0 }
0x1ea4   :  { %v4923_v57 = vpop.f32.mrf.mxu0 }
0x1ea5   :  { %v8935_v10 = vadd.f32 %v4923_v57, %v4854_v34 }
0x1ea6   :  { %v7073_v11 = vpop.f32.mrf.mxu0 }
0x1ea7   :  { %5097 = vrot.lane.b32.xlu0 %v8935_v10, %s7362_s30  ;;  %7075 = vmatpush3.xpose.msk.msra.mxu1 %vm436_vm8, %v8935_v10 }
0x1ea8   :  { %7084 = vmatprep.subr.mxu1 %v7355_v0 }
0x1eab   :  { %5265 = vrot.lane.b32.xlu0 %v8935_v10, %s7364_s5 }
0x1eaf   :  { %5433 = vrot.lane.b32.xlu0 %v8935_v10, %s7365_s6 }
0x1f19   :  { %v5098_v59 = vpop.permute.xlu0 %5097 }
0x1f1d   :  { %v5266_v62 = vpop.permute.xlu0 %5265 }
0x1f21   :  { %v5434_v19 = vpop.permute.xlu0 %5433 }
0x1f5d   :  { %v4843_v18 = vpop.f32.mrf.mxu1 }
0x1f5e   :  { %v4844_v30 = vadd.f32 %v4843_v18, %v4773_v15 }
0x1f5f   :  { %v7062_v47 = vpop.f32.mrf.mxu1 }
0x1f60   :  { %5095 = vrot.lane.b32.xlu1 %v4844_v30, %s7362_s30  ;;  %7077 = vmatmul.mubr.msk.f32.vlgmr.msra.gmra.mxu1 %vm436_vm8, %v4844_v30  ;;  %s7377_s30 = smov 3  }
0x1f61   :  { %7085 = vmatpush3.xpose.msk.msra.mxu1 %vm436_vm8, %v5098_v59  ;;  %7086 = vmatprep.mubr.msk.f32.mxu1 %vm7356_vm2, %v7355_v0 }
0x1f62   :  { %7094 = vmatprep.subr.mxu1 %v7355_v0 }
0x1f64   :  { %5263 = vrot.lane.b32.xlu1 %v4844_v30, %s7364_s5 }
0x1f68   :  { %5431 = vrot.lane.b32.xlu1 %v4844_v30, %s7365_s6 }
0x1fd2   :  { %v5096_v14 = vpop.permute.xlu1 %5095 }
0x1fd3   :  { %7087 = vmatmul.mubr.msk.f32.vlgmr.msra.gmra.mxu1 %vm436_vm8, %v5096_v14 }
0x1fd4   :  { %7095 = vmatpush3.xpose.msk.msra.mxu1 %vm436_vm8, %v5266_v62  ;;  %7096 = vmatprep.mubr.msk.f32.mxu1 %vm7356_vm2, %v7355_v0 }
0x1fd5   :  { %7104 = vmatprep.subr.mxu1 %v7355_v0 }
0x1fd6   :  { %v5264_v3 = vpop.permute.xlu1 %5263 }
0x1fd7   :  { %7097 = vmatmul.mubr.msk.f32.vlgmr.msra.gmra.mxu1 %vm436_vm8, %v5264_v3 }
0x1fd8   :  { %7105 = vmatpush3.xpose.msk.msra.mxu1 %vm436_vm8, %v5434_v19  ;;  %7106 = vmatprep.mubr.msk.f32.mxu1 %vm7356_vm2, %v7355_v0 }
0x1fd9   :  { %7114 = vmatprep.subr.mxu1 %v7355_v0 }
0x1fda   :  { %v5432_v6 = vpop.permute.xlu1 %5431 }
0x1fdb   :  { %7107 = vmatmul.mubr.msk.f32.vlgmr.msra.gmra.mxu1 %vm436_vm8, %v5432_v6 }
0x1fdc   :  { %7122 = vmatprep.mubr.msk.f32.mxu1 %vm7356_vm2, %v7355_v0 }
0x2020   :  { %v5000_v48 = vpop.f32.mrf.mxu1 }
0x2021   :  { %v5004_v35 = vmul.f32 0.35355338, %v5000_v48 }
0x2022   :  { %v7078_v25 = vpop.f32.mrf.mxu1 }
0x2023   :  { %v5005_v33 = vadd.f32 %v5004_v35, %v4927_v61  ;;  %v3606_v25 = vrot.slane %v8700_v13, %v8089_v52 }
0x2025   :  { %v5007_v8 = vsel %vm5006_vm14, %v5005_v33, -inf  ;;  %v3688_v13 = vadd.f32 %v8704_v24, %v3606_v25  ;;  %v5616_v24 = vld [vmem:[%s9102_s0 + $0xd8] sm:$0xff] }
0x2026   :  { %5008 = vmax.xlane.f32.xlu0 %v5007_v8  ;;  %v3693_v8 = vadd.f32 %v8710_v1, %v3606_v25 }
0x2093   :  { %v5169_v53 = vpop.f32.mrf.mxu1 }
0x2094   :  { %v5173_v41 = vmul.f32 0.35355338, %v5169_v53  ;;  %v3683_v53 = vadd.f32 %v8695_v21, %v3606_v25  ;;  %v5615_v21 = vld [vmem:[%s9102_s0 + $0xd0] sm:$0xff] }
0x2095   :  { %v7088_v54 = vpop.f32.mrf.mxu1 }
0x2096   :  { %v5174_v49 = vadd.f32 %v5173_v41, %v4927_v61  ;;  %v5617_v54 = vld [vmem:[%s9102_s0 + $0xe0] sm:$0xff] }
0x2097   :  { %v5337_v22 = vpop.f32.mrf.mxu1  ;;  %7115 = vmatpush3.msra.mxu1 %v5617_v54 }
0x2098   :  { %v5341_v36 = vmul.f32 0.35355338, %v5337_v22  ;;  %v5175_v29 = vsel %vm5006_vm14, %v5174_v49, -inf  ;;  %7116 = vmatprep.subr.mxu1 %v7355_v0 }
0x2099   :  { %5176 = vmax.xlane.f32.xlu1 %v5175_v29  ;;  %v7098_v23 = vpop.f32.mrf.mxu1  ;;  %7117 = vmatpush3.msra.mxu1 %v5616_v24 }
0x209a   :  { %v5342_v9 = vadd.f32 %v5341_v36, %v4927_v61  ;;  %7118 = vmatprep.subr.mxu1 %v7355_v0 }
0x209b   :  { %v5505_v27 = vpop.f32.mrf.mxu1  ;;  %7119 = vmatpush3.msra.mxu1 %v5615_v21 }
0x209c   :  { %v5509_v63 = vmul.f32 0.35355338, %v5505_v27  ;;  %v5343_v28 = vsel %vm5006_vm14, %v5342_v9, -inf  ;;  %7120 = vmatprep.subr.mxu1 %v7355_v0 }
0x209d   :  { %5344 = vmax.xlane.f32.xlu0 %v5343_v28  ;;  %v7108_v16 = vpop.f32.mrf.mxu1 }
0x209e   :  { %v5510_v55 = vadd.f32 %v5509_v63, %v4927_v61 }
0x20a0   :  { %v5511_v26 = vsel %vm5006_vm14, %v5510_v55, -inf }
0x20a1   :  { %5512 = vmax.xlane.f32.xlu0 %v5511_v26 }
0x20aa   :  { %5018 = vrot.lane.b32.xlu1 %v8935_v10, %s7358_s20 }
0x20af   :  { %v5009_v50 = vpop.xlane.xlu0 %5008 }
0x20b0   :  { %v5010_v42 = vsub.f32 %v5005_v33, %v5009_v50 }
0x20b2   :  { %v5011_v45 = vmul.f32 1.442695, %v5010_v42  ;;  %v5621_v42 = vrot.slane %v8898_v51, %v7983_v4 }
0x20b4   :  { %7325 = vpow2.f32 %v5011_v45 }
0x20c1   :  { %v7326_v37 = vpop.eup %7325 }
0x20c2   :  { %v5013_v5 = vsel %vm5006_vm14, %v7326_v37, 0.0 }
0x20ce   :  { %5014 = vadd.xlane.f32.xlu1 %v5013_v5 }
0x2122   :  { %v5177_v43 = vpop.xlane.xlu1 %5176 }
0x2123   :  { %v5178_v20 = vsub.f32 %v5174_v49, %v5177_v43  ;;  %v5614_v49 = vld [vmem:[%s9102_s0 + $0xc8] sm:$0xff] }
0x2124   :  { %7121 = vmatpush3.msra.mxu1 %v5614_v49 }
0x2125   :  { %v5179_v2 = vmul.f32 1.442695, %v5178_v20  ;;  %7134 = vmatprep.subr.mxu1 %v7355_v0 }
0x2126   :  { %v5019_v39 = vpop.permute.xlu1 %5018  ;;  %v5345_v44 = vpop.xlane.xlu0 %5344 }
0x2127   :  { %7327 = vpow2.f32 %v5179_v2  ;;  %v5346_v40 = vsub.f32 %v5342_v9, %v5345_v44  ;;  %7080 = vmatpush3.msk.msra.mxu0 %vm36_vm0, %v5019_v39 }
0x2128   :  { %7089 = vmatprep.subr.mxu0 %v7355_v0 }
0x2129   :  { %v5347_v32 = vmul.f32 1.442695, %v5346_v40 }
0x212a   :  { %v5513_v7 = vpop.xlane.xlu0 %5512 }
0x212b   :  { %7329 = vpow2.f32 %v5347_v32  ;;  %v5514_v60 = vsub.f32 %v5510_v55, %v5513_v7 }
0x212d   :  { %v5515_v46 = vmul.f32 1.442695, %v5514_v60 }
0x212f   :  { %7331 = vpow2.f32 %v5515_v46 }
0x2134   :  { %v7328_v12 = vpop.eup %7327 }
0x2135   :  { %v5181_v38 = vsel %vm5006_vm14, %v7328_v12, 0.0 }
0x2136   :  { %5182 = vadd.xlane.f32.xlu0 %v5181_v38  ;;  %v5797_v38 = vld [vmem:[%s9102_s0 + $0x150] sm:$0x3] }
0x2138   :  { %v7330_v56 = vpop.eup %7329 }
0x2139   :  { %v5349_v34 = vsel %vm5006_vm14, %v7330_v56, 0.0 }
0x213a   :  { %5350 = vadd.xlane.f32.xlu1 %v5349_v34  ;;  %v5795_v34 = vld [vmem:[%s9102_s0 + $0x140] sm:$0xff] }
0x213c   :  { %v7332_v57 = vpop.eup %7331 }
0x213d   :  { %v5517_v11 = vsel %vm5006_vm14, %v7332_v57, 0.0 }
0x213e   :  { %5518 = vadd.xlane.f32.xlu0 %v5517_v11 }
0x214b   :  { %5354 = vrot.lane.b32.xlu1 %v8935_v10, %s7361_s29 }
0x214f   :  { %5522 = vrot.lane.b32.xlu1 %v8935_v10, %s7363_s4 }
0x2154   :  { %5186 = vrot.lane.b32.xlu0 %v8935_v10, %s7360_s28 }
0x2157   :  { %v5015_v15 = vpop.xlane.xlu1 %5014 }
0x2158   :  { %7333 = vrcp.f32 %v5015_v15 }
0x2165   :  { %v7334_v18 = vpop.eup %7333 }
0x2166   :  { %v5017_v30 = vmul.f32 %v7334_v18, %v7326_v37 }
0x2168   :  { %7082 = vmatmul.mubr.msk.f32.vlgmr.msra.gmra.mxu0 %vm26_vm1, %v5017_v30  ;;  %v5889_v30 = vld [vmem:[%s9102_s0 + $0xe8] sm:$0xff] }
0x2169   :  { %7091 = vmatprep.mubr.msk.f32.mxu0 %vm7356_vm2, %v7355_v0 }
0x21bf   :  { %v5183_v47 = vpop.xlane.xlu0 %5182 }
0x21c0   :  { %7335 = vrcp.f32 %v5183_v47 }
0x21c3   :  { %v5351_v59 = vpop.xlane.xlu1 %5350 }
0x21c4   :  { %7337 = vrcp.f32 %v5351_v59 }
0x21c7   :  { %v5519_v62 = vpop.xlane.xlu0 %5518  ;;  %v5355_v10 = vpop.permute.xlu1 %5354 }
0x21c8   :  { %7339 = vrcp.f32 %v5519_v62 }
0x21cb   :  { %v5187_v14 = vpop.permute.xlu0 %5186  ;;  %v5523_v48 = vpop.permute.xlu1 %5522 }
0x21cc   :  { %7090 = vmatpush3.msk.msra.mxu0 %vm36_vm0, %v5187_v14  ;;  %v5977_v14 = vld [vmem:[%s9102_s0 + $0x110] sm:$0xff] }
0x21cd   :  { %v7336_v3 = vpop.eup %7335  ;;  %7099 = vmatprep.subr.mxu0 %v7355_v0 }
0x21ce   :  { %v5185_v19 = vmul.f32 %v7336_v3, %v7328_v12  ;;  %v5976_v3 = vld [vmem:[%s9102_s0 + $0x108] sm:$0xff] }
0x21d0   :  { %7092 = vmatmul.mubr.msk.f32.vlgmr.msra.gmra.mxu0 %vm26_vm1, %v5185_v19  ;;  %v5974_v19 = vld [vmem:[%s9102_s0 + $0xf8] sm:$0xff] }
0x21d1   :  { %v7338_v6 = vpop.eup %7337  ;;  %7100 = vmatpush3.msk.msra.mxu0 %vm36_vm0, %v5355_v10  ;;  %7101 = vmatprep.mubr.msk.f32.mxu0 %vm7356_vm2, %v7355_v0  ;;  %v5975_v10 = vld [vmem:[%s9102_s0 + $0x100] sm:$0xff] }
0x21d2   :  { %7109 = vmatprep.subr.mxu0 %v7355_v0  ;;  %v5353_v61 = vmul.f32 %v7338_v6, %v7330_v56  ;;  %v5796_v56 = vld [vmem:[%s9102_s0 + $0x148] sm:$0xff]  ;;  %v5879_v6 = vand.u32 127, %v158_v58 }
0x21d4   :  { %7102 = vmatmul.mubr.msk.f32.vlgmr.msra.gmra.mxu0 %vm26_vm1, %v5353_v61  ;;  %v5880_v61 = vcvt.s32.f32 %v5879_v6 }
0x21d5   :  { %v7340_v35 = vpop.eup %7339  ;;  %7110 = vmatpush3.msk.msra.mxu0 %vm36_vm0, %v5523_v48  ;;  %7111 = vmatprep.mubr.msk.f32.mxu0 %vm7356_vm2, %v7355_v0  ;;  %vm5895_vm0 = vcmask 72704  }
0x21d6   :  { %7125 = vmatprep.subr.mxu0 %v7355_v0  ;;  %v5521_v33 = vmul.f32 %v7340_v35, %v7332_v57  ;;  %v5890_v57 = vld [vmem:[%s9102_s0 + $0xf0] sm:$0x1]  ;;  %s7378_s0 = smov 2  }
0x21d8   :  { %7112 = vmatmul.mubr.msk.f32.vlgmr.msra.gmra.mxu0 %vm26_vm1, %v5521_v33  ;;  %vm5874_vm1 = vcmask 66560   ;;  %v5894_v33 = vrot.slane %v8898_v51, %v7991_v31 }
0x21d9   :  { %7126 = vmatpush3.xpose.msk.msra.mxu0 %vm120_vm5, %v3693_v8  ;;  %7131 = vmatprep.mubr.msk.f32.mxu0 %vm7356_vm2, %v7355_v0 }
0x21da   :  { %7127 = vmatprep.subr.mxu0 %v7355_v0 }
0x21dd   :  { %7128 = vmatpush3.xpose.msk.msra.mxu0 %vm120_vm5, %v3688_v13 }
0x21de   :  { %7129 = vmatprep.subr.mxu0 %v7355_v0 }
0x21e1   :  { %7130 = vmatpush3.xpose.msk.msra.mxu0 %vm120_vm5, %v3683_v53 }
0x21e2   :  { %7143 = vmatprep.subr.mxu0 %v7355_v0 }
0x2228   :  { %v5091_v1 = vpop.f32.mrf.mxu0 }
0x222a   :  { %v7083_v41 = vpop.f32.mrf.mxu0 }
0x2290   :  { %v5259_v22 = vpop.f32.mrf.mxu0 }
0x2291   :  { %5600 = vrot.lane.b32.xlu0 %v5259_v22, %s7372_s17  ;;  %s7376_s17 = smov 118  }
0x2292   :  { %v7093_v36 = vpop.f32.mrf.mxu0 }
0x2294   :  { %v5427_v29 = vpop.f32.mrf.mxu0 }
0x2295   :  { %5604 = vrot.lane.b32.xlu1 %v5427_v29, %s7373_s26 }
0x2296   :  { %v7103_v23 = vpop.f32.mrf.mxu0 }
0x2298   :  { %v5595_v9 = vpop.f32.mrf.mxu0 }
0x2299   :  { %5608 = vrot.lane.b32.xlu0 %v5595_v9, %s7374_s10  ;;  %5780 = vrot.lane.b32.xlu1 %v8688_v17, %s7376_s17 }
0x229a   :  { %v7113_v27 = vpop.f32.mrf.mxu0 }
0x2303   :  { %v5601_v63 = vpop.permute.xlu0 %5600 }
0x2304   :  { %v5611_v16 = vsel %vm436_vm8, %v5091_v1, %v5601_v63 }
0x2307   :  { %v5605_v28 = vpop.permute.xlu1 %5604 }
0x2308   :  { %v5612_v55 = vsel %vm1523_vm9, %v5611_v16, %v5605_v28 }
0x230b   :  { %v5609_v26 = vpop.permute.xlu0 %5608  ;;  %v5781_v44 = vpop.permute.xlu1 %5780 }
0x230c   :  { %v5613_v50 = vsel %vm1527_vm10, %v5612_v55, %v5609_v26 }
0x230d   :  { %7123 = vmatmul.mubr.msk.f32.vlgmr.msra.gmra.mxu1 %vm120_vm5, %v5613_v50 }
0x230e   :  { %7140 = vmatprep.mubr.msk.f32.mxu1 %vm7356_vm2, %v7355_v0  ;;  %7135 = vmatpush3.msk.msra.mxu1 %vm193_vm7, %v5797_v38  ;;  %vm6068_vm7 = vcmask 97280  }
0x230f   :  { %7136 = vmatprep.subr.mxu1 %v7355_v0 }
0x2310   :  { %7137 = vmatpush3.msra.mxu1 %v5796_v56 }
0x2311   :  { %7138 = vmatprep.subr.mxu1 %v7355_v0 }
0x2312   :  { %7139 = vmatpush3.msra.mxu1 %v5795_v34 }
0x2313   :  { %7150 = vmatprep.subr.mxu1 %v7355_v0 }
0x23cd   :  { %v5691_v45 = vpop.f32.mrf.mxu1 }
0x23ce   :  { %v5692_v37 = vadd.f32 %v5691_v45, %v5621_v42 }
0x23cf   :  { %v7124_v5 = vpop.f32.mrf.mxu1 }
0x23d0   :  { %7132 = vmatmul.mubr.msk.f32.vlgmr.msra.gmra.mxu0 %vm120_vm5, %v5692_v37 }
0x23d1   :  { %7147 = vmatprep.mubr.msk.f32.mxu0 %vm7356_vm2, %v7355_v0  ;;  %7144 = vmatpush3.msk.msra.mxu0 %vm5899_vm15, %v5890_v57 }
0x23d2   :  { %7145 = vmatprep.subr.mxu0 %v7355_v0 }
0x23d3   :  { %7146 = vmatpush3.msra.mxu0 %v5889_v30 }
0x2490   :  { %v5773_v43 = vpop.f32.mrf.mxu0 }
0x2491   :  { %v5777_v20 = vmul.f32 5.656854, %v5773_v43 }
0x2492   :  { %v7133_v2 = vpop.f32.mrf.mxu0 }
0x2493   :  { %7341 = vtanh.f32 %v5777_v20 }
0x24a0   :  { %v7342_v39 = vpop.eup %7341 }
0x24a1   :  { %v5779_v40 = vmul.f32 10.0, %v7342_v39 }
0x24a3   :  { %v5783_v32 = vadd.f32 %v5781_v44, %v5779_v40 }
0x24a5   :  { %v5784_v17 = vsel %vm188_vm4, %v5783_v32, -inf }
0x24a6   :  { %5785 = vmax.xlane.f32.xlu0 %v5784_v17 }
0x252f   :  { %v5786_v4 = vpop.xlane.xlu0 %5785 }
0x2530   :  { %v5787_v7 = vsub.f32 %v5783_v32, %v5786_v4 }
0x2532   :  { %v5788_v60 = vmul.f32 1.442695, %v5787_v7 }
0x2534   :  { %7343 = vpow2.f32 %v5788_v60 }
0x2541   :  { %v7344_v46 = vpop.eup %7343 }
0x2542   :  { %v5790_v12 = vsel %vm188_vm4, %v7344_v46, 0.0  ;;  %vm6064_vm4 = vcmask 15360  }
0x2543   :  { %5791 = vadd.xlane.f32.xlu1 %v5790_v12 }
0x25cc   :  { %v5792_v11 = vpop.xlane.xlu1 %5791 }
0x25cd   :  { %7345 = vrcp.f32 %v5792_v11 }
0x25da   :  { %v7346_v15 = vpop.eup %7345 }
0x25db   :  { %v5794_v18 = vmul.f32 %v7346_v15, %v7344_v46 }
0x25dd   :  { %7141 = vmatmul.mubr.msk.f32.vlgmr.msra.gmra.mxu1 %vm181_vm3, %v5794_v18  ;;  %vm6062_vm3 = vcmask 7168  }
0x25de   :  { %7158 = vmatprep.mubr.msk.f32.mxu1 %vm7356_vm2, %v7355_v0  ;;  %7151 = vmatpush3.msra.mxu1 %v5977_v14 }
0x25df   :  { %7152 = vmatprep.subr.mxu1 %v7355_v0 }
0x25e0   :  { %7153 = vmatpush3.msra.mxu1 %v5976_v3 }
0x25e1   :  { %7154 = vmatprep.subr.mxu1 %v7355_v0 }
0x25e2   :  { %7155 = vmatpush3.msra.mxu1 %v5975_v10 }
0x25e3   :  { %7156 = vmatprep.subr.mxu1 %v7355_v0  ;;  %v5981_v0 = vrot.slane %v8898_v51, %v8089_v52 }
0x25e4   :  { %7157 = vmatpush3.msra.mxu1 %v5974_v19 }
0x269d   :  { %v5870_v47 = vpop.f32.mrf.mxu1 }
0x269e   :  { %7148 = vmatmul.mubr.msk.f32.vlgmr.msra.gmra.mxu0 %vm5895_vm0, %v5870_v47  ;;  %v5875_v59 = vsel %vm5874_vm1, %v5870_v47, -inf }
0x269f   :  { %5876 = vmax.xlane.f32.xlu0 %v5875_v59  ;;  %v7142_v62 = vpop.f32.mrf.mxu1 }
0x2728   :  { %v5877_v48 = vpop.xlane.xlu0 %5876 }
0x2729   :  { %vm5881_vm2 = vcmp.ge.f32.partialorder %v5870_v47, %v5877_v48  ;;  %v5886_v24 = vadd.f32 1e-20, %v5877_v48 }
0x272a   :  { %v5882_v35 = vsel %vm5881_vm2, %v5880_v61, 9.0 }
0x272b   :  { %v5883_v25 = vsel %vm5874_vm1, %v5882_v35, inf  ;;  %7347 = vlog2.f32 %v5886_v24 }
0x272c   :  { %5884 = vmin.xlane.f32.xlu0 %v5883_v25 }
0x2738   :  { %v7348_v21 = vpop.eup %7347 }
0x2739   :  { %v5888_v31 = vmul.f32 0.6931472, %v7348_v21 }
0x2742   :  { %6059 = vrot.lane.b32.xlu0 %v5870_v47, %s7377_s30 }
0x275e   :  { %v5969_v8 = vpop.f32.mrf.mxu0 }
0x275f   :  { %v5970_v13 = vadd.f32 %v5969_v8, %v5894_v33 }
0x2760   :  { %v7149_v53 = vpop.f32.mrf.mxu0 }
0x2761   :  { %v5973_v1 = vmax.f32 %v5970_v13, 0.0 }
0x2763   :  { %7159 = vmatmul.mubr.msk.f32.vlgmr.msra.gmra.mxu1 %vm120_vm5, %v5973_v1 }
0x27b5   :  { %v5885_v49 = vpop.xlane.xlu0 %5884 }
0x27b6   :  { %v6063_v22 = vsel %vm6062_vm3, %v5885_v49, %v5888_v31 }
0x27b9   :  { %v6060_v29 = vpop.permute.xlu0 %6059 }
0x2823   :  { %v6051_v58 = vpop.f32.mrf.mxu1 }
0x2824   :  { %v6052_v41 = vadd.f32 %v6051_v58, %v5981_v0 }
0x2825   :  { %v7160_v54 = vpop.f32.mrf.mxu1 }
0x2826   :  { %6056 = vrot.lane.b32.xlu1 %v6052_v41, %s7378_s0 }
0x2898   :  { %v6057_v36 = vpop.permute.xlu1 %6056 }
0x2899   :  { %v6065_v23 = vsel %vm6064_vm4, %v6063_v22, %v6057_v36 }
0x289a   :  { %v6067_v9 = vsel %vm6066_vm6, %v6065_v23, %v6060_v29 }
0x289b   :  { %v6069_v52 = vsel %vm6068_vm7, %v6067_v9, 0.0 }
0x289c   :  { %6070 = vst [vmem:[%s9104_s3] sm:$0x3] %v6069_v52 }

</bundles_post_ra>
